<compile_context>
chip_gen: v7x
topology: tpu7x:2x2x1
jax: 0.10.0
libtpu: 0.0.40
codegen_flags: <defaults>
</compile_context>

<pallas_src>
import functools
import math

import jax
import jax.numpy as jnp
from jax import lax
from jax.experimental import pallas as pl
from jax.experimental.pallas import tpu as pltpu


def _layer_norm(x, gamma, beta, eps=1e-5):
    mean = jnp.mean(x, axis=-1, keepdims=True)
    var = jnp.mean((x - mean) ** 2, axis=-1, keepdims=True)
    return (x - mean) * lax.rsqrt(var + eps) * gamma + beta


def transformer_layer_kernel(
    x_ref,        # (S, E)    f32  one batch element's activations
    w_in_ref,     # (3E, E)   bf16 in_proj_weight (q rows pre-scaled by 1/sqrt(Dh))
    b_in_ref,     # (3H, Dh)  f32  in_proj_bias, head-major (q part pre-scaled)
    w_out_ref,    # (H, E, Dh) bf16 out_proj.weight split per head
    b_out_ref,    # (1, E)    f32
    w1_ref,       # (FF, E)   bf16 feed_forward[0].weight
    b1_ref,       # (1, FF)   f32
    w2_ref,       # (E, FF)   bf16 feed_forward[2].weight
    b2_ref,       # (1, E)    f32
    g1_ref,       # (1, E)    f32  norm1.weight
    be1_ref,      # (1, E)    f32  norm1.bias
    g2_ref,       # (1, E)    f32  norm2.weight
    be2_ref,      # (1, E)    f32  norm2.bias
    o_ref,        # (S, E)    f32
    *,
    nhead: int,
):
    S, E = x_ref.shape
    H = nhead
    Dh = E // H

    x = x_ref[...]                         # f32, kept for the residual stream
    x_bf = x.astype(jnp.bfloat16)          # bf16 copy for the MXU
    w_in = w_in_ref[...]                   # (3E, E) bf16
    b_in = b_in_ref[...]                   # (3H, Dh) f32

    def mm_t(a_bf, w_bf):
        # a @ w.T with bf16 MXU inputs and f32 accumulation; no transpose.
        return lax.dot_general(
            a_bf, w_bf,
            dimension_numbers=(((1,), (1,)), ((), ())),
            preferred_element_type=jnp.float32,
        )

    # ---- multi-head self-attention -----------------------------------------
    # Heads are split at the weight level: sublane-aligned row slices of w_in
    # and leading-dim slices of w_out / b_in.  No 32-lane activation slices,
    # no lane-dim concatenates; the head merge is an accumulated out-proj.
    attn = jnp.zeros((S, E), jnp.float32)
    for h in range(H):                      # static unroll, H small
        wq = w_in[h * Dh:(h + 1) * Dh, :]                   # (Dh, E)
        wk = w_in[E + h * Dh:E + (h + 1) * Dh, :]
        wv = w_in[2 * E + h * Dh:2 * E + (h + 1) * Dh, :]
        bq = b_in[h:h + 1, :]                               # (1, Dh)
        bk = b_in[H + h:H + h + 1, :]
        bv = b_in[2 * H + h:2 * H + h + 1, :]

        q = mm_t(x_bf, wq) + bq             # (S, Dh) f32, scale already folded
        k = mm_t(x_bf, wk) + bk
        v = mm_t(x_bf, wv) + bv

        s = mm_t(q.astype(jnp.bfloat16), k.astype(jnp.bfloat16))   # (S, S) f32
        s = s - jnp.max(s, axis=-1, keepdims=True)
        p = jnp.exp(s)
        denom = jnp.sum(p, axis=-1, keepdims=True)
        p = (p * pl.reciprocal(denom, approx=True)).astype(jnp.bfloat16)

        ctx = jnp.dot(p, v.astype(jnp.bfloat16),
                      preferred_element_type=jnp.float32)          # (S, Dh)
        attn = attn + mm_t(ctx.astype(jnp.bfloat16), w_out_ref[h])  # (S, E)

    attn = attn + b_out_ref[...]

    # ---- residual + norm1 (dropout == identity in eval mode) ---------------
    x1 = _layer_norm(x + attn, g1_ref[...], be1_ref[...])

    # ---- feed-forward: Linear -> GELU (tanh -> EUP) -> Linear ---------------
    h1 = mm_t(x1.astype(jnp.bfloat16), w1_ref[...]) + b1_ref[...]   # (S, FF)
    h1 = jax.nn.gelu(h1, approximate=True)
    ff = mm_t(h1.astype(jnp.bfloat16), w2_ref[...]) + b2_ref[...]   # (S, E)

    # ---- residual + norm2 ----------------------------------------------------
    x2 = _layer_norm(x1 + ff, g2_ref[...], be2_ref[...])
    o_ref[...] = x2.astype(o_ref.dtype)


def _rep_spec(shape):
    """Grid-invariant (weight/bias) block: whole array, single VMEM buffer."""
    index_map = lambda i: (0,) * len(shape)
    try:
        return pl.BlockSpec(shape, index_map, pipeline_mode=pl.Buffered(1))
    except Exception:  # older jax without pipeline_mode / Buffered
        return pl.BlockSpec(shape, index_map)


def _vmem_capacity_bytes():
    try:
        cap = getattr(pltpu.get_tpu_info(), "vmem_capacity_bytes", None)
        if cap:
            return int(cap)
    except Exception:
        pass
    return 128 << 20   # conservative fallback; the limit below is clamped far lower


def transformer_layer(x_sbe, params, *, nhead):
    """x_sbe: (S, B, E), PyTorch nn.MultiheadAttention default layout."""
    S, B, E = x_sbe.shape
    FF = params["w1"].shape[0]
    H = nhead
    assert E % H == 0
    Dh = E // H
    scale = 1.0 / math.sqrt(Dh)

    # ---- one-time weight massaging (weights only, no activation round trips) -
    # Fold 1/sqrt(Dh) into the q rows/bias of the in-projection; cast MXU
    # operands to bf16; split out_proj.weight per head: (E, E) -> (H, E, Dh).
    w_in = params["w_in"]
    w_in_k = jnp.concatenate([w_in[:E] * scale, w_in[E:]], axis=0).astype(jnp.bfloat16)
    b_in = params["b_in"].reshape(3 * H, Dh)
    b_in_k = jnp.concatenate([b_in[:H] * scale, b_in[H:]], axis=0).astype(jnp.float32)
    w_out_k = jnp.transpose(params["w_out"].reshape(E, H, Dh), (1, 0, 2)).astype(jnp.bfloat16)
    w1_k = params["w1"].astype(jnp.bfloat16)
    w2_k = params["w2"].astype(jnp.bfloat16)

    # Keep activations in (S, B, E); merging the two minor dims is a free
    # reshape, and each grid step then sees a lane/sublane-dense (S, E) slab
    # belonging to exactly one batch element (what attention needs).
    x2d = x_sbe.reshape(S, B * E)

    grid = (B,)   # >= 2 steps: x/o DMA pipelining + dual-TC sharding on v7x

    weight_args = (
        w_in_k, b_in_k, w_out_k, params["b_out"], w1_k, params["b1"],
        w2_k, params["b2"], params["g1"], params["be1"], params["g2"], params["be2"],
    )
    param_bytes = sum(int(a.size) * a.dtype.itemsize for a in weight_args)

    # ---- advisory cost estimate + generation-aware VMEM budget ---------------
    flops = int(2 * B * S * E * (4 * E + 2 * FF) + 4 * B * S * S * E)
    transcendentals = int(B * H * S * S + B * S * FF)
    bytes_accessed = int(2 * B * S * E * 4 + param_bytes)  # weights DMA'd once (constant block)

    act_bytes = 4 * (6 * S * E + 2 * S * S + 2 * S * FF)    # live f32-equiv intermediates
    needed = param_bytes + 2 * 2 * S * E * 4 + act_bytes + (8 << 20)
    cap = _vmem_capacity_bytes()
    vmem_limit = int(min(max(needed, 32 << 20), cap - (12 << 20)))

    kernel = functools.partial(transformer_layer_kernel, nhead=nhead)

    out2d = pl.pallas_call(
        kernel,
        out_shape=jax.ShapeDtypeStruct((S, B * E), x_sbe.dtype),
        grid_spec=pltpu.PrefetchScalarGridSpec(
            num_scalar_prefetch=0,
            grid=grid,
            in_specs=[
                pl.BlockSpec((S, E), lambda i: (0, i)),     # x: one batch slab
                _rep_spec((3 * E, E)),                      # w_in
                _rep_spec((3 * H, Dh)),                     # b_in (head-major)
                _rep_spec((H, E, Dh)),                      # w_out per head
                _rep_spec((1, E)),                          # b_out
                _rep_spec((FF, E)),                         # w1
                _rep_spec((1, FF)),                         # b1
                _rep_spec((E, FF)),                         # w2
                _rep_spec((1, E)),                          # b2
                _rep_spec((1, E)),                          # g1
                _rep_spec((1, E)),                          # be1
                _rep_spec((1, E)),                          # g2
                _rep_spec((1, E)),                          # be2
            ],
            out_specs=pl.BlockSpec((S, E), lambda i: (0, i)),
        ),
        compiler_params=pltpu.CompilerParams(
            dimension_semantics=("parallel",),
            vmem_limit_bytes=vmem_limit,
        ),
        cost_estimate=pl.CostEstimate(
            flops=flops,
            transcendentals=transcendentals,
            bytes_accessed=bytes_accessed,
        ),
    )(x2d, *weight_args)

    return out2d.reshape(S, B, E)


def reference_transformer_layer(x_sbe, params, *, nhead):
    """Pure-JAX exact-f32 reference matching PyTorch semantics (eval mode)."""
    S, B, E = x_sbe.shape
    Dh = E // nhead
    x = jnp.transpose(x_sbe, (1, 0, 2))                    # (B, S, E)

    qkv = jnp.einsum("bse,fe->bsf", x, params["w_in"]) + params["b_in"][0]
    q, k, v = jnp.split(qkv, 3, axis=-1)

    def split_heads(t):                                    # (B,S,E) -> (B,H,S,Dh)
        return jnp.transpose(t.reshape(B, S, nhead, Dh), (0, 2, 1, 3))

    qh, kh, vh = map(split_heads, (q, k, v))
    scores = jnp.einsum("bhsd,bhtd->bhst", qh, kh) / math.sqrt(Dh)
    p = jax.nn.softmax(scores, axis=-1)
    attn = jnp.einsum("bhst,bhtd->bhsd", p, vh)
    attn = jnp.transpose(attn, (0, 2, 1, 3)).reshape(B, S, E)
    attn = jnp.einsum("bse,fe->bsf", attn, params["w_out"]) + params["b_out"][0]

    x1 = _layer_norm(x + attn, params["g1"][0], params["be1"][0])
    h1 = jnp.einsum("bse,fe->bsf", x1, params["w1"]) + params["b1"][0]
    h1 = jax.nn.gelu(h1, approximate=False)
    ff = jnp.einsum("bsf,ef->bse", h1, params["w2"]) + params["b2"][0]
    x2 = _layer_norm(x1 + ff, params["g2"][0], params["be2"][0])
    return jnp.transpose(x2, (1, 0, 2))


def make_params(key, d_model, dim_feedforward):
    ks = jax.random.split(key, 8)
    scale = 0.02
    return {
        "w_in": scale * jax.random.normal(ks[0], (3 * d_model, d_model), jnp.float32),
        "b_in": scale * jax.random.normal(ks[1], (1, 3 * d_model), jnp.float32),
        "w_out": scale * jax.random.normal(ks[2], (d_model, d_model), jnp.float32),
        "b_out": scale * jax.random.normal(ks[3], (1, d_model), jnp.float32),
        "w1": scale * jax.random.normal(ks[4], (dim_feedforward, d_model), jnp.float32),
        "b1": scale * jax.random.normal(ks[5], (1, dim_feedforward), jnp.float32),
        "w2": scale * jax.random.normal(ks[6], (d_model, dim_feedforward), jnp.float32),
        "b2": scale * jax.random.normal(ks[7], (1, d_model), jnp.float32),
        "g1": jnp.ones((1, d_model), jnp.float32),
        "be1": jnp.zeros((1, d_model), jnp.float32),
        "g2": jnp.ones((1, d_model), jnp.float32),
        "be2": jnp.zeros((1, d_model), jnp.float32),
    }


if __name__ == "__main__":
    # Tile-friendly shapes: E = 128 lanes, S = 128 (lane-dense score path),
    # B = 4 -> grid of 4 parallel steps.
    S, B, d_model, nhead, dim_ff = 128, 4, 128, 4, 256
    key = jax.random.PRNGKey(0)
    kx, kp = jax.random.split(key)
    x = jax.random.normal(kx, (S, B, d_model), jnp.float32)
    params = make_params(kp, d_model, dim_ff)

    out = jax.block_until_ready(transformer_layer(x, params, nhead=nhead))
    ref = reference_transformer_layer(x, params, nhead=nhead)

    assert out.shape == (S, B, d_model)
    err = float(jnp.max(jnp.abs(out - ref)))
    # Tolerance 2e-2: bf16 MXU inputs, tanh GELU and the approx (EUP)
    # reciprocal in the softmax all deviate slightly from the exact-f32
    # reference; expected max-abs error is ~1e-3 with generous margin here.
    assert err < 2e-2, f"max abs err {err}"

    print("KERNEL_OK")
</pallas_src>

<mosaic_0001>
module attributes {stable_mosaic.version = 11 : i64} {
  func.func @transformer_layer_kernel(%arg0: i32, %arg1: memref<128x128xf32, #tpu.memory_space<vmem>>, %arg2: memref<384x128xbf16, #tpu.memory_space<vmem>>, %arg3: memref<12x32xf32, #tpu.memory_space<vmem>>, %arg4: memref<4x128x32xbf16, #tpu.memory_space<vmem>>, %arg5: memref<1x128xf32, #tpu.memory_space<vmem>>, %arg6: memref<256x128xbf16, #tpu.memory_space<vmem>>, %arg7: memref<1x256xf32, #tpu.memory_space<vmem>>, %arg8: memref<128x256xbf16, #tpu.memory_space<vmem>>, %arg9: memref<1x128xf32, #tpu.memory_space<vmem>>, %arg10: memref<1x128xf32, #tpu.memory_space<vmem>>, %arg11: memref<1x128xf32, #tpu.memory_space<vmem>>, %arg12: memref<1x128xf32, #tpu.memory_space<vmem>>, %arg13: memref<1x128xf32, #tpu.memory_space<vmem>>, %arg14: memref<128x128xf32, #tpu.memory_space<vmem>>) attributes {dimension_semantics = [#tpu.dimension_semantics<parallel>], iteration_bounds = array<i64: 4>, scalar_prefetch = 0 : i64, scratch_operands = 0 : i64, tpu.core_type = #tpu.core_type<tc>, window_params = [{transform_indices = @transform_0, window_bounds = array<i64: 128, 128>}, {pipeline_mode = #tpu.pipeline_mode<synchronous>, transform_indices = @transform_1, window_bounds = array<i64: 384, 128>}, {pipeline_mode = #tpu.pipeline_mode<synchronous>, transform_indices = @transform_2, window_bounds = array<i64: 12, 32>}, {pipeline_mode = #tpu.pipeline_mode<synchronous>, transform_indices = @transform_3, window_bounds = array<i64: 4, 128, 32>}, {pipeline_mode = #tpu.pipeline_mode<synchronous>, transform_indices = @transform_4, window_bounds = array<i64: 1, 128>}, {pipeline_mode = #tpu.pipeline_mode<synchronous>, transform_indices = @transform_5, window_bounds = array<i64: 256, 128>}, {pipeline_mode = #tpu.pipeline_mode<synchronous>, transform_indices = @transform_6, window_bounds = array<i64: 1, 256>}, {pipeline_mode = #tpu.pipeline_mode<synchronous>, transform_indices = @transform_7, window_bounds = array<i64: 128, 256>}, {pipeline_mode = #tpu.pipeline_mode<synchronous>, transform_indices = @transform_8, window_bounds = array<i64: 1, 128>}, {pipeline_mode = #tpu.pipeline_mode<synchronous>, transform_indices = @transform_9, window_bounds = array<i64: 1, 128>}, {pipeline_mode = #tpu.pipeline_mode<synchronous>, transform_indices = @transform_10, window_bounds = array<i64: 1, 128>}, {pipeline_mode = #tpu.pipeline_mode<synchronous>, transform_indices = @transform_11, window_bounds = array<i64: 1, 128>}, {pipeline_mode = #tpu.pipeline_mode<synchronous>, transform_indices = @transform_12, window_bounds = array<i64: 1, 128>}, {transform_indices = @transform_13, window_bounds = array<i64: 128, 128>}]} {
    %c0 = arith.constant 0 : index
    %c0_0 = arith.constant 0 : index
    %0 = vector.load %arg1[%c0, %c0_0] : memref<128x128xf32, #tpu.memory_space<vmem>>, vector<128x128xf32>
    %1 = arith.truncf %0 : vector<128x128xf32> to vector<128x128xbf16>
    %c0_1 = arith.constant 0 : index
    %c0_2 = arith.constant 0 : index
    %2 = vector.load %arg2[%c0_1, %c0_2] : memref<384x128xbf16, #tpu.memory_space<vmem>>, vector<384x128xbf16>
    %c0_3 = arith.constant 0 : index
    %c0_4 = arith.constant 0 : index
    %3 = vector.load %arg3[%c0_3, %c0_4] : memref<12x32xf32, #tpu.memory_space<vmem>>, vector<12x32xf32>
    %cst = arith.constant 0.000000e+00 : f32
    %4 = vector.broadcast %cst : f32 to vector<128x128xf32>
    %5 = vector.extract_strided_slice %2 {offsets = [0, 0], sizes = [32, 128], strides = [1, 1]} : vector<384x128xbf16> to vector<32x128xbf16>
    %6 = vector.extract_strided_slice %2 {offsets = [128, 0], sizes = [32, 128], strides = [1, 1]} : vector<384x128xbf16> to vector<32x128xbf16>
    %7 = vector.extract_strided_slice %2 {offsets = [256, 0], sizes = [32, 128], strides = [1, 1]} : vector<384x128xbf16> to vector<32x128xbf16>
    %8 = vector.extract_strided_slice %3 {offsets = [0, 0], sizes = [1, 32], strides = [1, 1]} : vector<12x32xf32> to vector<1x32xf32>
    %9 = vector.extract_strided_slice %3 {offsets = [4, 0], sizes = [1, 32], strides = [1, 1]} : vector<12x32xf32> to vector<1x32xf32>
    %10 = vector.extract_strided_slice %3 {offsets = [8, 0], sizes = [1, 32], strides = [1, 1]} : vector<12x32xf32> to vector<1x32xf32>
    %cst_5 = arith.constant dense<0.000000e+00> : vector<128x32xf32>
    %11 = tpu.matmul %1, %5, %cst_5 {dimension_numbers = #tpu.dot_dimension_numbers<[1], [1], [0], [0], [0, 0, 1, 0], [], []>} : vector<128x128xbf16>, vector<32x128xbf16>, vector<128x32xf32> -> vector<128x32xf32>
    %12 = vector.broadcast %8 : vector<1x32xf32> to vector<128x32xf32>
    %13 = arith.addf %11, %12 : vector<128x32xf32>
    %cst_6 = arith.constant dense<0.000000e+00> : vector<128x32xf32>
    %14 = tpu.matmul %1, %6, %cst_6 {dimension_numbers = #tpu.dot_dimension_numbers<[1], [1], [0], [0], [0, 0, 1, 0], [], []>} : vector<128x128xbf16>, vector<32x128xbf16>, vector<128x32xf32> -> vector<128x32xf32>
    %15 = vector.broadcast %9 : vector<1x32xf32> to vector<128x32xf32>
    %16 = arith.addf %14, %15 : vector<128x32xf32>
    %cst_7 = arith.constant dense<0.000000e+00> : vector<128x32xf32>
    %17 = tpu.matmul %1, %7, %cst_7 {dimension_numbers = #tpu.dot_dimension_numbers<[1], [1], [0], [0], [0, 0, 1, 0], [], []>} : vector<128x128xbf16>, vector<32x128xbf16>, vector<128x32xf32> -> vector<128x32xf32>
    %18 = vector.broadcast %10 : vector<1x32xf32> to vector<128x32xf32>
    %19 = arith.addf %17, %18 : vector<128x32xf32>
    %20 = arith.truncf %13 : vector<128x32xf32> to vector<128x32xbf16>
    %21 = arith.truncf %16 : vector<128x32xf32> to vector<128x32xbf16>
    %cst_8 = arith.constant dense<0.000000e+00> : vector<128x128xf32>
    %22 = tpu.matmul %20, %21, %cst_8 {dimension_numbers = #tpu.dot_dimension_numbers<[1], [1], [0], [0], [0, 0, 1, 0], [], []>} : vector<128x32xbf16>, vector<128x32xbf16>, vector<128x128xf32> -> vector<128x128xf32>
    %cst_9 = arith.constant dense<0xFF800000> : vector<128xf32>
    %23 = vector.multi_reduction <maximumf>, %22, %cst_9 [1] : vector<128x128xf32> to vector<128xf32>
    %24 = vector.shape_cast %23 : vector<128xf32> to vector<128x1xf32>
    %25 = vector.broadcast %24 : vector<128x1xf32> to vector<128x128xf32>
    %26 = arith.subf %22, %25 : vector<128x128xf32>
    %27 = math.exp %26 : vector<128x128xf32>
    %cst_10 = arith.constant dense<0.000000e+00> : vector<128xf32>
    %28 = vector.multi_reduction <add>, %27, %cst_10 [1] : vector<128x128xf32> to vector<128xf32>
    %29 = vector.shape_cast %28 : vector<128xf32> to vector<128x1xf32>
    %30 = tpu.reciprocal %29 {approx = true} : vector<128x1xf32> -> vector<128x1xf32>
    %31 = vector.broadcast %30 : vector<128x1xf32> to vector<128x128xf32>
    %32 = arith.mulf %27, %31 : vector<128x128xf32>
    %33 = arith.truncf %32 : vector<128x128xf32> to vector<128x128xbf16>
    %34 = arith.truncf %19 : vector<128x32xf32> to vector<128x32xbf16>
    %cst_11 = arith.constant dense<0.000000e+00> : vector<128x32xf32>
    %35 = tpu.matmul %33, %34, %cst_11 {dimension_numbers = #tpu.dot_dimension_numbers<[1], [0], [0], [1], [0, 0, 1, 1], [], []>} : vector<128x128xbf16>, vector<128x32xbf16>, vector<128x32xf32> -> vector<128x32xf32>
    %36 = arith.truncf %35 : vector<128x32xf32> to vector<128x32xbf16>
    %c0_12 = arith.constant 0 : index
    %c0_13 = arith.constant 0 : index
    %c0_14 = arith.constant 0 : index
    %37 = vector.load %arg4[%c0_12, %c0_13, %c0_14] : memref<4x128x32xbf16, #tpu.memory_space<vmem>>, vector<1x128x32xbf16>
    %38 = vector.shape_cast %37 : vector<1x128x32xbf16> to vector<128x32xbf16>
    %cst_15 = arith.constant dense<0.000000e+00> : vector<128x128xf32>
    %39 = tpu.matmul %36, %38, %cst_15 {dimension_numbers = #tpu.dot_dimension_numbers<[1], [1], [0], [0], [0, 0, 1, 0], [], []>} : vector<128x32xbf16>, vector<128x32xbf16>, vector<128x128xf32> -> vector<128x128xf32>
    %40 = arith.addf %4, %39 : vector<128x128xf32>
    %41 = vector.extract_strided_slice %2 {offsets = [32, 0], sizes = [32, 128], strides = [1, 1]} : vector<384x128xbf16> to vector<32x128xbf16>
    %42 = vector.extract_strided_slice %2 {offsets = [160, 0], sizes = [32, 128], strides = [1, 1]} : vector<384x128xbf16> to vector<32x128xbf16>
    %43 = vector.extract_strided_slice %2 {offsets = [288, 0], sizes = [32, 128], strides = [1, 1]} : vector<384x128xbf16> to vector<32x128xbf16>
    %44 = vector.extract_strided_slice %3 {offsets = [1, 0], sizes = [1, 32], strides = [1, 1]} : vector<12x32xf32> to vector<1x32xf32>
    %45 = vector.extract_strided_slice %3 {offsets = [5, 0], sizes = [1, 32], strides = [1, 1]} : vector<12x32xf32> to vector<1x32xf32>
    %46 = vector.extract_strided_slice %3 {offsets = [9, 0], sizes = [1, 32], strides = [1, 1]} : vector<12x32xf32> to vector<1x32xf32>
    %cst_16 = arith.constant dense<0.000000e+00> : vector<128x32xf32>
    %47 = tpu.matmul %1, %41, %cst_16 {dimension_numbers = #tpu.dot_dimension_numbers<[1], [1], [0], [0], [0, 0, 1, 0], [], []>} : vector<128x128xbf16>, vector<32x128xbf16>, vector<128x32xf32> -> vector<128x32xf32>
    %48 = vector.broadcast %44 : vector<1x32xf32> to vector<128x32xf32>
    %49 = arith.addf %47, %48 : vector<128x32xf32>
    %cst_17 = arith.constant dense<0.000000e+00> : vector<128x32xf32>
    %50 = tpu.matmul %1, %42, %cst_17 {dimension_numbers = #tpu.dot_dimension_numbers<[1], [1], [0], [0], [0, 0, 1, 0], [], []>} : vector<128x128xbf16>, vector<32x128xbf16>, vector<128x32xf32> -> vector<128x32xf32>
    %51 = vector.broadcast %45 : vector<1x32xf32> to vector<128x32xf32>
    %52 = arith.addf %50, %51 : vector<128x32xf32>
    %cst_18 = arith.constant dense<0.000000e+00> : vector<128x32xf32>
    %53 = tpu.matmul %1, %43, %cst_18 {dimension_numbers = #tpu.dot_dimension_numbers<[1], [1], [0], [0], [0, 0, 1, 0], [], []>} : vector<128x128xbf16>, vector<32x128xbf16>, vector<128x32xf32> -> vector<128x32xf32>
    %54 = vector.broadcast %46 : vector<1x32xf32> to vector<128x32xf32>
    %55 = arith.addf %53, %54 : vector<128x32xf32>
    %56 = arith.truncf %49 : vector<128x32xf32> to vector<128x32xbf16>
    %57 = arith.truncf %52 : vector<128x32xf32> to vector<128x32xbf16>
    %cst_19 = arith.constant dense<0.000000e+00> : vector<128x128xf32>
    %58 = tpu.matmul %56, %57, %cst_19 {dimension_numbers = #tpu.dot_dimension_numbers<[1], [1], [0], [0], [0, 0, 1, 0], [], []>} : vector<128x32xbf16>, vector<128x32xbf16>, vector<128x128xf32> -> vector<128x128xf32>
    %cst_20 = arith.constant dense<0xFF800000> : vector<128xf32>
    %59 = vector.multi_reduction <maximumf>, %58, %cst_20 [1] : vector<128x128xf32> to vector<128xf32>
    %60 = vector.shape_cast %59 : vector<128xf32> to vector<128x1xf32>
    %61 = vector.broadcast %60 : vector<128x1xf32> to vector<128x128xf32>
    %62 = arith.subf %58, %61 : vector<128x128xf32>
    %63 = math.exp %62 : vector<128x128xf32>
    %cst_21 = arith.constant dense<0.000000e+00> : vector<128xf32>
    %64 = vector.multi_reduction <add>, %63, %cst_21 [1] : vector<128x128xf32> to vector<128xf32>
    %65 = vector.shape_cast %64 : vector<128xf32> to vector<128x1xf32>
    %66 = tpu.reciprocal %65 {approx = true} : vector<128x1xf32> -> vector<128x1xf32>
    %67 = vector.broadcast %66 : vector<128x1xf32> to vector<128x128xf32>
    %68 = arith.mulf %63, %67 : vector<128x128xf32>
    %69 = arith.truncf %68 : vector<128x128xf32> to vector<128x128xbf16>
    %70 = arith.truncf %55 : vector<128x32xf32> to vector<128x32xbf16>
    %cst_22 = arith.constant dense<0.000000e+00> : vector<128x32xf32>
    %71 = tpu.matmul %69, %70, %cst_22 {dimension_numbers = #tpu.dot_dimension_numbers<[1], [0], [0], [1], [0, 0, 1, 1], [], []>} : vector<128x128xbf16>, vector<128x32xbf16>, vector<128x32xf32> -> vector<128x32xf32>
    %72 = arith.truncf %71 : vector<128x32xf32> to vector<128x32xbf16>
    %c1 = arith.constant 1 : index
    %c0_23 = arith.constant 0 : index
    %c0_24 = arith.constant 0 : index
    %73 = vector.load %arg4[%c1, %c0_23, %c0_24] : memref<4x128x32xbf16, #tpu.memory_space<vmem>>, vector<1x128x32xbf16>
    %74 = vector.shape_cast %73 : vector<1x128x32xbf16> to vector<128x32xbf16>
    %cst_25 = arith.constant dense<0.000000e+00> : vector<128x128xf32>
    %75 = tpu.matmul %72, %74, %cst_25 {dimension_numbers = #tpu.dot_dimension_numbers<[1], [1], [0], [0], [0, 0, 1, 0], [], []>} : vector<128x32xbf16>, vector<128x32xbf16>, vector<128x128xf32> -> vector<128x128xf32>
    %76 = arith.addf %40, %75 : vector<128x128xf32>
    %77 = vector.extract_strided_slice %2 {offsets = [64, 0], sizes = [32, 128], strides = [1, 1]} : vector<384x128xbf16> to vector<32x128xbf16>
    %78 = vector.extract_strided_slice %2 {offsets = [192, 0], sizes = [32, 128], strides = [1, 1]} : vector<384x128xbf16> to vector<32x128xbf16>
    %79 = vector.extract_strided_slice %2 {offsets = [320, 0], sizes = [32, 128], strides = [1, 1]} : vector<384x128xbf16> to vector<32x128xbf16>
    %80 = vector.extract_strided_slice %3 {offsets = [2, 0], sizes = [1, 32], strides = [1, 1]} : vector<12x32xf32> to vector<1x32xf32>
    %81 = vector.extract_strided_slice %3 {offsets = [6, 0], sizes = [1, 32], strides = [1, 1]} : vector<12x32xf32> to vector<1x32xf32>
    %82 = vector.extract_strided_slice %3 {offsets = [10, 0], sizes = [1, 32], strides = [1, 1]} : vector<12x32xf32> to vector<1x32xf32>
    %cst_26 = arith.constant dense<0.000000e+00> : vector<128x32xf32>
    %83 = tpu.matmul %1, %77, %cst_26 {dimension_numbers = #tpu.dot_dimension_numbers<[1], [1], [0], [0], [0, 0, 1, 0], [], []>} : vector<128x128xbf16>, vector<32x128xbf16>, vector<128x32xf32> -> vector<128x32xf32>
    %84 = vector.broadcast %80 : vector<1x32xf32> to vector<128x32xf32>
    %85 = arith.addf %83, %84 : vector<128x32xf32>
    %cst_27 = arith.constant dense<0.000000e+00> : vector<128x32xf32>
    %86 = tpu.matmul %1, %78, %cst_27 {dimension_numbers = #tpu.dot_dimension_numbers<[1], [1], [0], [0], [0, 0, 1, 0], [], []>} : vector<128x128xbf16>, vector<32x128xbf16>, vector<128x32xf32> -> vector<128x32xf32>
    %87 = vector.broadcast %81 : vector<1x32xf32> to vector<128x32xf32>
    %88 = arith.addf %86, %87 : vector<128x32xf32>
    %cst_28 = arith.constant dense<0.000000e+00> : vector<128x32xf32>
    %89 = tpu.matmul %1, %79, %cst_28 {dimension_numbers = #tpu.dot_dimension_numbers<[1], [1], [0], [0], [0, 0, 1, 0], [], []>} : vector<128x128xbf16>, vector<32x128xbf16>, vector<128x32xf32> -> vector<128x32xf32>
    %90 = vector.broadcast %82 : vector<1x32xf32> to vector<128x32xf32>
    %91 = arith.addf %89, %90 : vector<128x32xf32>
    %92 = arith.truncf %85 : vector<128x32xf32> to vector<128x32xbf16>
    %93 = arith.truncf %88 : vector<128x32xf32> to vector<128x32xbf16>
    %cst_29 = arith.constant dense<0.000000e+00> : vector<128x128xf32>
    %94 = tpu.matmul %92, %93, %cst_29 {dimension_numbers = #tpu.dot_dimension_numbers<[1], [1], [0], [0], [0, 0, 1, 0], [], []>} : vector<128x32xbf16>, vector<128x32xbf16>, vector<128x128xf32> -> vector<128x128xf32>
    %cst_30 = arith.constant dense<0xFF800000> : vector<128xf32>
    %95 = vector.multi_reduction <maximumf>, %94, %cst_30 [1] : vector<128x128xf32> to vector<128xf32>
    %96 = vector.shape_cast %95 : vector<128xf32> to vector<128x1xf32>
    %97 = vector.broadcast %96 : vector<128x1xf32> to vector<128x128xf32>
    %98 = arith.subf %94, %97 : vector<128x128xf32>
    %99 = math.exp %98 : vector<128x128xf32>
    %cst_31 = arith.constant dense<0.000000e+00> : vector<128xf32>
    %100 = vector.multi_reduction <add>, %99, %cst_31 [1] : vector<128x128xf32> to vector<128xf32>
    %101 = vector.shape_cast %100 : vector<128xf32> to vector<128x1xf32>
    %102 = tpu.reciprocal %101 {approx = true} : vector<128x1xf32> -> vector<128x1xf32>
    %103 = vector.broadcast %102 : vector<128x1xf32> to vector<128x128xf32>
    %104 = arith.mulf %99, %103 : vector<128x128xf32>
    %105 = arith.truncf %104 : vector<128x128xf32> to vector<128x128xbf16>
    %106 = arith.truncf %91 : vector<128x32xf32> to vector<128x32xbf16>
    %cst_32 = arith.constant dense<0.000000e+00> : vector<128x32xf32>
    %107 = tpu.matmul %105, %106, %cst_32 {dimension_numbers = #tpu.dot_dimension_numbers<[1], [0], [0], [1], [0, 0, 1, 1], [], []>} : vector<128x128xbf16>, vector<128x32xbf16>, vector<128x32xf32> -> vector<128x32xf32>
    %108 = arith.truncf %107 : vector<128x32xf32> to vector<128x32xbf16>
    %c2 = arith.constant 2 : index
    %c0_33 = arith.constant 0 : index
    %c0_34 = arith.constant 0 : index
    %109 = vector.load %arg4[%c2, %c0_33, %c0_34] : memref<4x128x32xbf16, #tpu.memory_space<vmem>>, vector<1x128x32xbf16>
    %110 = vector.shape_cast %109 : vector<1x128x32xbf16> to vector<128x32xbf16>
    %cst_35 = arith.constant dense<0.000000e+00> : vector<128x128xf32>
    %111 = tpu.matmul %108, %110, %cst_35 {dimension_numbers = #tpu.dot_dimension_numbers<[1], [1], [0], [0], [0, 0, 1, 0], [], []>} : vector<128x32xbf16>, vector<128x32xbf16>, vector<128x128xf32> -> vector<128x128xf32>
    %112 = arith.addf %76, %111 : vector<128x128xf32>
    %113 = vector.extract_strided_slice %2 {offsets = [96, 0], sizes = [32, 128], strides = [1, 1]} : vector<384x128xbf16> to vector<32x128xbf16>
    %114 = vector.extract_strided_slice %2 {offsets = [224, 0], sizes = [32, 128], strides = [1, 1]} : vector<384x128xbf16> to vector<32x128xbf16>
    %115 = vector.extract_strided_slice %2 {offsets = [352, 0], sizes = [32, 128], strides = [1, 1]} : vector<384x128xbf16> to vector<32x128xbf16>
    %116 = vector.extract_strided_slice %3 {offsets = [3, 0], sizes = [1, 32], strides = [1, 1]} : vector<12x32xf32> to vector<1x32xf32>
    %117 = vector.extract_strided_slice %3 {offsets = [7, 0], sizes = [1, 32], strides = [1, 1]} : vector<12x32xf32> to vector<1x32xf32>
    %118 = vector.extract_strided_slice %3 {offsets = [11, 0], sizes = [1, 32], strides = [1, 1]} : vector<12x32xf32> to vector<1x32xf32>
    %cst_36 = arith.constant dense<0.000000e+00> : vector<128x32xf32>
    %119 = tpu.matmul %1, %113, %cst_36 {dimension_numbers = #tpu.dot_dimension_numbers<[1], [1], [0], [0], [0, 0, 1, 0], [], []>} : vector<128x128xbf16>, vector<32x128xbf16>, vector<128x32xf32> -> vector<128x32xf32>
    %120 = vector.broadcast %116 : vector<1x32xf32> to vector<128x32xf32>
    %121 = arith.addf %119, %120 : vector<128x32xf32>
    %cst_37 = arith.constant dense<0.000000e+00> : vector<128x32xf32>
    %122 = tpu.matmul %1, %114, %cst_37 {dimension_numbers = #tpu.dot_dimension_numbers<[1], [1], [0], [0], [0, 0, 1, 0], [], []>} : vector<128x128xbf16>, vector<32x128xbf16>, vector<128x32xf32> -> vector<128x32xf32>
    %123 = vector.broadcast %117 : vector<1x32xf32> to vector<128x32xf32>
    %124 = arith.addf %122, %123 : vector<128x32xf32>
    %cst_38 = arith.constant dense<0.000000e+00> : vector<128x32xf32>
    %125 = tpu.matmul %1, %115, %cst_38 {dimension_numbers = #tpu.dot_dimension_numbers<[1], [1], [0], [0], [0, 0, 1, 0], [], []>} : vector<128x128xbf16>, vector<32x128xbf16>, vector<128x32xf32> -> vector<128x32xf32>
    %126 = vector.broadcast %118 : vector<1x32xf32> to vector<128x32xf32>
    %127 = arith.addf %125, %126 : vector<128x32xf32>
    %128 = arith.truncf %121 : vector<128x32xf32> to vector<128x32xbf16>
    %129 = arith.truncf %124 : vector<128x32xf32> to vector<128x32xbf16>
    %cst_39 = arith.constant dense<0.000000e+00> : vector<128x128xf32>
    %130 = tpu.matmul %128, %129, %cst_39 {dimension_numbers = #tpu.dot_dimension_numbers<[1], [1], [0], [0], [0, 0, 1, 0], [], []>} : vector<128x32xbf16>, vector<128x32xbf16>, vector<128x128xf32> -> vector<128x128xf32>
    %cst_40 = arith.constant dense<0xFF800000> : vector<128xf32>
    %131 = vector.multi_reduction <maximumf>, %130, %cst_40 [1] : vector<128x128xf32> to vector<128xf32>
    %132 = vector.shape_cast %131 : vector<128xf32> to vector<128x1xf32>
    %133 = vector.broadcast %132 : vector<128x1xf32> to vector<128x128xf32>
    %134 = arith.subf %130, %133 : vector<128x128xf32>
    %135 = math.exp %134 : vector<128x128xf32>
    %cst_41 = arith.constant dense<0.000000e+00> : vector<128xf32>
    %136 = vector.multi_reduction <add>, %135, %cst_41 [1] : vector<128x128xf32> to vector<128xf32>
    %137 = vector.shape_cast %136 : vector<128xf32> to vector<128x1xf32>
    %138 = tpu.reciprocal %137 {approx = true} : vector<128x1xf32> -> vector<128x1xf32>
    %139 = vector.broadcast %138 : vector<128x1xf32> to vector<128x128xf32>
    %140 = arith.mulf %135, %139 : vector<128x128xf32>
    %141 = arith.truncf %140 : vector<128x128xf32> to vector<128x128xbf16>
    %142 = arith.truncf %127 : vector<128x32xf32> to vector<128x32xbf16>
    %cst_42 = arith.constant dense<0.000000e+00> : vector<128x32xf32>
    %143 = tpu.matmul %141, %142, %cst_42 {dimension_numbers = #tpu.dot_dimension_numbers<[1], [0], [0], [1], [0, 0, 1, 1], [], []>} : vector<128x128xbf16>, vector<128x32xbf16>, vector<128x32xf32> -> vector<128x32xf32>
    %144 = arith.truncf %143 : vector<128x32xf32> to vector<128x32xbf16>
    %c3 = arith.constant 3 : index
    %c0_43 = arith.constant 0 : index
    %c0_44 = arith.constant 0 : index
    %145 = vector.load %arg4[%c3, %c0_43, %c0_44] : memref<4x128x32xbf16, #tpu.memory_space<vmem>>, vector<1x128x32xbf16>
    %146 = vector.shape_cast %145 : vector<1x128x32xbf16> to vector<128x32xbf16>
    %cst_45 = arith.constant dense<0.000000e+00> : vector<128x128xf32>
    %147 = tpu.matmul %144, %146, %cst_45 {dimension_numbers = #tpu.dot_dimension_numbers<[1], [1], [0], [0], [0, 0, 1, 0], [], []>} : vector<128x32xbf16>, vector<128x32xbf16>, vector<128x128xf32> -> vector<128x128xf32>
    %148 = arith.addf %112, %147 : vector<128x128xf32>
    %c0_46 = arith.constant 0 : index
    %c0_47 = arith.constant 0 : index
    %149 = vector.load %arg5[%c0_46, %c0_47] : memref<1x128xf32, #tpu.memory_space<vmem>>, vector<1x128xf32>
    %150 = vector.broadcast %149 : vector<1x128xf32> to vector<128x128xf32>
    %151 = arith.addf %148, %150 : vector<128x128xf32>
    %152 = arith.addf %0, %151 : vector<128x128xf32>
    %c0_48 = arith.constant 0 : index
    %c0_49 = arith.constant 0 : index
    %153 = vector.load %arg10[%c0_48, %c0_49] : memref<1x128xf32, #tpu.memory_space<vmem>>, vector<1x128xf32>
    %c0_50 = arith.constant 0 : index
    %c0_51 = arith.constant 0 : index
    %154 = vector.load %arg11[%c0_50, %c0_51] : memref<1x128xf32, #tpu.memory_space<vmem>>, vector<1x128xf32>
    %cst_52 = arith.constant dense<0.000000e+00> : vector<128xf32>
    %155 = vector.multi_reduction <add>, %152, %cst_52 [1] : vector<128x128xf32> to vector<128xf32>
    %156 = vector.shape_cast %155 : vector<128xf32> to vector<128x1xf32>
    %cst_53 = arith.constant 1.280000e+02 : f32
    %157 = vector.broadcast %cst_53 : f32 to vector<128x1xf32>
    %158 = arith.divf %156, %157 : vector<128x1xf32>
    %159 = vector.broadcast %158 : vector<128x1xf32> to vector<128x128xf32>
    %160 = arith.subf %152, %159 : vector<128x128xf32>
    %161 = arith.mulf %160, %160 : vector<128x128xf32>
    %cst_54 = arith.constant dense<0.000000e+00> : vector<128xf32>
    %162 = vector.multi_reduction <add>, %161, %cst_54 [1] : vector<128x128xf32> to vector<128xf32>
    %163 = vector.shape_cast %162 : vector<128xf32> to vector<128x1xf32>
    %cst_55 = arith.constant 1.280000e+02 : f32
    %164 = vector.broadcast %cst_55 : f32 to vector<128x1xf32>
    %165 = arith.divf %163, %164 : vector<128x1xf32>
    %166 = vector.broadcast %158 : vector<128x1xf32> to vector<128x128xf32>
    %167 = arith.subf %152, %166 : vector<128x128xf32>
    %cst_56 = arith.constant 9.99999974E-6 : f32
    %168 = vector.broadcast %cst_56 : f32 to vector<128x1xf32>
    %169 = arith.addf %165, %168 : vector<128x1xf32>
    %170 = math.rsqrt %169 : vector<128x1xf32>
    %171 = vector.broadcast %170 : vector<128x1xf32> to vector<128x128xf32>
    %172 = arith.mulf %167, %171 : vector<128x128xf32>
    %173 = vector.broadcast %153 : vector<1x128xf32> to vector<128x128xf32>
    %174 = arith.mulf %172, %173 : vector<128x128xf32>
    %175 = vector.broadcast %154 : vector<1x128xf32> to vector<128x128xf32>
    %176 = arith.addf %174, %175 : vector<128x128xf32>
    %177 = arith.truncf %176 : vector<128x128xf32> to vector<128x128xbf16>
    %c0_57 = arith.constant 0 : index
    %c0_58 = arith.constant 0 : index
    %178 = vector.load %arg6[%c0_57, %c0_58] : memref<256x128xbf16, #tpu.memory_space<vmem>>, vector<256x128xbf16>
    %cst_59 = arith.constant dense<0.000000e+00> : vector<128x256xf32>
    %179 = tpu.matmul %177, %178, %cst_59 {dimension_numbers = #tpu.dot_dimension_numbers<[1], [1], [0], [0], [0, 0, 1, 0], [], []>} : vector<128x128xbf16>, vector<256x128xbf16>, vector<128x256xf32> -> vector<128x256xf32>
    %c0_60 = arith.constant 0 : index
    %c0_61 = arith.constant 0 : index
    %180 = vector.load %arg7[%c0_60, %c0_61] : memref<1x256xf32, #tpu.memory_space<vmem>>, vector<1x256xf32>
    %181 = vector.broadcast %180 : vector<1x256xf32> to vector<128x256xf32>
    %182 = arith.addf %179, %181 : vector<128x256xf32>
    %183 = arith.mulf %182, %182 : vector<128x256xf32>
    %184 = arith.mulf %182, %183 : vector<128x256xf32>
    %cst_62 = arith.constant 4.471500e-02 : f32
    %185 = vector.broadcast %cst_62 : f32 to vector<128x256xf32>
    %186 = arith.mulf %185, %184 : vector<128x256xf32>
    %187 = arith.addf %182, %186 : vector<128x256xf32>
    %cst_63 = arith.constant 0.797884583 : f32
    %188 = vector.broadcast %cst_63 : f32 to vector<128x256xf32>
    %189 = arith.mulf %188, %187 : vector<128x256xf32>
    %190 = math.tanh %189 : vector<128x256xf32>
    %cst_64 = arith.constant 1.000000e+00 : f32
    %191 = vector.broadcast %cst_64 : f32 to vector<128x256xf32>
    %192 = arith.addf %191, %190 : vector<128x256xf32>
    %cst_65 = arith.constant 5.000000e-01 : f32
    %193 = vector.broadcast %cst_65 : f32 to vector<128x256xf32>
    %194 = arith.mulf %193, %192 : vector<128x256xf32>
    %195 = arith.mulf %182, %194 : vector<128x256xf32>
    %196 = arith.truncf %195 : vector<128x256xf32> to vector<128x256xbf16>
    %c0_66 = arith.constant 0 : index
    %c0_67 = arith.constant 0 : index
    %197 = vector.load %arg8[%c0_66, %c0_67] : memref<128x256xbf16, #tpu.memory_space<vmem>>, vector<128x256xbf16>
    %cst_68 = arith.constant dense<0.000000e+00> : vector<128x128xf32>
    %198 = tpu.matmul %196, %197, %cst_68 {dimension_numbers = #tpu.dot_dimension_numbers<[1], [1], [0], [0], [0, 0, 1, 0], [], []>} : vector<128x256xbf16>, vector<128x256xbf16>, vector<128x128xf32> -> vector<128x128xf32>
    %c0_69 = arith.constant 0 : index
    %c0_70 = arith.constant 0 : index
    %199 = vector.load %arg9[%c0_69, %c0_70] : memref<1x128xf32, #tpu.memory_space<vmem>>, vector<1x128xf32>
    %200 = vector.broadcast %199 : vector<1x128xf32> to vector<128x128xf32>
    %201 = arith.addf %198, %200 : vector<128x128xf32>
    %202 = arith.addf %176, %201 : vector<128x128xf32>
    %c0_71 = arith.constant 0 : index
    %c0_72 = arith.constant 0 : index
    %203 = vector.load %arg12[%c0_71, %c0_72] : memref<1x128xf32, #tpu.memory_space<vmem>>, vector<1x128xf32>
    %c0_73 = arith.constant 0 : index
    %c0_74 = arith.constant 0 : index
    %204 = vector.load %arg13[%c0_73, %c0_74] : memref<1x128xf32, #tpu.memory_space<vmem>>, vector<1x128xf32>
    %cst_75 = arith.constant dense<0.000000e+00> : vector<128xf32>
    %205 = vector.multi_reduction <add>, %202, %cst_75 [1] : vector<128x128xf32> to vector<128xf32>
    %206 = vector.shape_cast %205 : vector<128xf32> to vector<128x1xf32>
    %cst_76 = arith.constant 1.280000e+02 : f32
    %207 = vector.broadcast %cst_76 : f32 to vector<128x1xf32>
    %208 = arith.divf %206, %207 : vector<128x1xf32>
    %209 = vector.broadcast %208 : vector<128x1xf32> to vector<128x128xf32>
    %210 = arith.subf %202, %209 : vector<128x128xf32>
    %211 = arith.mulf %210, %210 : vector<128x128xf32>
    %cst_77 = arith.constant dense<0.000000e+00> : vector<128xf32>
    %212 = vector.multi_reduction <add>, %211, %cst_77 [1] : vector<128x128xf32> to vector<128xf32>
    %213 = vector.shape_cast %212 : vector<128xf32> to vector<128x1xf32>
    %cst_78 = arith.constant 1.280000e+02 : f32
    %214 = vector.broadcast %cst_78 : f32 to vector<128x1xf32>
    %215 = arith.divf %213, %214 : vector<128x1xf32>
    %216 = vector.broadcast %208 : vector<128x1xf32> to vector<128x128xf32>
    %217 = arith.subf %202, %216 : vector<128x128xf32>
    %cst_79 = arith.constant 9.99999974E-6 : f32
    %218 = vector.broadcast %cst_79 : f32 to vector<128x1xf32>
    %219 = arith.addf %215, %218 : vector<128x1xf32>
    %220 = math.rsqrt %219 : vector<128x1xf32>
    %221 = vector.broadcast %220 : vector<128x1xf32> to vector<128x128xf32>
    %222 = arith.mulf %217, %221 : vector<128x128xf32>
    %223 = vector.broadcast %203 : vector<1x128xf32> to vector<128x128xf32>
    %224 = arith.mulf %222, %223 : vector<128x128xf32>
    %225 = vector.broadcast %204 : vector<1x128xf32> to vector<128x128xf32>
    %226 = arith.addf %224, %225 : vector<128x128xf32>
    %c0_80 = arith.constant 0 : index
    %c0_81 = arith.constant 0 : index
    %227 = vector.load %arg14[%c0_80, %c0_81] : memref<128x128xf32, #tpu.memory_space<vmem>>, vector<128x128xf32>
    tpu.vector_store %arg14[%c0_80, %c0_81], %226 {strides = array<i32>} : memref<128x128xf32, #tpu.memory_space<vmem>>, vector<128x128xf32>,
    return
  }
  func.func @transform_0(%arg0: i32) -> (i32, i32) {
    %c0_i32 = arith.constant 0 : i32
    %c0_i32_0 = arith.constant 0 : i32
    return %c0_i32, %arg0 : i32, i32
  }
  func.func @transform_1(%arg0: i32) -> (i32, i32) {
    %c0_i32 = arith.constant 0 : i32
    %c0_i32_0 = arith.constant 0 : i32
    %c0_i32_1 = arith.constant 0 : i32
    return %c0_i32, %c0_i32_0 : i32, i32
  }
  func.func @transform_2(%arg0: i32) -> (i32, i32) {
    %c0_i32 = arith.constant 0 : i32
    %c0_i32_0 = arith.constant 0 : i32
    %c0_i32_1 = arith.constant 0 : i32
    return %c0_i32, %c0_i32_0 : i32, i32
  }
  func.func @transform_3(%arg0: i32) -> (i32, i32, i32) {
    %c0_i32 = arith.constant 0 : i32
    %c0_i32_0 = arith.constant 0 : i32
    %c0_i32_1 = arith.constant 0 : i32
    %c0_i32_2 = arith.constant 0 : i32
    return %c0_i32, %c0_i32_0, %c0_i32_1 : i32, i32, i32
  }
  func.func @transform_4(%arg0: i32) -> (i32, i32) {
    %c0_i32 = arith.constant 0 : i32
    %c0_i32_0 = arith.constant 0 : i32
    %c0_i32_1 = arith.constant 0 : i32
    return %c0_i32, %c0_i32_0 : i32, i32
  }
  func.func @transform_5(%arg0: i32) -> (i32, i32) {
    %c0_i32 = arith.constant 0 : i32
    %c0_i32_0 = arith.constant 0 : i32
    %c0_i32_1 = arith.constant 0 : i32
    return %c0_i32, %c0_i32_0 : i32, i32
  }
  func.func @transform_6(%arg0: i32) -> (i32, i32) {
    %c0_i32 = arith.constant 0 : i32
    %c0_i32_0 = arith.constant 0 : i32
    %c0_i32_1 = arith.constant 0 : i32
    return %c0_i32, %c0_i32_0 : i32, i32
  }
  func.func @transform_7(%arg0: i32) -> (i32, i32) {
    %c0_i32 = arith.constant 0 : i32
    %c0_i32_0 = arith.constant 0 : i32
    %c0_i32_1 = arith.constant 0 : i32
    return %c0_i32, %c0_i32_0 : i32, i32
  }
  func.func @transform_8(%arg0: i32) -> (i32, i32) {
    %c0_i32 = arith.constant 0 : i32
    %c0_i32_0 = arith.constant 0 : i32
    %c0_i32_1 = arith.constant 0 : i32
    return %c0_i32, %c0_i32_0 : i32, i32
  }
  func.func @transform_9(%arg0: i32) -> (i32, i32) {
    %c0_i32 = arith.constant 0 : i32
    %c0_i32_0 = arith.constant 0 : i32
    %c0_i32_1 = arith.constant 0 : i32
    return %c0_i32, %c0_i32_0 : i32, i32
  }
  func.func @transform_10(%arg0: i32) -> (i32, i32) {
    %c0_i32 = arith.constant 0 : i32
    %c0_i32_0 = arith.constant 0 : i32
    %c0_i32_1 = arith.constant 0 : i32
    return %c0_i32, %c0_i32_0 : i32, i32
  }
  func.func @transform_11(%arg0: i32) -> (i32, i32) {
    %c0_i32 = arith.constant 0 : i32
    %c0_i32_0 = arith.constant 0 : i32
    %c0_i32_1 = arith.constant 0 : i32
    return %c0_i32, %c0_i32_0 : i32, i32
  }
  func.func @transform_12(%arg0: i32) -> (i32, i32) {
    %c0_i32 = arith.constant 0 : i32
    %c0_i32_0 = arith.constant 0 : i32
    %c0_i32_1 = arith.constant 0 : i32
    return %c0_i32, %c0_i32_0 : i32, i32
  }
  func.func @transform_13(%arg0: i32) -> (i32, i32) {
    %c0_i32 = arith.constant 0 : i32
    %c0_i32_0 = arith.constant 0 : i32
    return %c0_i32, %arg0 : i32, i32
  }
}

</mosaic_0001>

<bundles_post_ra>
// kernel: tpu_custom_call.1
= control target key start
LH: loop header
LB: loop body
LE: loop exit
PB: predicated region body
PF: predicated region fallthrough
CT: control target
= control target key end

     0   :  { %s10504_s0 = inlined_call_operand.hbm [shape: f32[128,512], index: 0, kind: input, shape index: {}]   ;;  %s10505_s1 = inlined_call_operand.vmem [shape: bf16[384,128], index: 1, kind: input, shape index: {}]   ;;  %s10506_s2 = inlined_call_operand.hbm [shape: f32[12,32], index: 2, kind: input, shape index: {}]   ;;  %s10507_s3 = inlined_call_operand.vmem [shape: bf16[4,128,32], index: 3, kind: input, shape index: {}]   ;;  %s10508_s4 = inlined_call_operand.vmem [shape: f32[1,128], index: 4, kind: input, shape index: {}]   ;;  %s10509_s5 = inlined_call_operand.vmem [shape: bf16[256,128], index: 5, kind: input, shape index: {}]   ;;  %s10510_s6 = inlined_call_operand.vmem [shape: f32[1,256], index: 6, kind: input, shape index: {}]   ;;  %s10511_s7 = inlined_call_operand.hbm [shape: bf16[128,256], index: 7, kind: input, shape index: {}]   ;;  %s10512_s8 = inlined_call_operand.vmem [shape: f32[1,128], index: 8, kind: input, shape index: {}]   ;;  %s10513_s9 = inlined_call_operand.vmem [shape: f32[1,128], index: 9, kind: input, shape index: {}]   ;;  %s10514_s10 = inlined_call_operand.vmem [shape: f32[1,128], index: 10, kind: input, shape index: {}]   ;;  %s10515_s11 = inlined_call_operand.vmem [shape: f32[1,128], index: 11, kind: input, shape index: {}]   ;;  %s10516_s12 = inlined_call_operand.vmem [shape: f32[1,128], index: 12, kind: input, shape index: {}]   ;;  %s10517_s13 = inlined_call_operand.hbm [shape: f32[128,512], index: 13, kind: output, shape index: {}]  }
   0x1   :  { %10564 = sst [smem:[#allocation41_spill]] %s10515_s11 }
   0x2   :  { %10565 = sst [smem:[#allocation42_spill]] %s10516_s12 }
   0x3   :  { %10566 = sst [smem:[#allocation43_spill]] %s10517_s13 }
   0x4   :  { %18 = vsyncpa [#allocation3], 0 }
   0x5   :  { %20 = vsyncpa [#allocation3 + $0x1], 0 }
   0x6   :  { %21 = vsyncpa [#allocation6], 0 }
   0x7   :  { %22 = vsyncpa [#allocation4], 0 }
   0x8   :  { %24 = vsyncpa [#allocation4 + $0x1], 0  ;;  %s7961_s25 = smov 0   ;;  %s7963_s26 = smov 0  }
   0x9   :  { %s7965_s27 = smov 0   ;;  %s7967_s28 = smov 0  }
   0xa LB: > { %10567 = sst [smem:[#allocation12_spill]] %s7867_s25  ;;  %s7982_s29 = sadd.s32 4294967295, %s7879_s28   ;;  %s7879_s28 = sphi %s7967_s28, %s10682_s28   ;;  %s7875_s27 = sphi %s7965_s27, %s10686_s27   ;;  %s7871_s26 = sphi %s7963_s26, %s10685_s26   ;;  %s7867_s25 = sphi %s7961_s25, %s10684_s25  }
   0xb   : > { %s5848_s30 = sadd.s32 4294967294, %s7879_s28   ;;  %s7986_s14 = sadd.s32 1, %s7879_s28  }
   0xc   : > { %10568 = sst [smem:[#allocation13_spill]] %s7986_s14  ;;  %s37_s15 = sadd.s32 1, %s7875_s27 }
   0xd   : > { %s34_s16 = ssub.s32 %s7879_s28, %s7986_s14  ;;  %p44_p0 = scmp.ne.s32.totalorder %s7875_s27, %s7871_s26 }
   0xe   : > { %p35_p1 = scmp.eq.s32.totalorder %s34_s16, 0  ;;  %p45_p2 = scmp.eq.s32.totalorder %s7879_s28, 0 }
   0xf   : > { %p50_p3 = scmp.ne.s32.totalorder %s7871_s26, %s7867_s25  ;;  %p10525_p4 = scmp.eq.s32.totalorder %s7982_s29, 0 }
  0x10   : > { %s7998_s17 = scalar_select %p35_p1, %s7875_s27, %s37_s15  }
  0x11   : > { %p8000_p5 = por %p45_p2, %p44_p0  ;;  %p8006_p6 = por %p10525_p4, %p50_p3 }
  0x12   : > { %10569 = sst [smem:[#allocation14_spill]] %s7998_s17  ;;  %p326_p7 = scmp.eq.s32.totalorder %s7982_s29, 3 }
  0x13   : > { %s10570_s18 = scalar_select %p8000_p5, 1, 0 }
  0x14   : > { %s10571_s19 = scalar_select %p8006_p6, 1, 0 }
  0x15   : > { %p332_p8 = scmp.eq.s32.totalorder %s5848_s30, 3  ;;  %p5849_p9 = scmp.ge.s32.totalorder %s7879_s28, 1 }
  0x16   : > { %p339_p10 = scmp.lt.s32.totalorder %s7879_s28, 5  ;;  %p8013_p11 = por %p326_p7, %p44_p0 }
  0x17   : > { %p8017_p12 = por %p332_p8, %p50_p3  ;;  %s7881_s23 = smov [#allocation5]  }
  0x18   : > { %s10572_s20 = scalar_select %p8013_p11, 1, 0 }
  0x19   : > { %s10574_s21 = scalar_select %p8017_p12, 1, 0 }
  0x1a   : > { %10573 = sst [smem:[#allocation15_spill]] %s10572_s20  ;;  %p8021_p13 = pnand %p5849_p9, %p339_p10 }
  0x1b   : > { %10575 = sst [smem:[#allocation16_spill]] %s10574_s21  ;;  %s354_s24 = sshll.u32 %s7881_s23, 4  ;;  %s355_s24 = int_to_ptr.vmem [resolvable:$true] %s354_s24 }
  0x1c   : > { %s10576_s22 = scalar_select %p8021_p13, 1, 0 }
  0x1d   : > { %p7162_p1 = pneg %p8021_p13  ;;  %s7882_s15 = smov [#allocation7]  }
  0x1e   : > { %s379_s16 = sshll.u32 %s7882_s15, 4  ;;  %s7723_s21 = scalar_lea.hbm %s10506_s2, 256  ;;  %s380_s16 = int_to_ptr.vmem [resolvable:$true] %s379_s16 }
  0x1f   : > { %p8029_p2 = pnand %p7162_p1, %p10525_p4  ;;  %p7724_p3 = scmp.ne.s32.totalorder %s10506_s2, %s7723_s21 }
  0x20   : > { %p7730_p10 = scmp.lt.u32.totalorder %s7723_s21, %s10506_s2 }
  0x21   : > { %p7725_p7 = pneg %p8029_p2 }
  0x23   : > { %p7726_p8 = pnand %p7725_p7, %p7724_p3 }
  0x25   : > { %p7727_p9 = pneg %p7726_p8 }
  0x27   : > { %p7732_p1 = pnand %p7730_p10, %p7727_p9 }
  0x29   : > { %7735 = shalt.err (!%p7732_p1)
}
  0x2a   : > { %s7736_s15 = scalar_lea.vmem %s355_s24, 256  ;;  %p7744_p11 = scmp.lt.s32.totalorder %s355_s24, %s355_s24 }
  0x2b   : > { %p7737_p4 = scmp.ne.s32.totalorder %s355_s24, %s7736_s15  ;;  %p7745_p6 = scmp.lt.s32.totalorder %s7736_s15, %s7736_s15 }
  0x2d   : > { %p7739_p0 = pnand %p7737_p4, %p7725_p7  ;;  %p7746_p13 = por %p7745_p6, %p7744_p11 }
  0x2f   : > { %p7740_p12 = pneg %p7739_p0 }
  0x31   : > { %p7747_p5 = pnand %p7746_p13, %p7740_p12 }
  0x33   : > { %7750 = shalt.err (!%p7747_p5)
}
  0x34   : > { %s10530_s13 = smov 128   ;;  %s7884_s25 = smov 8  }
  0x35   : > { %7165 = dma.hbm_to_vmem [thread:$0]  (!%p8029_p2), %s10506_s2, 256, %s355_s24, [#allocation6], %s10530_s13, %s10530_s13, %s7884_s25  }
  0x36   : > { %p10578_p4 = scmp.ne.s32.totalorder %s10570_s18, 0  ;;  %p10579_p0 = scmp.lt.s32.totalorder %s7879_s28, 4 }
  0x37   : > { %s7751_s15 = scalar_lea.hbm %s10511_s7, 2048 }
  0x38   : > { %p8063_p3 = pnand %p10579_p0, %p10578_p4  ;;  %p7752_p5 = scmp.ne.s32.totalorder %s10511_s7, %s7751_s15 }
  0x39   : > { %p7758_p12 = scmp.lt.u32.totalorder %s7751_s15, %s10511_s7 }
  0x3a   : > { %s10580_s20 = scalar_select %p8063_p3, 1, 0 }
  0x3b   : > { %p7754_p6 = pnand %p7752_p5, %p7725_p7 }
  0x3d   : > { %p7755_p11 = pneg %p7754_p6 }
  0x3f   : > { %p7760_p13 = pnand %p7758_p12, %p7755_p11 }
  0x41   : > { %7763 = shalt.err (!%p7760_p13)
}
  0x42   : > { %s7764_s14 = scalar_lea.vmem %s380_s16, 2048  ;;  %p7772_p1 = scmp.lt.s32.totalorder %s380_s16, %s380_s16 }
  0x43   : > { %p7765_p8 = scmp.ne.s32.totalorder %s380_s16, %s7764_s14  ;;  %p7773_p4 = scmp.lt.s32.totalorder %s7764_s14, %s7764_s14 }
  0x45   : > { %p7767_p9 = pnand %p7765_p8, %p7725_p7  ;;  %p7774_p0 = por %p7773_p4, %p7772_p1 }
  0x47   : > { %p7768_p10 = pneg %p7767_p9 }
  0x49   : > { %p7775_p3 = pnand %p7774_p0, %p7768_p10 }
  0x4b   : > { %7778 = shalt.err (!%p7775_p3)
}
  0x4c   : > { %7168 = dma.hbm_to_vmem [thread:$0]  (!%p8029_p2), %s10511_s7, 2048, %s380_s16, [#allocation6], %s10530_s13, %s10530_s13, %s7884_s25  }
  0x4d   : > { %s408_s17 = sand.u32 1, %s7875_s27   ;;  %s5854_s23 = sshll.u32 %s7879_s28, 7 }
  0x4e   : > { %s5853_s21 = sshll.u32 %s408_s17, 7  ;;  %s8095_s18 = scalar_lea.hbm %s10504_s0, %s5854_s23 }
  0x4f   : > { %s412_s30 = scalar_lea.vmem [#allocation2], %s5853_s21  ;;  %s8099_s11 = scalar_lea.sflag [#allocation3], %s408_s17 }
  0x50   : > { %s418_s14 = sshll.u32 %s412_s30, 4  ;;  %s7779_s12 = scalar_lea.hbm %s8095_s18, 2048  ;;  %s8097_s14 = int_to_ptr.vmem [resolvable:$true] %s418_s14 }
  0x51   : > { %p7780_p2 = scmp.ne.s32.totalorder %s8095_s18, %s7779_s12  ;;  %p10581_p7 = scmp.ne.s32.totalorder %s10580_s20, 0 }
  0x52   : > { %s7784_s15 = scalar_lea.hbm %s10504_s0, 8192  ;;  %p7785_p11 = scmp.lt.u32.totalorder %s8095_s18, %s10504_s0 }
  0x53   : > { %p7781_p3 = pneg %p10581_p7  ;;  %p7786_p12 = scmp.lt.u32.totalorder %s7784_s15, %s7779_s12 }
  0x54   : > { %p7788_p8 = scmp.lt.u32.totalorder %s7779_s12, %s8095_s18 }
  0x55   : > { %p7782_p5 = pnand %p7781_p3, %p7780_p2  ;;  %p7787_p13 = por %p7786_p12, %p7785_p11 }
  0x57   : > { %p7783_p6 = pneg %p7782_p5  ;;  %p7789_p9 = por %p7788_p8, %p7787_p13 }
  0x59   : > { %p7790_p10 = pnand %p7789_p9, %p7783_p6 }
  0x5b   : > { %7793 = shalt.err (!%p7790_p10)
}
  0x5c   : > { %s7794_s17 = scalar_lea.vmem %s8097_s14, 2048  ;;  %s7885_s21 = smov [#allocation2]  }
  0x5d   : > { %p7795_p1 = scmp.ne.s32.totalorder %s8097_s14, %s7794_s17  ;;  %s7799_s30 = sshll.u32 %s7885_s21, 4  ;;  %s7800_s30 = int_to_ptr.vmem [resolvable:$false] %s7799_s30 }
  0x5e   : > { %s7801_s13 = scalar_lea.vmem %s7800_s30, 4096  ;;  %p7802_p2 = scmp.lt.s32.totalorder %s8097_s14, %s7800_s30 }
  0x5f   : > { %p7797_p4 = pnand %p7795_p1, %p7781_p3  ;;  %p7803_p5 = scmp.lt.s32.totalorder %s7801_s13, %s7794_s17 }
  0x61   : > { %p7798_p0 = pneg %p7797_p4  ;;  %p7804_p11 = por %p7803_p5, %p7802_p2 }
  0x63   : > { %p7805_p12 = pnand %p7804_p11, %p7798_p0 }
  0x65   : > { %7808 = shalt.err (!%p7805_p12)
}
  0x66   : > { %s7886_s12 = smov 512   ;;  %s10582_s16 = smov 128  }
  0x67   : > { %7172 = dma.hbm_to_vmem [thread:$0]  (!%p10581_p7), %s8095_s18, 2048, %s8097_s14, %s8099_s11, %s7886_s12, %s10582_s16, %s7884_s25  }
  0x68   : > { %p10583_p3 = scmp.ne.s32.totalorder %s10576_s22, 0 }
  0x6a   : > { %430 = sbr.rel (%p10583_p3) target bundleno = 4239 (0x108f), region = 72 }
  0x71   : > { %s8132_s23 = sand.u32 1, %s7871_s26   ;;  %p10584_p6 = scmp.ne.s32.totalorder %s10571_s19, 0 }
  0x72   : > { %s5856_s15 = sshll.u32 %s8132_s23, 7  ;;  %s433_s24 = scalar_lea.sflag [#allocation3], %s8132_s23 }
  0x73   : > { %s8138_s20 = scalar_lea.vmem [#allocation2], %s5856_s15 }
  0x74   : > { %7854 = dma.done.wait (%p10584_p6), %s433_s24, 2048  }
  0x75   : > { %7856 = vsyncadd (%p10584_p6), %s433_s24, 4294965248  ;;  %p10585_p7 = scmp.eq.s32.totalorder %s7982_s29, 0 }
  0x77   : > { %7858 = dma.done.wait (%p10585_p7), [#allocation6], 2304   ;;  %p10586_p13 = pmov %p10585_p7 }
  0x78   : > { %v7223_v0 = vld [vmem:[%s10505_s1] sm:$0xff]   ;;  %v7224_v1 = vld [vmem:[%s10505_s1 + $0x8] sm:$0xff]   ;;  %v490_v6 = vld [vmem:[%s8138_s20 + $0x10] sm:$0xff]  ;;  %v562_v28 = vlaneseq  ;;  %vm917_vm0 = vcmask 261120   ;;  %s10674_s12 = sld [smem:[#allocation41_spill]]  ;;  %s10675_s22 = sld [smem:[#allocation42_spill]] }
  0x79   : > { %7860 = vsyncadd (%p10586_p13), [#allocation6], 4294964992  ;;  %6414 = vmatprep.subr.bf16.mxu1 %v7223_v0  ;;  %v488_v2 = vld [vmem:[%s8138_s20] sm:$0xff]  ;;  %v489_v3 = vld [vmem:[%s8138_s20 + $0x8] sm:$0xff]  ;;  %s10393_s25 = scalar_lea.vmem [#allocation8], %s5856_s15  ;;  %s10676_s15 = sld [smem:[#allocation15_spill]] }
  0x7a   : > { %6415 = vmatpush3.bf16.xpose.msra.mxu1 %v7223_v0  ;;  %v8156_v4 = vpack.c.bf16 %v489_v3, %v488_v2  ;;  %v7225_v5 = vld [vmem:[%s10505_s1 + $0x40] sm:$0xff]   ;;  %v491_v7 = vld [vmem:[%s8138_s20 + $0x18] sm:$0xff]  ;;  %v493_v9 = vld [vmem:[%s8138_s20 + $0x28] sm:$0xff]  ;;  %v8209_v29 = vshrl.u32 %v562_v28, 7  ;;  %s6067_s18 = sshll.u32 %s7982_s29, 7  ;;  %s10677_s11 = sld [smem:[#allocation43_spill]] }
  0x7b   : > { %6416 = vmatprep.subr.bf16.mxu1 %v7224_v1  ;;  %v492_v8 = vld [vmem:[%s8138_s20 + $0x20] sm:$0xff]  ;;  %v8167_v10 = vpack.c.bf16 %v491_v7, %v490_v6  ;;  %v7226_v11 = vld [vmem:[%s10505_s1 + $0x48] sm:$0xff]   ;;  %v494_v13 = vld [vmem:[%s8138_s20 + $0x30] sm:$0xff]  ;;  %s5744_s29 = scalar_lea.sflag [#allocation4], %s8132_s23  ;;  %s7887_s30 = smov [#allocation8]  }
  0x7c   : > { %6418 = vmatprep.mubr.bf16.mxu1 %v8156_v4  ;;  %6458 = vmatprep.mubr.bf16.mxu0 %v8156_v4  ;;  %v8172_v12 = vpack.c.bf16 %v493_v9, %v492_v8  ;;  %v495_v14 = vld [vmem:[%s8138_s20 + $0x38] sm:$0xff]  ;;  %v496_v15 = vld [vmem:[%s8138_s20 + $0x40] sm:$0xff]  ;;  %v497_v16 = vld [vmem:[%s8138_s20 + $0x48] sm:$0xff]  ;;  %10594 = vst [vmem:[#allocation24_spill] sm:$0xff] %v8209_v29  ;;  %v8212_v30 = vsub.s32 0, %v8209_v29  ;;  %v677_v7 = vsub.s32 4, %v8209_v29 }
  0x7d   : > { %10587 = vst [vmem:[#allocation17_spill] sm:$0xff] %v8167_v10  ;;  %v8180_v17 = vpack.c.bf16 %v495_v14, %v494_v13  ;;  %v8182_v18 = vpack.c.bf16 %v497_v16, %v496_v15  ;;  %v498_v19 = vld [vmem:[%s8138_s20 + $0x50] sm:$0xff]  ;;  %v499_v20 = vld [vmem:[%s8138_s20 + $0x58] sm:$0xff]  ;;  %v500_v21 = vld [vmem:[%s8138_s20 + $0x60] sm:$0xff]  ;;  %s7813_s13 = sshll.u32 %s7887_s30, 4  ;;  %s7814_s13 = int_to_ptr.vmem [resolvable:$false] %s7813_s13 }
  0x7e   : > { %10588 = vst [vmem:[#allocation18_spill] sm:$0xff] %v8172_v12  ;;  %v501_v22 = vld [vmem:[%s8138_s20 + $0x68] sm:$0xff]  ;;  %v8190_v23 = vpack.c.bf16 %v499_v20, %v498_v19  ;;  %v502_v25 = vld [vmem:[%s8138_s20 + $0x70] sm:$0xff]  ;;  %v503_v26 = vld [vmem:[%s8138_s20 + $0x78] sm:$0xff] }
  0x7f   : > { %10589 = vst [vmem:[#allocation19_spill] sm:$0xff] %v8180_v17  ;;  %10590 = vst [vmem:[#allocation20_spill] sm:$0xff] %v8182_v18  ;;  %v8192_v24 = vpack.c.bf16 %v501_v22, %v500_v21  ;;  %v8198_v27 = vpack.c.bf16 %v503_v26, %v502_v25  ;;  %v8214_v31 = vld [vmem:[#allocation5] sm:$0xff]  ;;  %p10678_p9 = scmp.ne.s32.totalorder %s10676_s15, 0 }
  0x80   : > { %10591 = vst [vmem:[#allocation21_spill] sm:$0xff] %v8190_v23  ;;  %10595 = vst [vmem:[#allocation25_spill] sm:$0xff] %v8212_v30  ;;  %v565_v32 = vrot.slane %v8214_v31, %v8212_v30  ;;  %v678_v13 = vrot.slane %v8214_v31, %v677_v7  ;;  %s10456_s17 = scalar_lea.hbm %s10677_s11, %s6067_s18 }
  0x81   : > { %10592 = vst [vmem:[#allocation22_spill] sm:$0xff] %v8192_v24  ;;  %10593 = vst [vmem:[#allocation23_spill] sm:$0xff] %v8198_v27 }
  0x82   : > { %6417 = vmatpush3.bf16.xpose.msra.mxu1 %v7224_v1 }
  0x83   : > { %6434 = vmatprep.subr.bf16.mxu1 %v7225_v5 }
  0x89   : > { %6419 = vmatmul.mubr.bf16.vlgmr.msra.gmra.mrb[0].mxu1 %v8167_v10 }
  0x8a   : > { %6435 = vmatpush3.bf16.xpose.msra.mxu1 %v7225_v5  ;;  %6422 = vmatprep.mubr.bf16.mxu1 %v8172_v12 }
  0x8b   : > { %6436 = vmatprep.subr.bf16.mxu1 %v7226_v11 }
  0x91   : > { %6423 = vmatmul.mubr.bf16.gmra.mrb[4].mxu1 %v8180_v17 }
  0x92   : > { %6426 = vmatprep.mubr.bf16.mxu1 %v8182_v18  ;;  %6437 = vmatpush3.bf16.xpose.msra.mxu1 %v7226_v11 }
  0x99   : > { %6427 = vmatmul.mubr.bf16.gmra.mrb[8].mxu1 %v8190_v23 }
  0x9a   : > { %6430 = vmatprep.mubr.bf16.mxu1 %v8192_v24 }
  0xa1   : > { %6431 = vmatmul.mubr.bf16.gmra.mrb[12].mxu1 %v8198_v27 }
  0xa2   : > { %6438 = vmatprep.mubr.bf16.mxu1 %v8156_v4 }
  0xa9   : > { %6439 = vmatmul.mubr.bf16.vlgmr.msra.gmra.mrb[16].mxu1 %v8167_v10 }
  0xaa   : > { %6442 = vmatprep.mubr.bf16.mxu1 %v8172_v12 }
  0xb1   : > { %6443 = vmatmul.mubr.bf16.gmra.mrb[20].mxu1 %v8180_v17 }
  0xb2   : > { %6446 = vmatprep.mubr.bf16.mxu1 %v8182_v18 }
  0xb9   : > { %6447 = vmatmul.mubr.bf16.gmra.mrb[24].mxu1 %v8190_v23 }
  0xba   : > { %6450 = vmatprep.mubr.bf16.mxu1 %v8192_v24 }
  0xc1   : > { %6451 = vmatmul.mubr.bf16.gmra.mrb[28].mxu1 %v8198_v27 }
 0x15c   : > { %v6420_v33 = vpop.f32.mrb[0].mxu1 }
 0x15d   : > { %v8218_v34 = vadd.f32 %v6420_v33, %v565_v32  ;;  %v612_v35 = vpop.f32.mrb[1].mxu1 }
 0x15e   : > { %v6421_v36 = vpop.f32.mrb[2].mxu1  ;;  %v613_v39 = vadd.f32 %v612_v35, %v565_v32 }
 0x15f   : > { %v8220_v37 = vadd.f32 %v6421_v36, %v565_v32  ;;  %v615_v38 = vpop.f32.mrb[3].mxu1 }
 0x160   : > { %v616_v40 = vadd.f32 %v615_v38, %v565_v32 }
 0x161   : > { %v902_v41 = vpack.c.bf16 %v8220_v37, %v8218_v34  ;;  %v7227_v34 = vld [vmem:[%s10505_s1 + $0x80] sm:$0xff]   ;;  %v7228_v37 = vld [vmem:[%s10505_s1 + $0x88] sm:$0xff]  }
 0x162   : > { %v901_v42 = vpack.c.bf16 %v616_v40, %v613_v39  ;;  %6454 = vmatprep.subr.bf16.mxu0 %v7227_v34 }
 0x163   : > { %6455 = vmatpush3.bf16.xpose.msra.mxu0 %v7227_v34 }
 0x164   : > { %v6424_v43 = vpop.f32.mrb[4].mxu1  ;;  %6490 = vmatprep.mubr.msk.bf16.mxu1 %vm917_vm0, %v901_v42  ;;  %6456 = vmatprep.subr.bf16.mxu0 %v7228_v37 }
 0x165   : > { %v8225_v44 = vadd.f32 %v6424_v43, %v565_v32  ;;  %v628_v45 = vpop.f32.mrb[5].mxu1 }
 0x166   : > { %v8227_v46 = vadd.f32 %v628_v45, %v565_v32  ;;  %v6425_v47 = vpop.f32.mrb[6].mxu1 }
 0x167   : > { %v8229_v48 = vadd.f32 %v6425_v47, %v565_v32  ;;  %v631_v49 = vpop.f32.mrb[7].mxu1 }
 0x168   : > { %v8231_v50 = vadd.f32 %v631_v49, %v565_v32 }
 0x169   : > { %v904_v51 = vpack.c.bf16 %v8229_v48, %v8225_v44 }
 0x16a   : > { %v903_v52 = vpack.c.bf16 %v8231_v50, %v8227_v46 }
 0x16b   : > { %6457 = vmatpush3.bf16.xpose.msra.mxu0 %v7228_v37 }
 0x16c   : > { %v6428_v53 = vpop.f32.mrb[8].mxu1 }
 0x16d   : > { %v8237_v54 = vadd.f32 %v6428_v53, %v565_v32  ;;  %v644_v55 = vpop.f32.mrb[9].mxu1 }
 0x16e   : > { %v8239_v56 = vadd.f32 %v644_v55, %v565_v32  ;;  %v6429_v57 = vpop.f32.mrb[10].mxu1 }
 0x16f   : > { %v8241_v58 = vadd.f32 %v6429_v57, %v565_v32  ;;  %v647_v59 = vpop.f32.mrb[11].mxu1 }
 0x170   : > { %v8243_v60 = vadd.f32 %v647_v59, %v565_v32 }
 0x171   : > { %v906_v61 = vpack.c.bf16 %v8241_v58, %v8237_v54 }
 0x172   : > { %v905_v62 = vpack.c.bf16 %v8243_v60, %v8239_v56  ;;  %6459 = vmatmul.mubr.bf16.vlgmr.msra.gmra.mrb[0].mxu0 %v8167_v10 }
 0x173   : > { %6462 = vmatprep.mubr.bf16.mxu0 %v8172_v12 }
 0x174   : > { %v6432_v63 = vpop.f32.mrb[12].mxu1 }
 0x175   : > { %v8249_v0 = vadd.f32 %v6432_v63, %v565_v32  ;;  %v660_v1 = vpop.f32.mrb[13].mxu1 }
 0x176   : > { %v8251_v2 = vadd.f32 %v660_v1, %v565_v32  ;;  %v6433_v3 = vpop.f32.mrb[14].mxu1 }
 0x177   : > { %v8253_v5 = vadd.f32 %v6433_v3, %v565_v32  ;;  %v663_v6 = vpop.f32.mrb[15].mxu1 }
 0x178   : > { %v8256_v8 = vadd.f32 %v663_v6, %v565_v32 }
 0x179   : > { %v908_v9 = vpack.c.bf16 %v8253_v5, %v8249_v0 }
 0x17a   : > { %v907_v11 = vpack.c.bf16 %v8256_v8, %v8251_v2  ;;  %6463 = vmatmul.mubr.bf16.gmra.mrb[4].mxu0 %v8180_v17  ;;  %v7229_v8 = vld [vmem:[%s10505_s1 + $0x50] sm:$0xff]  }
 0x17b   : > { %6466 = vmatprep.mubr.bf16.mxu0 %v8182_v18 }
 0x17c   : > { %v6440_v14 = vpop.f32.mrb[16].mxu1 }
 0x17d   : > { %v725_v15 = vpop.f32.mrb[17].mxu1  ;;  %v734_v19 = vadd.f32 %v6440_v14, %v678_v13 }
 0x17e   : > { %v6441_v16 = vpop.f32.mrb[18].mxu1  ;;  %v726_v22 = vadd.f32 %v725_v15, %v678_v13 }
 0x17f   : > { %v737_v20 = vadd.f32 %v6441_v16, %v678_v13  ;;  %v728_v21 = vpop.f32.mrb[19].mxu1 }
 0x180   : > { %v729_v25 = vadd.f32 %v728_v21, %v678_v13 }
 0x181   : > { %v910_v26 = vpack.c.bf16 %v737_v20, %v734_v19 }
 0x182   : > { %v909_v28 = vpack.c.bf16 %v729_v25, %v726_v22  ;;  %6467 = vmatmul.mubr.bf16.gmra.mrb[8].mxu0 %v8190_v23 }
 0x183   : > { %v946_v49 = vsel %vm917_vm0, %v910_v26, 0  ;;  %6470 = vmatprep.mubr.bf16.mxu0 %v8192_v24 }
 0x184   : > { %7086 = vmatprep.subr.msk.bf16.mxu1 %vm917_vm0, %v909_v28  ;;  %v943_v32 = vsel %vm917_vm0, %v909_v28, 0  ;;  %v6444_v33 = vpop.f32.mrb[20].mxu1 }
 0x185   : > { %6475 = vmatpush3.bf16.xpose.msra.mxu1 %v943_v32  ;;  %v750_v35 = vadd.f32 %v6444_v33, %v678_v13  ;;  %v741_v36 = vpop.f32.mrb[21].mxu1 }
 0x186   : > { %7087 = vmatprep.subr.msk.bf16.mxu1 %vm917_vm0, %v910_v26  ;;  %v742_v38 = vadd.f32 %v741_v36, %v678_v13  ;;  %v6445_v39 = vpop.f32.mrb[22].mxu1 }
 0x187   : > { %v753_v40 = vadd.f32 %v6445_v39, %v678_v13  ;;  %v744_v42 = vpop.f32.mrb[23].mxu1 }
 0x188   : > { %v745_v43 = vadd.f32 %v744_v42, %v678_v13 }
 0x189   : > { %v912_v45 = vpack.c.bf16 %v753_v40, %v750_v35 }
 0x18a   : > { %v911_v47 = vpack.c.bf16 %v745_v43, %v742_v38  ;;  %6471 = vmatmul.mubr.bf16.gmra.mrb[12].mxu0 %v8198_v27 }
 0x18b   : > { %v952_v35 = vsel %vm917_vm0, %v912_v45, 0 }
 0x18c   : > { %v6448_v53 = vpop.f32.mrb[24].mxu1  ;;  %v949_v15 = vsel %vm917_vm0, %v911_v47, 0 }
 0x18d   : > { %6477 = vmatpush3.bf16.xpose.msra.mxu1 %v946_v49  ;;  %v766_v55 = vadd.f32 %v6448_v53, %v678_v13  ;;  %v757_v57 = vpop.f32.mrb[25].mxu1 }
 0x18e   : > { %7088 = vmatprep.subr.msk.bf16.mxu1 %vm917_vm0, %v911_v47  ;;  %v758_v59 = vadd.f32 %v757_v57, %v678_v13  ;;  %v6449_v63 = vpop.f32.mrb[26].mxu1 }
 0x18f   : > { %v769_v1 = vadd.f32 %v6449_v63, %v678_v13  ;;  %v760_v3 = vpop.f32.mrb[27].mxu1 }
 0x190   : > { %v761_v6 = vadd.f32 %v760_v3, %v678_v13 }
 0x191   : > { %v914_v7 = vpack.c.bf16 %v769_v1, %v766_v55 }
 0x192   : > { %v913_v14 = vpack.c.bf16 %v761_v6, %v758_v59 }
 0x193   : > { %v958_v38 = vsel %vm917_vm0, %v914_v7, 0 }
 0x194   : > { %v6452_v16 = vpop.f32.mrb[28].mxu1  ;;  %v955_v36 = vsel %vm917_vm0, %v913_v14, 0 }
 0x195   : > { %6479 = vmatpush3.bf16.xpose.msra.mxu1 %v949_v15  ;;  %v782_v19 = vadd.f32 %v6452_v16, %v678_v13  ;;  %v773_v20 = vpop.f32.mrb[29].mxu1 }
 0x196   : > { %7089 = vmatprep.subr.msk.bf16.mxu1 %vm917_vm0, %v912_v45  ;;  %v774_v21 = vadd.f32 %v773_v20, %v678_v13  ;;  %v6453_v22 = vpop.f32.mrb[30].mxu1 }
 0x197   : > { %v785_v25 = vadd.f32 %v6453_v22, %v678_v13  ;;  %v776_v26 = vpop.f32.mrb[31].mxu1 }
 0x198   : > { %v777_v28 = vadd.f32 %v776_v26, %v678_v13 }
 0x199   : > { %v916_v32 = vpack.c.bf16 %v785_v25, %v782_v19 }
 0x19a   : > { %v915_v33 = vpack.c.bf16 %v777_v28, %v774_v21 }
 0x19b   : > { %v964_v13 = vsel %vm917_vm0, %v916_v32, 0 }
 0x19c   : > { %v961_v39 = vsel %vm917_vm0, %v915_v33, 0 }
 0x19d   : > { %6481 = vmatpush3.bf16.xpose.msra.mxu1 %v952_v35 }
 0x19e   : > { %7090 = vmatprep.subr.msk.bf16.mxu1 %vm917_vm0, %v913_v14 }
 0x1a5   : > { %6483 = vmatpush3.bf16.xpose.msra.mxu1 %v955_v36 }
 0x1a6   : > { %7091 = vmatprep.subr.msk.bf16.mxu1 %vm917_vm0, %v914_v7 }
 0x1ad   : > { %6485 = vmatpush3.bf16.xpose.msra.mxu1 %v958_v38 }
 0x1ae   : > { %7092 = vmatprep.subr.msk.bf16.mxu1 %vm917_vm0, %v915_v33 }
 0x1b5   : > { %6487 = vmatpush3.bf16.xpose.msra.mxu1 %v961_v39 }
 0x1b6   : > { %7093 = vmatprep.subr.msk.bf16.mxu1 %vm917_vm0, %v916_v32 }
 0x1bd   : > { %6489 = vmatpush3.bf16.xpose.msra.mxu1 %v964_v13 }
 0x1be   : > { %6558 = vmatprep.subr.bf16.mxu1 %v7229_v8 }
 0x1c4   : > { %6491 = vmatmul.mubr.msk.bf16.vlgmr.msra.gmra.mrb[32].mxu1 %vm917_vm0, %v902_v41 }
 0x1c5   : > { %6494 = vmatprep.mubr.msk.bf16.mxu1 %vm917_vm0, %v903_v52  ;;  %6559 = vmatpush3.bf16.xpose.msra.mxu1 %v7229_v8 }
 0x1cc   : > { %6495 = vmatmul.mubr.msk.bf16.gmra.mrb[36].mxu1 %vm917_vm0, %v904_v51 }
 0x1cd   : > { %6498 = vmatprep.mubr.msk.bf16.mxu1 %vm917_vm0, %v905_v62 }
 0x1d4   : > { %6499 = vmatmul.mubr.msk.bf16.gmra.mrb[40].mxu1 %vm917_vm0, %v906_v61 }
 0x1d5   : > { %6502 = vmatprep.mubr.msk.bf16.mxu1 %vm917_vm0, %v907_v11  ;;  %v561_v11 = vld [vmem:[#allocation5 + $0x8] sm:$0xf] }
 0x1d6   : > { %v8383_v40 = vrot.slane %v561_v11, %v8212_v30 }
 0x1dc   : > { %6503 = vmatmul.mubr.msk.bf16.gmra.mrb[44].mxu1 %vm917_vm0, %v908_v9  ;;  %v7230_v9 = vld [vmem:[%s10505_s1 + $0x58] sm:$0xff]  }
 0x1dd   : > { %6562 = vmatprep.mubr.bf16.mxu1 %v8156_v4  ;;  %6560 = vmatprep.subr.bf16.mxu1 %v7230_v9 }
 0x1de   : > { %6561 = vmatpush3.bf16.xpose.msra.mxu1 %v7230_v9 }
 0x1e5   : > { %6563 = vmatmul.mubr.bf16.vlgmr.msra.gmra.mrb[48].mxu1 %v8167_v10 }
 0x1e6   : > { %6566 = vmatprep.mubr.bf16.mxu1 %v8172_v12 }
 0x1ed   : > { %6567 = vmatmul.mubr.bf16.gmra.mrb[52].mxu1 %v8180_v17 }
 0x1ee   : > { %6570 = vmatprep.mubr.bf16.mxu1 %v8182_v18 }
 0x1f5   : > { %6571 = vmatmul.mubr.bf16.gmra.mrb[56].mxu1 %v8190_v23 }
 0x1f6   : > { %6574 = vmatprep.mubr.bf16.mxu1 %v8192_v24 }
 0x1fd   : > { %6575 = vmatmul.mubr.bf16.gmra.mrb[60].mxu1 %v8198_v27 }
 0x245   : > { %v6460_v42 = vpop.f32.mrb[0].mxu0 }
 0x246   : > { %v847_v43 = vadd.f32 %v6460_v42, %v8383_v40  ;;  %v838_v45 = vpop.f32.mrb[1].mxu0 }
 0x247   : > { %v839_v47 = vadd.f32 %v838_v45, %v8383_v40  ;;  %v6461_v49 = vpop.f32.mrb[2].mxu0 }
 0x248   : > { %v850_v53 = vadd.f32 %v6461_v49, %v8383_v40  ;;  %v841_v55 = vpop.f32.mrb[3].mxu0 }
 0x249   : > { %v842_v57 = vadd.f32 %v841_v55, %v8383_v40 }
 0x24a   : > { %v1216_v59 = vpack.c.bf16 %v850_v53, %v847_v43 }
 0x24b   : > { %v1215_v63 = vpack.c.bf16 %v842_v57, %v839_v47 }
 0x24d   : > { %v6464_v1 = vpop.f32.mrb[4].mxu0  ;;  %6506 = vmatprep.subr.bf16.mxu0 %v1215_v63 }
 0x24e   : > { %v863_v6 = vadd.f32 %v6464_v1, %v8383_v40  ;;  %v854_v7 = vpop.f32.mrb[5].mxu0  ;;  %6507 = vmatpush3.bf16.msra.mxu0 %v1215_v63 }
 0x24f   : > { %v855_v16 = vadd.f32 %v854_v7, %v8383_v40  ;;  %v6465_v19 = vpop.f32.mrb[6].mxu0  ;;  %6508 = vmatprep.subr.bf16.mxu0 %v1216_v59 }
 0x250   : > { %v866_v21 = vadd.f32 %v6465_v19, %v8383_v40  ;;  %v857_v22 = vpop.f32.mrb[7].mxu0 }
 0x251   : > { %v858_v25 = vadd.f32 %v857_v22, %v8383_v40 }
 0x252   : > { %v1218_v32 = vpack.c.bf16 %v866_v21, %v863_v6  ;;  %6509 = vmatpush3.bf16.msra.mxu0 %v1216_v59 }
 0x253   : > { %v1217_v38 = vpack.c.bf16 %v858_v25, %v855_v16 }
 0x255   : > { %v6468_v13 = vpop.f32.mrb[8].mxu0  ;;  %6510 = vmatprep.subr.bf16.mxu0 %v1217_v38 }
 0x256   : > { %v879_v37 = vadd.f32 %v6468_v13, %v8383_v40  ;;  %6511 = vmatpush3.bf16.msra.mxu0 %v1217_v38 }
 0x257   : > { %6512 = vmatprep.subr.bf16.mxu0 %v1218_v32 }
 0x25a   : > { %6513 = vmatpush3.bf16.msra.mxu0 %v1218_v32 }
 0x297   : > { %v8321_v41 = vpop.f32.mrb[32].mxu1 }
 0x298   : > { %1067 = vmax.xlane.f32.xlu1 %v8321_v41  ;;  %v8324_v44 = vpop.f32.mrb[33].mxu1 }
 0x299   : > { %1063 = vmax.xlane.f32.xlu0 %v8324_v44  ;;  %v8327_v46 = vpop.f32.mrb[34].mxu1 }
 0x29a   : > { %v8329_v48 = vpop.f32.mrb[35].mxu1 }
 0x29c   : > { %1069 = vmax.xlane.f32.xlu1 %v8327_v46 }
 0x29d   : > { %1065 = vmax.xlane.f32.xlu0 %v8329_v48 }
 0x29f   : > { %v8333_v50 = vpop.f32.mrb[36].mxu1 }
 0x2a0   : > { %v8335_v51 = vpop.f32.mrb[37].mxu1 }
 0x2a1   : > { %1071 = vmax.xlane.f32.xlu0 %v8335_v51  ;;  %v8338_v52 = vpop.f32.mrb[38].mxu1 }
 0x2a2   : > { %v8340_v54 = vpop.f32.mrb[39].mxu1 }
 0x2a3   : > { %1073 = vmax.xlane.f32.xlu1 %v8340_v54 }
 0x2a5   : > { %1075 = vmax.xlane.f32.xlu0 %v8333_v50 }
 0x2a7   : > { %1077 = vmax.xlane.f32.xlu1 %v8338_v52  ;;  %v8345_v56 = vpop.f32.mrb[40].mxu1 }
 0x2a8   : > { %v8347_v58 = vpop.f32.mrb[41].mxu1 }
 0x2a9   : > { %1079 = vmax.xlane.f32.xlu0 %v8347_v58  ;;  %v8350_v60 = vpop.f32.mrb[42].mxu1 }
 0x2aa   : > { %v8352_v61 = vpop.f32.mrb[43].mxu1 }
 0x2ab   : > { %1081 = vmax.xlane.f32.xlu1 %v8352_v61 }
 0x2ad   : > { %1083 = vmax.xlane.f32.xlu0 %v8345_v56 }
 0x2af   : > { %1085 = vmax.xlane.f32.xlu1 %v8350_v60  ;;  %v8357_v62 = vpop.f32.mrb[44].mxu1 }
 0x2b0   : > { %v8359_v0 = vpop.f32.mrb[45].mxu1 }
 0x2b1   : > { %1087 = vmax.xlane.f32.xlu0 %v8359_v0  ;;  %v8362_v2 = vpop.f32.mrb[46].mxu1 }
 0x2b2   : > { %v8364_v5 = vpop.f32.mrb[47].mxu1 }
 0x2b3   : > { %1089 = vmax.xlane.f32.xlu1 %v8364_v5 }
 0x2b5   : > { %1091 = vmax.xlane.f32.xlu0 %v8357_v62 }
 0x2b7   : > { %1093 = vmax.xlane.f32.xlu1 %v8362_v2 }
 0x325   : > { %v1068_v3 = vpop.xlane.xlu1 %1067 }
 0x326   : > { %v1097_v14 = vsub.f32 %v8321_v41, %v1068_v3  ;;  %v1064_v15 = vpop.xlane.xlu0 %1063  ;;  %v870_v41 = vpop.f32.mrb[9].mxu0 }
 0x327   : > { %v1095_v20 = vsub.f32 %v8324_v44, %v1064_v15  ;;  %v871_v9 = vadd.f32 %v870_v41, %v8383_v40  ;;  %v6469_v11 = vpop.f32.mrb[10].mxu0 }
 0x328   : > { %v1115_v33 = vmul.f32 1.442695, %v1097_v14  ;;  %v882_v42 = vadd.f32 %v6469_v11, %v8383_v40 }
 0x329   : > { %v1111_v26 = vmul.f32 1.442695, %v1095_v20  ;;  %v1070_v28 = vpop.xlane.xlu1 %1069 }
 0x32a   : > { %v1098_v35 = vsub.f32 %v8327_v46, %v1070_v28  ;;  %v1066_v36 = vpop.xlane.xlu0 %1065  ;;  %v1220_v53 = vpack.c.bf16 %v882_v42, %v879_v37 }
 0x32b   : > { %7319 = vpow2.f32 %v1111_v26  ;;  %v1096_v39 = vsub.f32 %v8329_v48, %v1066_v36  ;;  %v873_v48 = vpop.f32.mrb[11].mxu0 }
 0x32c   : > { %7321 = vpow2.f32 %v1115_v33  ;;  %v1117_v44 = vmul.f32 1.442695, %v1098_v35  ;;  %v874_v45 = vadd.f32 %v873_v48, %v8383_v40 }
 0x32d   : > { %v1113_v34 = vmul.f32 1.442695, %v1096_v39 }
 0x32e   : > { %v1072_v8 = vpop.xlane.xlu0 %1071  ;;  %v1219_v57 = vpack.c.bf16 %v874_v45, %v871_v9 }
 0x32f   : > { %7323 = vpow2.f32 %v1113_v34  ;;  %v1099_v46 = vsub.f32 %v8335_v51, %v1072_v8  ;;  %v6472_v51 = vpop.f32.mrb[12].mxu0 }
 0x330   : > { %v1074_v43 = vpop.xlane.xlu1 %1073  ;;  %7325 = vpow2.f32 %v1117_v44  ;;  %6514 = vmatprep.subr.bf16.mxu0 %v1219_v57  ;;  %v895_v14 = vadd.f32 %v6472_v51, %v8383_v40  ;;  %v8468_v51 = vld [vmem:[%s10505_s1 + $0x10] sm:$0xff]  }
 0x331   : > { %v1119_v47 = vmul.f32 1.442695, %v1099_v46  ;;  %v1100_v49 = vsub.f32 %v8340_v54, %v1074_v43  ;;  %v886_v54 = vpop.f32.mrb[13].mxu0  ;;  %6515 = vmatpush3.bf16.msra.mxu0 %v1219_v57 }
 0x332   : > { %v1076_v55 = vpop.xlane.xlu0 %1075  ;;  %v887_v16 = vadd.f32 %v886_v54, %v8383_v40  ;;  %v6473_v19 = vpop.f32.mrb[14].mxu0  ;;  %6516 = vmatprep.subr.bf16.mxu0 %v1220_v53 }
 0x333   : > { %7327 = vpow2.f32 %v1119_v47  ;;  %v1121_v59 = vmul.f32 1.442695, %v1100_v49  ;;  %v1101_v63 = vsub.f32 %v8333_v50, %v1076_v55  ;;  %v898_v21 = vadd.f32 %v6473_v19, %v8383_v40  ;;  %v889_v22 = vpop.f32.mrb[15].mxu0 }
 0x334   : > { %v1078_v1 = vpop.xlane.xlu1 %1077  ;;  %v890_v26 = vadd.f32 %v889_v22, %v8383_v40 }
 0x335   : > { %v8404_v3 = vpop.eup %7319  ;;  %v1123_v6 = vmul.f32 1.442695, %v1101_v63  ;;  %v1102_v7 = vsub.f32 %v8338_v52, %v1078_v1  ;;  %7329 = vpow2.f32 %v1121_v59  ;;  %v1222_v35 = vpack.c.bf16 %v898_v21, %v895_v14  ;;  %6517 = vmatpush3.bf16.msra.mxu0 %v1220_v53  ;;  %v6564_v14 = vpop.f32.mrb[48].mxu1 }
 0x336   : > { %v1080_v15 = vpop.xlane.xlu0 %1079  ;;  %1143 = vadd.xlane.f32.xlu0 %v8404_v3  ;;  %v8412_v52 = vpop.eup %7321 }
 0x337   : > { %7331 = vpow2.f32 %v1123_v6  ;;  %v1125_v50 = vmul.f32 1.442695, %v1102_v7  ;;  %v1103_v20 = vsub.f32 %v8347_v58, %v1080_v15  ;;  %v1221_v58 = vpack.c.bf16 %v890_v26, %v887_v16  ;;  %v1507_v15 = vpop.f32.mrb[49].mxu1 }
 0x338   : > { %v1082_v25 = vpop.xlane.xlu1 %1081  ;;  %v1459_v6 = vsub.s32 5, %v8209_v29  ;;  %v6565_v19 = vpop.f32.mrb[50].mxu1 }
 0x339   : > { %v8415_v28 = vpop.eup %7323  ;;  %v1127_v32 = vmul.f32 1.442695, %v1103_v20  ;;  %v1104_v33 = vsub.f32 %v8352_v61, %v1082_v25  ;;  %7333 = vpow2.f32 %v1125_v50  ;;  %6518 = vmatprep.subr.bf16.mxu0 %v1221_v58  ;;  %v1510_v20 = vpop.f32.mrb[51].mxu1 }
 0x33a   : > { %v1084_v36 = vpop.xlane.xlu0 %1083  ;;  %1147 = vadd.xlane.f32.xlu0 %v8412_v52  ;;  %1145 = vadd.xlane.f32.xlu1 %v8415_v28  ;;  %v8421_v13 = vpop.eup %7325  ;;  %v8473_v7 = vrot.slane %v8214_v31, %v1459_v6 }
 0x33b   : > { %7335 = vpow2.f32 %v1127_v32  ;;  %v1129_v38 = vmul.f32 1.442695, %v1104_v33  ;;  %v1105_v39 = vsub.f32 %v8345_v56, %v1084_v36  ;;  %6519 = vmatpush3.bf16.msra.mxu0 %v1221_v58  ;;  %v6568_v32 = vpop.f32.mrb[52].mxu1 }
 0x33c   : > { %v1086_v40 = vpop.xlane.xlu1 %1085  ;;  %6520 = vmatprep.subr.bf16.mxu0 %v1222_v35  ;;  %v1516_v54 = vadd.f32 %v6564_v14, %v8473_v7  ;;  %v1508_v16 = vadd.f32 %v1507_v15, %v8473_v7  ;;  %v1519_v50 = vadd.f32 %v6565_v19, %v8473_v7  ;;  %v1511_v21 = vadd.f32 %v1510_v20, %v8473_v7 }
 0x33d   : > { %v8423_v34 = vpop.eup %7327  ;;  %v1131_v61 = vmul.f32 1.442695, %v1105_v39  ;;  %v1106_v37 = vsub.f32 %v8350_v60, %v1086_v40  ;;  %7337 = vpow2.f32 %v1129_v38  ;;  %v1532_v33 = vadd.f32 %v6568_v32, %v8473_v7 }
 0x33e   : > { %1151 = vadd.xlane.f32.xlu0 %v8423_v34  ;;  %v1088_v41 = vpop.xlane.xlu0 %1087  ;;  %1149 = vadd.xlane.f32.xlu1 %v8421_v13  ;;  %v1692_v22 = vpack.c.bf16 %v1519_v50, %v1516_v54  ;;  %v1691_v25 = vpack.c.bf16 %v1511_v21, %v1508_v16 }
 0x33f   : > { %7339 = vpow2.f32 %v1131_v61  ;;  %v1133_v44 = vmul.f32 1.442695, %v1106_v37  ;;  %v1107_v56 = vsub.f32 %v8359_v0, %v1088_v41  ;;  %v8429_v8 = vpop.eup %7329  ;;  %6521 = vmatpush3.bf16.msra.mxu0 %v1222_v35  ;;  %v1523_v35 = vpop.f32.mrb[53].mxu1 }
 0x340   : > { %v1090_v9 = vpop.xlane.xlu1 %1089  ;;  %6538 = vmatprep.subr.bf16.mxu0 %v8468_v51  ;;  %7094 = vmatprep.subr.msk.bf16.mxu1 %vm917_vm0, %v1691_v25  ;;  %v1724_v31 = vsel %vm917_vm0, %v1691_v25, 0  ;;  %v1524_v36 = vadd.f32 %v1523_v35, %v8473_v7  ;;  %v6569_v58 = vpop.f32.mrb[54].mxu1 }
 0x341   : > { %v8431_v11 = vpop.eup %7331  ;;  %v1135_v46 = vmul.f32 1.442695, %v1107_v56  ;;  %v1108_v60 = vsub.f32 %v8364_v5, %v1090_v9  ;;  %7341 = vpow2.f32 %v1133_v44  ;;  %6599 = vmatpush3.bf16.xpose.msra.mxu1 %v1724_v31  ;;  %v1535_v38 = vadd.f32 %v6569_v58, %v8473_v7  ;;  %v1526_v39 = vpop.f32.mrb[55].mxu1 }
 0x342   : > { %1155 = vadd.xlane.f32.xlu0 %v8431_v11  ;;  %v1092_v42 = vpop.xlane.xlu0 %1091  ;;  %1153 = vadd.xlane.f32.xlu1 %v8429_v8  ;;  %v1527_v37 = vadd.f32 %v1526_v39, %v8473_v7  ;;  %v1727_v44 = vsel %vm917_vm0, %v1692_v22, 0  ;;  %v7232_v39 = vld [vmem:[%s10505_s1 + $0x18] sm:$0xff]  }
 0x343   : > { %7343 = vpow2.f32 %v1135_v46  ;;  %v1137_v48 = vmul.f32 1.442695, %v1108_v60  ;;  %v1109_v0 = vsub.f32 %v8357_v62, %v1092_v42  ;;  %v8437_v43 = vpop.eup %7333  ;;  %7095 = vmatprep.subr.msk.bf16.mxu1 %vm917_vm0, %v1692_v22  ;;  %v1694_v41 = vpack.c.bf16 %v1535_v38, %v1532_v33  ;;  %v6572_v60 = vpop.f32.mrb[56].mxu1 }
 0x344   : > { %v1094_v45 = vpop.xlane.xlu1 %1093  ;;  %v1693_v56 = vpack.c.bf16 %v1527_v37, %v1524_v36  ;;  %v1548_v42 = vadd.f32 %v6572_v60, %v8473_v7 }
 0x345   : > { %v8439_v47 = vpop.eup %7335  ;;  %v1139_v49 = vmul.f32 1.442695, %v1109_v0  ;;  %v1110_v53 = vsub.f32 %v8362_v2, %v1094_v45  ;;  %7345 = vpow2.f32 %v1137_v48  ;;  %v1539_v48 = vpop.f32.mrb[57].mxu1 }
 0x346   : > { %1159 = vadd.xlane.f32.xlu0 %v8439_v47  ;;  %1157 = vadd.xlane.f32.xlu1 %v8437_v43  ;;  %v6573_v0 = vpop.f32.mrb[58].mxu1  ;;  %v1730_v54 = vsel %vm917_vm0, %v1693_v56, 0 }
 0x347   : > { %7347 = vpow2.f32 %v1139_v49  ;;  %v1141_v5 = vmul.f32 1.442695, %v1110_v53  ;;  %v8444_v55 = vpop.eup %7337  ;;  %v1540_v53 = vadd.f32 %v1539_v48, %v8473_v7  ;;  %v1542_v6 = vpop.f32.mrb[59].mxu1 }
 0x348   : > { %v1543_v16 = vadd.f32 %v1542_v6, %v8473_v7 }
 0x349   : > { %v8446_v57 = vpop.eup %7339  ;;  %7349 = vpow2.f32 %v1141_v5  ;;  %6601 = vmatpush3.bf16.xpose.msra.mxu1 %v1727_v44  ;;  %v1551_v5 = vadd.f32 %v6573_v0, %v8473_v7 }
 0x34a   : > { %1163 = vadd.xlane.f32.xlu0 %v8446_v57  ;;  %1161 = vadd.xlane.f32.xlu1 %v8444_v55  ;;  %v1695_v21 = vpack.c.bf16 %v1543_v16, %v1540_v53 }
 0x34b   : > { %v8450_v62 = vpop.eup %7341  ;;  %7096 = vmatprep.subr.msk.bf16.mxu1 %vm917_vm0, %v1693_v56  ;;  %v8492_v15 = vpack.c.bf16 %v1551_v5, %v1548_v42 }
 0x34d   : > { %v8452_v59 = vpop.eup %7343 }
 0x34e   : > { %1167 = vadd.xlane.f32.xlu0 %v8452_v59  ;;  %1165 = vadd.xlane.f32.xlu1 %v8450_v62 }
 0x34f   : > { %v8456_v2 = vpop.eup %7345 }
 0x351   : > { %v8458_v63 = vpop.eup %7347  ;;  %6603 = vmatpush3.bf16.xpose.msra.mxu1 %v1730_v54 }
 0x352   : > { %1171 = vadd.xlane.f32.xlu0 %v8458_v63  ;;  %1169 = vadd.xlane.f32.xlu1 %v8456_v2 }
 0x353   : > { %v8462_v1 = vpop.eup %7349  ;;  %7097 = vmatprep.subr.msk.bf16.mxu1 %vm917_vm0, %v1694_v41 }
 0x356   : > { %1173 = vadd.xlane.f32.xlu1 %v8462_v1 }
 0x3c3   : > { %v1144_v26 = vpop.xlane.xlu0 %1143 }
 0x3c4   : > { %7351 = vrcp.f32 %v1144_v26 }
 0x3c7   : > { %v1148_v40 = vpop.xlane.xlu0 %1147  ;;  %v1146_v61 = vpop.xlane.xlu1 %1145 }
 0x3c8   : > { %7353 = vrcp.f32 %v1146_v61 }
 0x3c9   : > { %7355 = vrcp.f32 %v1148_v40 }
 0x3cb   : > { %v1152_v9 = vpop.xlane.xlu0 %1151  ;;  %v1150_v46 = vpop.xlane.xlu1 %1149 }
 0x3cc   : > { %7357 = vrcp.f32 %v1150_v46 }
 0x3cd   : > { %7359 = vrcp.f32 %v1152_v9 }
 0x3ce   : > { %v7352_v14 = vpop.eup %7351 }
 0x3cf   : > { %v1156_v45 = vpop.xlane.xlu0 %1155  ;;  %v1154_v49 = vpop.xlane.xlu1 %1153  ;;  %v1191_v22 = vmul.f32 %v7352_v14, %v8404_v3  ;;  %v1733_v3 = vsel %vm917_vm0, %v1694_v41, 0 }
 0x3d0   : > { %7361 = vrcp.f32 %v1154_v49  ;;  %6605 = vmatpush3.bf16.xpose.msra.mxu1 %v1733_v3 }
 0x3d1   : > { %7363 = vrcp.f32 %v1156_v45  ;;  %7098 = vmatprep.subr.msk.bf16.mxu1 %vm917_vm0, %v1695_v21 }
 0x3d2   : > { %v7354_v19 = vpop.eup %7353 }
 0x3d3   : > { %v1160_v50 = vpop.xlane.xlu0 %1159  ;;  %v1158_v20 = vpop.xlane.xlu1 %1157  ;;  %v1192_v25 = vmul.f32 %v7354_v19, %v8415_v28 }
 0x3d4   : > { %v7356_v26 = vpop.eup %7355  ;;  %7365 = vrcp.f32 %v1158_v20 }
 0x3d5   : > { %v1207_v31 = vpack.c.bf16 %v1192_v25, %v1191_v22  ;;  %7367 = vrcp.f32 %v1160_v50  ;;  %v1193_v36 = vmul.f32 %v7356_v26, %v8412_v52 }
 0x3d6   : > { %v7358_v32 = vpop.eup %7357 }
 0x3d7   : > { %v1164_v33 = vpop.xlane.xlu0 %1163  ;;  %v1162_v35 = vpop.xlane.xlu1 %1161  ;;  %v1194_v58 = vmul.f32 %v7358_v32, %v8421_v13  ;;  %6522 = vmatprep.mubr.bf16.mxu0 %v1207_v31 }
 0x3d8   : > { %v7360_v38 = vpop.eup %7359  ;;  %7369 = vrcp.f32 %v1162_v35 }
 0x3d9   : > { %v1208_v28 = vpack.c.bf16 %v1194_v58, %v1193_v36  ;;  %7371 = vrcp.f32 %v1164_v33  ;;  %v1195_v44 = vmul.f32 %v7360_v38, %v8423_v34  ;;  %v7233_v58 = vld [vmem:[%s10505_s1 + $0x20] sm:$0xff]  }
 0x3da   : > { %v7362_v40 = vpop.eup %7361 }
 0x3db   : > { %v1168_v61 = vpop.xlane.xlu0 %1167  ;;  %v1166_v37 = vpop.xlane.xlu1 %1165  ;;  %6523 = vmatmul.mubr.bf16.vlgmr.msra.gmra.mrb[16].mxu0 %v1208_v28  ;;  %v1196_v52 = vmul.f32 %v7362_v40, %v8429_v8  ;;  %v1736_v8 = vsel %vm917_vm0, %v1695_v21, 0 }
 0x3dc   : > { %v7364_v13 = vpop.eup %7363  ;;  %7373 = vrcp.f32 %v1166_v37  ;;  %6539 = vmatpush3.bf16.xpose.msra.mxu0 %v8468_v51  ;;  %6607 = vmatpush3.bf16.xpose.msra.mxu1 %v1736_v8 }
 0x3dd   : > { %v1209_v41 = vpack.c.bf16 %v1196_v52, %v1195_v44  ;;  %6540 = vmatprep.subr.bf16.mxu0 %v7232_v39  ;;  %7375 = vrcp.f32 %v1168_v61  ;;  %v1197_v60 = vmul.f32 %v7364_v13, %v8431_v11  ;;  %7099 = vmatprep.subr.msk.bf16.mxu1 %vm917_vm0, %v8492_v15 }
 0x3de   : > { %v7366_v56 = vpop.eup %7365 }
 0x3df   : > { %v1172_v9 = vpop.xlane.xlu0 %1171  ;;  %v1170_v46 = vpop.xlane.xlu1 %1169  ;;  %6526 = vmatprep.mubr.bf16.mxu0 %v1209_v41  ;;  %v1198_v34 = vmul.f32 %v7366_v56, %v8437_v43 }
 0x3e0   : > { %v7368_v42 = vpop.eup %7367  ;;  %7377 = vrcp.f32 %v1170_v46 }
 0x3e1   : > { %7379 = vrcp.f32 %v1172_v9  ;;  %v1210_v48 = vpack.c.bf16 %v1198_v34, %v1197_v60  ;;  %v1199_v45 = vmul.f32 %v7368_v42, %v8439_v47 }
 0x3e2   : > { %v7370_v51 = vpop.eup %7369 }
 0x3e3   : > { %v1174_v0 = vpop.xlane.xlu1 %1173  ;;  %6527 = vmatmul.mubr.bf16.gmra.mrb[20].mxu0 %v1210_v48  ;;  %v1200_v49 = vmul.f32 %v7370_v51, %v8444_v55  ;;  %v7372_v53 = vpop.eup %7371 }
 0x3e4   : > { %7381 = vrcp.f32 %v1174_v0  ;;  %6541 = vmatpush3.bf16.xpose.msra.mxu0 %v7232_v39  ;;  %v1201_v5 = vmul.f32 %v7372_v53, %v8446_v57  ;;  %v6576_v57 = vpop.f32.mrb[60].mxu1 }
 0x3e5   : > { %v1211_v11 = vpack.c.bf16 %v1200_v49, %v1199_v45  ;;  %v8590_v49 = vsub.s32 1, %v8209_v29 }
 0x3e6   : > { %v7374_v43 = vpop.eup %7373 }
 0x3e7   : > { %6530 = vmatprep.mubr.bf16.mxu0 %v1211_v11  ;;  %v1202_v6 = vmul.f32 %v7374_v43, %v8450_v62  ;;  %v7376_v14 = vpop.eup %7375  ;;  %v1739_v62 = vsel %vm917_vm0, %v8492_v15, 0  ;;  %10610 = vst [vmem:[#allocation40_spill] sm:$0xff] %v8590_v49  ;;  %v8594_v11 = vld [vmem:[#allocation5] sm:$0xff] }
 0x3e8   : > { %v1203_v47 = vmul.f32 %v7376_v14, %v8452_v59  ;;  %v1555_v59 = vpop.f32.mrb[61].mxu1  ;;  %6609 = vmatpush3.bf16.xpose.msra.mxu1 %v1739_v62  ;;  %v1347_v43 = vrot.slane %v8594_v11, %v8590_v49 }
 0x3e9   : > { %v1212_v54 = vpack.c.bf16 %v1202_v6, %v1201_v5 }
 0x3ea   : > { %v7378_v16 = vpop.eup %7377 }
 0x3eb   : > { %v7380_v19 = vpop.eup %7379  ;;  %6531 = vmatmul.mubr.bf16.gmra.mrb[24].mxu0 %v1212_v54  ;;  %v1204_v55 = vmul.f32 %v7378_v16, %v8456_v2  ;;  %v1564_v2 = vadd.f32 %v6576_v57, %v8473_v7 }
 0x3ec   : > { %v1205_v21 = vmul.f32 %v7380_v19, %v8458_v63  ;;  %v1556_v63 = vadd.f32 %v1555_v59, %v8473_v7 }
 0x3ed   : > { %v1213_v20 = vpack.c.bf16 %v1204_v55, %v1203_v47 }
 0x3ee   : > { %v7382_v50 = vpop.eup %7381 }
 0x3ef   : > { %v1206_v22 = vmul.f32 %v7382_v50, %v8462_v1  ;;  %6534 = vmatprep.mubr.bf16.mxu0 %v1213_v20  ;;  %v6577_v1 = vpop.f32.mrb[62].mxu1 }
 0x3f0   : > { %v1567_v26 = vadd.f32 %v6577_v1, %v8473_v7  ;;  %v1558_v31 = vpop.f32.mrb[63].mxu1 }
 0x3f1   : > { %v1214_v25 = vpack.c.bf16 %v1206_v22, %v1205_v21  ;;  %v1559_v32 = vadd.f32 %v1558_v31, %v8473_v7  ;;  %v7234_v21 = vld [vmem:[%s10505_s1 + $0x28] sm:$0xff]  }
 0x3f2   : > { %v1698_v33 = vpack.c.bf16 %v1567_v26, %v1564_v2 }
 0x3f3   : > { %6535 = vmatmul.mubr.bf16.gmra.mrb[28].mxu0 %v1214_v25  ;;  %v1697_v35 = vpack.c.bf16 %v1559_v32, %v1556_v63  ;;  %v7235_v32 = vld [vmem:[%s10505_s1 + $0x60] sm:$0xff]  }
 0x3f4   : > { %6542 = vmatprep.mubr.bf16.mxu0 %v8156_v4  ;;  %v1745_v15 = vsel %vm917_vm0, %v1698_v33, 0 }
 0x3f5   : > { %7100 = vmatprep.subr.msk.bf16.mxu1 %vm917_vm0, %v1697_v35  ;;  %v1742_v36 = vsel %vm917_vm0, %v1697_v35, 0 }
 0x3f6   : > { %6611 = vmatpush3.bf16.xpose.msra.mxu1 %v1742_v36 }
 0x3f7   : > { %7101 = vmatprep.subr.msk.bf16.mxu1 %vm917_vm0, %v1698_v33 }
 0x3fb   : > { %6543 = vmatmul.mubr.bf16.vlgmr.msra.gmra.mrb[32].mxu0 %v8167_v10 }
 0x3fc   : > { %6546 = vmatprep.mubr.bf16.mxu0 %v8172_v12 }
 0x3fe   : > { %6613 = vmatpush3.bf16.xpose.msra.mxu1 %v1745_v15 }
 0x3ff   : > { %6726 = vmatprep.subr.bf16.mxu1 %v7233_v58 }
 0x403   : > { %6547 = vmatmul.mubr.bf16.gmra.mrb[36].mxu0 %v8180_v17 }
 0x404   : > { %6550 = vmatprep.mubr.bf16.mxu0 %v8182_v18 }
 0x40b   : > { %6551 = vmatmul.mubr.bf16.gmra.mrb[40].mxu0 %v8190_v23 }
 0x40c   : > { %6554 = vmatprep.mubr.bf16.mxu0 %v8192_v24 }
 0x413   : > { %6555 = vmatmul.mubr.bf16.gmra.mrb[44].mxu0 %v8198_v27 }
 0x414   : > { %6582 = vmatprep.mubr.bf16.mxu0 %v8156_v4 }
 0x4ae   : > { %v8543_v38 = vpop.f32.mrb[16].mxu0 }
 0x4af   : > { %10596 = vst [vmem:[#allocation26_spill] sm:$0xff] %v8543_v38  ;;  %v8545_v7 = vpop.f32.mrb[17].mxu0 }
 0x4b0   : > { %v8547_v3 = vpop.f32.mrb[18].mxu0 }
 0x4b1   : > { %10597 = vst [vmem:[#allocation27_spill] sm:$0xff] %v8547_v3  ;;  %v8551_v39 = vpop.f32.mrb[19].mxu0 }
 0x4b6   : > { %v8555_v61 = vpop.f32.mrb[20].mxu0 }
 0x4b7   : > { %10598 = vst [vmem:[#allocation28_spill] sm:$0xff] %v8555_v61  ;;  %v8557_v37 = vpop.f32.mrb[21].mxu0 }
 0x4b8   : > { %10599 = vst [vmem:[#allocation29_spill] sm:$0xff] %v8557_v37  ;;  %v8559_v44 = vpop.f32.mrb[22].mxu0 }
 0x4b9   : > { %10600 = vst [vmem:[#allocation30_spill] sm:$0xff] %v8559_v44  ;;  %v8563_v13 = vpop.f32.mrb[23].mxu0 }
 0x4ba   : > { %10601 = vst [vmem:[#allocation31_spill] sm:$0xff] %v8563_v13 }
 0x4be   : > { %v8567_v56 = vpop.f32.mrb[24].mxu0 }
 0x4bf   : > { %10602 = vst [vmem:[#allocation32_spill] sm:$0xff] %v8567_v56  ;;  %v8569_v9 = vpop.f32.mrb[25].mxu0 }
 0x4c0   : > { %10603 = vst [vmem:[#allocation33_spill] sm:$0xff] %v8569_v9  ;;  %v8571_v46 = vpop.f32.mrb[26].mxu0 }
 0x4c1   : > { %10604 = vst [vmem:[#allocation34_spill] sm:$0xff] %v8571_v46  ;;  %v8575_v34 = vpop.f32.mrb[27].mxu0 }
 0x4c2   : > { %10605 = vst [vmem:[#allocation35_spill] sm:$0xff] %v8575_v34 }
 0x4c6   : > { %v8579_v8 = vpop.f32.mrb[28].mxu0 }
 0x4c7   : > { %10606 = vst [vmem:[#allocation36_spill] sm:$0xff] %v8579_v8  ;;  %v8581_v48 = vpop.f32.mrb[29].mxu0  ;;  %v2611_v8 = vsub.s32 6, %v8209_v29 }
 0x4c8   : > { %10607 = vst [vmem:[#allocation37_spill] sm:$0xff] %v8581_v48  ;;  %v8583_v51 = vpop.f32.mrb[30].mxu0 }
 0x4c9   : > { %10608 = vst [vmem:[#allocation38_spill] sm:$0xff] %v8583_v51  ;;  %v8587_v45 = vpop.f32.mrb[31].mxu0 }
 0x4ca   : > { %10609 = vst [vmem:[#allocation39_spill] sm:$0xff] %v8587_v45 }
 0x4ce   : > { %v6544_v5 = vpop.f32.mrb[32].mxu0 }
 0x4cf   : > { %v1394_v6 = vpop.f32.mrb[33].mxu0  ;;  %v1403_v54 = vadd.f32 %v6544_v5, %v1347_v43 }
 0x4d0   : > { %v6545_v14 = vpop.f32.mrb[34].mxu0  ;;  %v1395_v47 = vadd.f32 %v1394_v6, %v1347_v43 }
 0x4d1   : > { %v1406_v16 = vadd.f32 %v6545_v14, %v1347_v43  ;;  %v1397_v19 = vpop.f32.mrb[35].mxu0 }
 0x4d2   : > { %v1398_v55 = vadd.f32 %v1397_v19, %v1347_v43 }
 0x4d3   : > { %v1684_v50 = vpack.c.bf16 %v1406_v16, %v1403_v54 }
 0x4d4   : > { %v1683_v20 = vpack.c.bf16 %v1398_v55, %v1395_v47 }
 0x4d6   : > { %v6548_v22 = vpop.f32.mrb[36].mxu0  ;;  %6614 = vmatprep.mubr.msk.bf16.mxu1 %vm917_vm0, %v1683_v20 }
 0x4d7   : > { %v1410_v25 = vpop.f32.mrb[37].mxu0  ;;  %6615 = vmatmul.mubr.msk.bf16.vlgmr.msra.gmra.mrb[64].mxu1 %vm917_vm0, %v1684_v50  ;;  %v1419_v62 = vadd.f32 %v6548_v22, %v1347_v43 }
 0x4d8   : > { %v6549_v57 = vpop.f32.mrb[38].mxu0  ;;  %6727 = vmatpush3.bf16.xpose.msra.mxu1 %v7233_v58  ;;  %v1411_v63 = vadd.f32 %v1410_v25, %v1347_v43 }
 0x4d9   : > { %v1422_v59 = vadd.f32 %v6549_v57, %v1347_v43  ;;  %v1413_v2 = vpop.f32.mrb[39].mxu0  ;;  %6728 = vmatprep.subr.bf16.mxu1 %v7234_v21 }
 0x4da   : > { %v1414_v1 = vadd.f32 %v1413_v2, %v1347_v43  ;;  %v7238_v2 = vld [vmem:[%s10505_s1 + $0xa8] sm:$0xff]  }
 0x4db   : > { %v1686_v26 = vpack.c.bf16 %v1422_v59, %v1419_v62  ;;  %v7236_v59 = vld [vmem:[%s10505_s1 + $0x68] sm:$0xff]  }
 0x4dc   : > { %v1685_v31 = vpack.c.bf16 %v1414_v1, %v1411_v63  ;;  %v7239_v63 = vld [vmem:[%s10505_s1 + $0x90] sm:$0xff]   ;;  %v7240_v1 = vld [vmem:[%s10505_s1 + $0x98] sm:$0xff]  }
 0x4dd   : > { %6578 = vmatprep.subr.bf16.mxu0 %v7239_v63 }
 0x4de   : > { %v6552_v33 = vpop.f32.mrb[40].mxu0  ;;  %6618 = vmatprep.mubr.msk.bf16.mxu1 %vm917_vm0, %v1685_v31  ;;  %6579 = vmatpush3.bf16.xpose.msra.mxu0 %v7239_v63 }
 0x4df   : > { %v1426_v35 = vpop.f32.mrb[41].mxu0  ;;  %6619 = vmatmul.mubr.msk.bf16.gmra.mrb[68].mxu1 %vm917_vm0, %v1686_v26  ;;  %v1435_v15 = vadd.f32 %v6552_v33, %v1347_v43  ;;  %6580 = vmatprep.subr.bf16.mxu0 %v7240_v1 }
 0x4e0   : > { %v6553_v36 = vpop.f32.mrb[42].mxu0  ;;  %6729 = vmatpush3.bf16.xpose.msra.mxu1 %v7234_v21  ;;  %v1427_v6 = vadd.f32 %v1426_v35, %v1347_v43 }
 0x4e1   : > { %v1438_v58 = vadd.f32 %v6553_v36, %v1347_v43  ;;  %v1429_v5 = vpop.f32.mrb[43].mxu0  ;;  %6746 = vmatprep.subr.bf16.mxu1 %v7235_v32 }
 0x4e2   : > { %v1430_v14 = vadd.f32 %v1429_v5, %v1347_v43 }
 0x4e3   : > { %v1688_v54 = vpack.c.bf16 %v1438_v58, %v1435_v15 }
 0x4e4   : > { %v1687_v16 = vpack.c.bf16 %v1430_v14, %v1427_v6 }
 0x4e6   : > { %v6556_v19 = vpop.f32.mrb[44].mxu0  ;;  %6622 = vmatprep.mubr.msk.bf16.mxu1 %vm917_vm0, %v1687_v16  ;;  %6581 = vmatpush3.bf16.xpose.msra.mxu0 %v7240_v1 }
 0x4e7   : > { %v1442_v47 = vpop.f32.mrb[45].mxu0  ;;  %6623 = vmatmul.mubr.msk.bf16.gmra.mrb[72].mxu1 %vm917_vm0, %v1688_v54  ;;  %v1451_v50 = vadd.f32 %v6556_v19, %v1347_v43 }
 0x4e8   : > { %v6557_v55 = vpop.f32.mrb[46].mxu0  ;;  %v1443_v25 = vadd.f32 %v1442_v47, %v1347_v43  ;;  %v10531_v47 = vsub.s32 2, %v8209_v29 }
 0x4e9   : > { %v1454_v20 = vadd.f32 %v6557_v55, %v1347_v43  ;;  %v1445_v22 = vpop.f32.mrb[47].mxu0 }
 0x4ea   : > { %v1446_v21 = vadd.f32 %v1445_v22, %v1347_v43  ;;  %v7237_v43 = vld [vmem:[%s10505_s1 + $0xa0] sm:$0xff]  }
 0x4eb   : > { %v1690_v57 = vpack.c.bf16 %v1454_v20, %v1451_v50  ;;  %v2499_v20 = vrot.slane %v8594_v11, %v10531_v47 }
 0x4ec   : > { %v1689_v62 = vpack.c.bf16 %v1446_v21, %v1443_v25 }
 0x4ed   : > { %6583 = vmatmul.mubr.bf16.vlgmr.msra.gmra.mrb[48].mxu0 %v8167_v10 }
 0x4ee   : > { %6626 = vmatprep.mubr.msk.bf16.mxu1 %vm917_vm0, %v1689_v62  ;;  %6586 = vmatprep.mubr.bf16.mxu0 %v8172_v12 }
 0x4ef   : > { %6627 = vmatmul.mubr.msk.bf16.gmra.mrb[76].mxu1 %vm917_vm0, %v1690_v57 }
 0x4f0   : > { %6730 = vmatprep.mubr.bf16.mxu1 %v8156_v4 }
 0x4f5   : > { %6587 = vmatmul.mubr.bf16.gmra.mrb[52].mxu0 %v8180_v17 }
 0x4f6   : > { %6590 = vmatprep.mubr.bf16.mxu0 %v8182_v18 }
 0x4f7   : > { %6731 = vmatmul.mubr.bf16.vlgmr.msra.gmra.mrb[80].mxu1 %v8167_v10 }
 0x4f8   : > { %6747 = vmatpush3.bf16.xpose.msra.mxu1 %v7235_v32  ;;  %6734 = vmatprep.mubr.bf16.mxu1 %v8172_v12 }
 0x4f9   : > { %6748 = vmatprep.subr.bf16.mxu1 %v7236_v59 }
 0x4fd   : > { %6591 = vmatmul.mubr.bf16.gmra.mrb[56].mxu0 %v8190_v23 }
 0x4fe   : > { %6594 = vmatprep.mubr.bf16.mxu0 %v8192_v24 }
 0x4ff   : > { %6735 = vmatmul.mubr.bf16.gmra.mrb[84].mxu1 %v8180_v17 }
 0x500   : > { %6738 = vmatprep.mubr.bf16.mxu1 %v8182_v18  ;;  %6749 = vmatpush3.bf16.xpose.msra.mxu1 %v7236_v59 }
 0x501   : > { %6766 = vmatprep.subr.bf16.mxu1 %v7237_v43 }
 0x505   : > { %6595 = vmatmul.mubr.bf16.gmra.mrb[60].mxu0 %v8198_v27 }
 0x507   : > { %6739 = vmatmul.mubr.bf16.gmra.mrb[88].mxu1 %v8190_v23 }
 0x508   : > { %6742 = vmatprep.mubr.bf16.mxu1 %v8192_v24 }
 0x50f   : > { %6743 = vmatmul.mubr.bf16.gmra.mrb[92].mxu1 %v8198_v27 }
 0x510   : > { %6750 = vmatprep.mubr.bf16.mxu1 %v8156_v4 }
 0x517   : > { %6751 = vmatmul.mubr.bf16.vlgmr.msra.gmra.mrb[96].mxu1 %v8167_v10 }
 0x518   : > { %6754 = vmatprep.mubr.bf16.mxu1 %v8172_v12  ;;  %6767 = vmatpush3.bf16.xpose.msra.mxu1 %v7237_v43 }
 0x519   : > { %6768 = vmatprep.subr.bf16.mxu1 %v7238_v2 }
 0x51f   : > { %6755 = vmatmul.mubr.bf16.gmra.mrb[100].mxu1 %v8180_v17 }
 0x520   : > { %6758 = vmatprep.mubr.bf16.mxu1 %v8182_v18  ;;  %6769 = vmatpush3.bf16.xpose.msra.mxu1 %v7238_v2 }
 0x527   : > { %6759 = vmatmul.mubr.bf16.gmra.mrb[104].mxu1 %v8190_v23 }
 0x528   : > { %6762 = vmatprep.mubr.bf16.mxu1 %v8192_v24 }
 0x52f   : > { %6763 = vmatmul.mubr.bf16.gmra.mrb[108].mxu1 %v8198_v27 }
 0x530   : > { %6770 = vmatprep.mubr.bf16.mxu1 %v8156_v4 }
 0x537   : > { %6771 = vmatmul.mubr.bf16.vlgmr.msra.gmra.mrb[112].mxu1 %v8167_v10 }
 0x538   : > { %6774 = vmatprep.mubr.bf16.mxu1 %v8172_v12 }
 0x53f   : > { %6775 = vmatmul.mubr.bf16.gmra.mrb[116].mxu1 %v8180_v17 }
 0x540   : > { %6778 = vmatprep.mubr.bf16.mxu1 %v8182_v18 }
 0x547   : > { %6779 = vmatmul.mubr.bf16.gmra.mrb[120].mxu1 %v8190_v23 }
 0x548   : > { %6782 = vmatprep.mubr.bf16.mxu1 %v8192_v24 }
 0x54f   : > { %6783 = vmatmul.mubr.bf16.gmra.mrb[124].mxu1 %v8198_v27 }
 0x5aa   : > { %v8658_v26 = vpop.f32.mrb[64].mxu1 }
 0x5ab   : > { %v8660_v31 = vpop.f32.mrb[65].mxu1 }
 0x5ac   : > { %1844 = vmax.xlane.f32.xlu0 %v8660_v31  ;;  %v8663_v32 = vpop.f32.mrb[66].mxu1 }
 0x5ad   : > { %v8665_v33 = vpop.f32.mrb[67].mxu1 }
 0x5ae   : > { %1846 = vmax.xlane.f32.xlu1 %v8665_v33 }
 0x5b0   : > { %1848 = vmax.xlane.f32.xlu0 %v8658_v26 }
 0x5b2   : > { %1850 = vmax.xlane.f32.xlu1 %v8663_v32  ;;  %v8670_v35 = vpop.f32.mrb[68].mxu1 }
 0x5b3   : > { %v8672_v36 = vpop.f32.mrb[69].mxu1 }
 0x5b4   : > { %1852 = vmax.xlane.f32.xlu0 %v8672_v36  ;;  %v8675_v15 = vpop.f32.mrb[70].mxu1 }
 0x5b5   : > { %v8677_v58 = vpop.f32.mrb[71].mxu1 }
 0x5b6   : > { %1854 = vmax.xlane.f32.xlu1 %v8677_v58 }
 0x5b8   : > { %1856 = vmax.xlane.f32.xlu0 %v8670_v35 }
 0x5ba   : > { %1858 = vmax.xlane.f32.xlu1 %v8675_v15  ;;  %v8682_v5 = vpop.f32.mrb[72].mxu1 }
 0x5bb   : > { %v8684_v6 = vpop.f32.mrb[73].mxu1 }
 0x5bc   : > { %1860 = vmax.xlane.f32.xlu0 %v8684_v6  ;;  %v8687_v14 = vpop.f32.mrb[74].mxu1 }
 0x5bd   : > { %v8689_v54 = vpop.f32.mrb[75].mxu1 }
 0x5be   : > { %1862 = vmax.xlane.f32.xlu1 %v8689_v54 }
 0x5c0   : > { %1864 = vmax.xlane.f32.xlu0 %v8682_v5 }
 0x5c2   : > { %1866 = vmax.xlane.f32.xlu1 %v8687_v14  ;;  %v8694_v16 = vpop.f32.mrb[76].mxu1 }
 0x5c3   : > { %v8696_v19 = vpop.f32.mrb[77].mxu1 }
 0x5c4   : > { %1868 = vmax.xlane.f32.xlu0 %v8696_v19  ;;  %v8700_v55 = vpop.f32.mrb[78].mxu1 }
 0x5c5   : > { %v8702_v50 = vpop.f32.mrb[79].mxu1 }
 0x5c6   : > { %1870 = vmax.xlane.f32.xlu1 %v8702_v50 }
 0x5c8   : > { %1872 = vmax.xlane.f32.xlu0 %v8694_v16 }
 0x5ca   : > { %1874 = vmax.xlane.f32.xlu1 %v8700_v55  ;;  %v6732_v22 = vpop.f32.mrb[80].mxu1 }
 0x5cb   : > { %v8710_v25 = vadd.f32 %v6732_v22, %v2499_v20  ;;  %v2546_v21 = vpop.f32.mrb[81].mxu1 }
 0x5cc   : > { %v6733_v57 = vpop.f32.mrb[82].mxu1  ;;  %v2547_v43 = vadd.f32 %v2546_v21, %v2499_v20 }
 0x5cd   : > { %v8712_v62 = vadd.f32 %v6733_v57, %v2499_v20  ;;  %v2549_v59 = vpop.f32.mrb[83].mxu1 }
 0x5ce   : > { %v2550_v2 = vadd.f32 %v2549_v59, %v2499_v20 }
 0x5d0   : > { %v2835_v1 = vpack.c.bf16 %v2550_v2, %v2547_v43 }
 0x5d2   : > { %v6736_v0 = vpop.f32.mrb[84].mxu1  ;;  %6802 = vmatprep.mubr.msk.bf16.mxu1 %vm917_vm0, %v2835_v1 }
 0x5d3   : > { %v8717_v53 = vadd.f32 %v6736_v0, %v2499_v20  ;;  %v2562_v60 = vpop.f32.mrb[85].mxu1 }
 0x5d4   : > { %v8719_v42 = vadd.f32 %v2562_v60, %v2499_v20  ;;  %v6737_v22 = vpop.f32.mrb[86].mxu1 }
 0x5d5   : > { %v8721_v52 = vadd.f32 %v6737_v22, %v2499_v20  ;;  %v2565_v57 = vpop.f32.mrb[87].mxu1 }
 0x5d6   : > { %v8723_v41 = vadd.f32 %v2565_v57, %v2499_v20 }
 0x5da   : > { %v6740_v43 = vpop.f32.mrb[88].mxu1 }
 0x5db   : > { %v8729_v2 = vadd.f32 %v6740_v43, %v2499_v20  ;;  %v2578_v0 = vpop.f32.mrb[89].mxu1 }
 0x5dc   : > { %v8731_v1 = vadd.f32 %v2578_v0, %v2499_v20  ;;  %v6741_v60 = vpop.f32.mrb[90].mxu1 }
 0x5dd   : > { %v8733_v28 = vadd.f32 %v6741_v60, %v2499_v20  ;;  %v2581_v22 = vpop.f32.mrb[91].mxu1 }
 0x5de   : > { %v8735_v40 = vadd.f32 %v2581_v22, %v2499_v20 }
 0x5e2   : > { %v6744_v63 = vpop.f32.mrb[92].mxu1 }
 0x5e3   : > { %v8741_v59 = vadd.f32 %v6744_v63, %v2499_v20  ;;  %v2594_v43 = vpop.f32.mrb[93].mxu1  ;;  %v2612_v63 = vrot.slane %v8594_v11, %v2611_v8 }
 0x5e4   : > { %v8743_v47 = vadd.f32 %v2594_v43, %v2499_v20  ;;  %v6745_v0 = vpop.f32.mrb[94].mxu1 }
 0x5e5   : > { %v8745_v30 = vadd.f32 %v6745_v0, %v2499_v20  ;;  %v2597_v60 = vpop.f32.mrb[95].mxu1 }
 0x5e6   : > { %v8748_v22 = vadd.f32 %v2597_v60, %v2499_v20 }
 0x5ea   : > { %v6752_v51 = vpop.f32.mrb[96].mxu1 }
 0x5eb   : > { %v2659_v48 = vpop.f32.mrb[97].mxu1  ;;  %v2668_v45 = vadd.f32 %v6752_v51, %v2612_v63 }
 0x5ec   : > { %v6753_v43 = vpop.f32.mrb[98].mxu1  ;;  %v2660_v46 = vadd.f32 %v2659_v48, %v2612_v63 }
 0x5ed   : > { %v2671_v56 = vadd.f32 %v6753_v43, %v2612_v63  ;;  %v2662_v0 = vpop.f32.mrb[99].mxu1 }
 0x5ee   : > { %v2663_v9 = vadd.f32 %v2662_v0, %v2612_v63 }
 0x5ef   : > { %v2844_v34 = vpack.c.bf16 %v2671_v56, %v2668_v45 }
 0x5f0   : > { %v2843_v61 = vpack.c.bf16 %v2663_v9, %v2660_v46 }
 0x5f1   : > { %v2879_v56 = vsel %vm917_vm0, %v2844_v34, 0 }
 0x5f2   : > { %7118 = vmatprep.subr.msk.bf16.mxu1 %vm917_vm0, %v2843_v61  ;;  %v2876_v20 = vsel %vm917_vm0, %v2843_v61, 0  ;;  %v6756_v60 = vpop.f32.mrb[100].mxu1 }
 0x5f3   : > { %6787 = vmatpush3.bf16.xpose.msra.mxu1 %v2876_v20  ;;  %v2684_v57 = vadd.f32 %v6756_v60, %v2612_v63  ;;  %v2675_v21 = vpop.f32.mrb[101].mxu1 }
 0x5f4   : > { %7119 = vmatprep.subr.msk.bf16.mxu1 %vm917_vm0, %v2844_v34  ;;  %v2676_v8 = vadd.f32 %v2675_v21, %v2612_v63  ;;  %v6757_v11 = vpop.f32.mrb[102].mxu1 }
 0x5f5   : > { %v2687_v44 = vadd.f32 %v6757_v11, %v2612_v63  ;;  %v2678_v51 = vpop.f32.mrb[103].mxu1 }
 0x5f6   : > { %v2679_v43 = vadd.f32 %v2678_v51, %v2612_v63 }
 0x5f7   : > { %v2846_v37 = vpack.c.bf16 %v2687_v44, %v2684_v57 }
 0x5f8   : > { %v2845_v48 = vpack.c.bf16 %v2679_v43, %v2676_v8 }
 0x5fa   : > { %v6760_v9 = vpop.f32.mrb[104].mxu1  ;;  %v2882_v11 = vsel %vm917_vm0, %v2845_v48, 0 }
 0x5fb   : > { %6789 = vmatpush3.bf16.xpose.msra.mxu1 %v2879_v56  ;;  %v2700_v46 = vadd.f32 %v6760_v9, %v2612_v63  ;;  %v2691_v45 = vpop.f32.mrb[105].mxu1 }
 0x5fc   : > { %7120 = vmatprep.subr.msk.bf16.mxu1 %vm917_vm0, %v2845_v48  ;;  %v2692_v61 = vadd.f32 %v2691_v45, %v2612_v63  ;;  %v6761_v0 = vpop.f32.mrb[106].mxu1 }
 0x5fd   : > { %v2703_v20 = vadd.f32 %v6761_v0, %v2612_v63  ;;  %v2694_v60 = vpop.f32.mrb[107].mxu1  ;;  %v2885_v0 = vsel %vm917_vm0, %v2846_v37, 0 }
 0x5fe   : > { %v2695_v13 = vadd.f32 %v2694_v60, %v2612_v63  ;;  %v7704_v60 = vld [vmem:[#allocation5 + $0x8] sm:$0xf] }
 0x5ff   : > { %v2848_v21 = vpack.c.bf16 %v2703_v20, %v2700_v46 }
 0x600   : > { %v2847_v38 = vpack.c.bf16 %v2695_v13, %v2692_v61  ;;  %v10611_v13 = vsub.s32 2, %v8209_v29 }
 0x602   : > { %v6764_v51 = vpop.f32.mrb[108].mxu1  ;;  %v8765_v46 = vrot.slane %v7704_v60, %v10611_v13 }
 0x603   : > { %6791 = vmatpush3.bf16.xpose.msra.mxu1 %v2882_v11  ;;  %v2716_v44 = vadd.f32 %v6764_v51, %v2612_v63  ;;  %v2707_v57 = vpop.f32.mrb[109].mxu1 }
 0x604   : > { %7121 = vmatprep.subr.msk.bf16.mxu1 %vm917_vm0, %v2846_v37  ;;  %v2708_v34 = vadd.f32 %v2707_v57, %v2612_v63  ;;  %v6765_v8 = vpop.f32.mrb[110].mxu1 }
 0x605   : > { %v2719_v43 = vadd.f32 %v6765_v8, %v2612_v63  ;;  %v2710_v56 = vpop.f32.mrb[111].mxu1 }
 0x606   : > { %v2711_v9 = vadd.f32 %v2710_v56, %v2612_v63 }
 0x607   : > { %v2850_v45 = vpack.c.bf16 %v2719_v43, %v2716_v44  ;;  %v2891_v43 = vsel %vm917_vm0, %v2848_v21, 0 }
 0x608   : > { %v2849_v3 = vpack.c.bf16 %v2711_v9, %v2708_v34  ;;  %v2888_v34 = vsel %vm917_vm0, %v2847_v38, 0  ;;  %v7241_v9 = vld [vmem:[%s10505_s1 + $0x30] sm:$0xff]  }
 0x60a   : > { %v6772_v48 = vpop.f32.mrb[112].mxu1  ;;  %v2894_v56 = vsel %vm917_vm0, %v2849_v3, 0 }
 0x60b   : > { %6793 = vmatpush3.bf16.xpose.msra.mxu1 %v2885_v0  ;;  %v2781_v61 = vadd.f32 %v6772_v48, %v8765_v46  ;;  %v2772_v20 = vpop.f32.mrb[113].mxu1  ;;  %v10612_v0 = vpack.c.bf16 %v8712_v62, %v8710_v25  ;;  %v10614_v25 = vpack.c.bf16 %v8721_v52, %v8717_v53 }
 0x60c   : > { %7122 = vmatprep.subr.msk.bf16.mxu1 %vm917_vm0, %v2847_v38  ;;  %v2773_v11 = vadd.f32 %v2772_v20, %v8765_v46  ;;  %v6773_v51 = vpop.f32.mrb[114].mxu1  ;;  %v2897_v38 = vsel %vm917_vm0, %v2850_v45, 0 }
 0x60d   : > { %v2784_v63 = vadd.f32 %v6773_v51, %v8765_v46  ;;  %v2775_v44 = vpop.f32.mrb[115].mxu1 }
 0x60e   : > { %v2776_v37 = vadd.f32 %v2775_v44, %v8765_v46  ;;  %v8821_v44 = vrot.slane %v7704_v60, %v8590_v49 }
 0x60f   : > { %v8772_v57 = vpack.c.bf16 %v2784_v63, %v2781_v61 }
 0x610   : > { %v8775_v8 = vpack.c.bf16 %v2776_v37, %v2773_v11 }
 0x613   : > { %6795 = vmatpush3.bf16.xpose.msra.mxu1 %v2888_v34 }
 0x614   : > { %7123 = vmatprep.subr.msk.bf16.mxu1 %vm917_vm0, %v2848_v21  ;;  %v7242_v21 = vld [vmem:[%s10505_s1 + $0x38] sm:$0xff]  }
 0x61b   : > { %6797 = vmatpush3.bf16.xpose.msra.mxu1 %v2891_v43  ;;  %v6584_v43 = vpop.f32.mrb[48].mxu0 }
 0x61c   : > { %7124 = vmatprep.subr.msk.bf16.mxu1 %vm917_vm0, %v2849_v3  ;;  %v10613_v3 = vpack.c.bf16 %v8723_v41, %v8719_v42  ;;  %v10615_v41 = vpack.c.bf16 %v8735_v40, %v8731_v1 }
 0x623   : > { %6799 = vmatpush3.bf16.xpose.msra.mxu1 %v2894_v56  ;;  %v1629_v56 = vadd.f32 %v6584_v43, %v8821_v44 }
 0x624   : > { %7125 = vmatprep.subr.msk.bf16.mxu1 %vm917_vm0, %v2850_v45  ;;  %v8800_v45 = vld [vmem:[%s10505_s1 + $0x70] sm:$0xff]  }
 0x62b   : > { %6801 = vmatpush3.bf16.xpose.msra.mxu1 %v2897_v38 }
 0x62c   : > { %6882 = vmatprep.subr.bf16.mxu1 %v7241_v9 }
 0x632   : > { %6803 = vmatmul.mubr.msk.bf16.vlgmr.msra.gmra.mrb[128].mxu1 %vm917_vm0, %v10612_v0 }
 0x633   : > { %6806 = vmatprep.mubr.msk.bf16.mxu1 %vm917_vm0, %v10613_v3  ;;  %6883 = vmatpush3.bf16.xpose.msra.mxu1 %v7241_v9 }
 0x634   : > { %6884 = vmatprep.subr.bf16.mxu1 %v7242_v21 }
 0x639   : > { %v1845_v13 = vpop.xlane.xlu0 %1844 }
 0x63a   : > { %v1876_v48 = vsub.f32 %v8660_v31, %v1845_v13  ;;  %6807 = vmatmul.mubr.msk.bf16.gmra.mrb[132].mxu1 %vm917_vm0, %v10614_v25 }
 0x63b   : > { %v1847_v62 = vpop.xlane.xlu1 %1846  ;;  %6810 = vmatprep.mubr.msk.bf16.mxu1 %vm917_vm0, %v10615_v41  ;;  %6885 = vmatpush3.bf16.xpose.msra.mxu1 %v7242_v21 }
 0x63c   : > { %v1892_v42 = vmul.f32 1.442695, %v1876_v48  ;;  %v1877_v61 = vsub.f32 %v8665_v33, %v1847_v62  ;;  %6902 = vmatprep.subr.bf16.mxu1 %v8800_v45  ;;  %v10616_v33 = vpack.c.bf16 %v8733_v28, %v8729_v2  ;;  %v1620_v28 = vpop.f32.mrb[49].mxu0 }
 0x63d   : > { %v1849_v20 = vpop.xlane.xlu0 %1848  ;;  %v1621_v9 = vadd.f32 %v1620_v28, %v8821_v44  ;;  %v6585_v38 = vpop.f32.mrb[50].mxu0 }
 0x63e   : > { %7383 = vpow2.f32 %v1892_v42  ;;  %v1894_v31 = vmul.f32 1.442695, %v1877_v61  ;;  %v1878_v11 = vsub.f32 %v8658_v26, %v1849_v20  ;;  %v10617_v26 = vpack.c.bf16 %v8748_v22, %v8743_v47  ;;  %v1623_v22 = vpop.f32.mrb[51].mxu0 }
 0x63f   : > { %v1851_v52 = vpop.xlane.xlu1 %1850  ;;  %v1632_v47 = vadd.f32 %v6585_v38, %v8821_v44  ;;  %v1624_v13 = vadd.f32 %v1623_v22, %v8821_v44  ;;  %v10618_v42 = vpack.c.bf16 %v8745_v30, %v8741_v59 }
 0x640   : > { %7385 = vpow2.f32 %v1894_v31  ;;  %v1896_v53 = vmul.f32 1.442695, %v1878_v11  ;;  %v1879_v51 = vsub.f32 %v8663_v32, %v1851_v52  ;;  %v6588_v52 = vpop.f32.mrb[52].mxu0 }
 0x641   : > { %v1853_v63 = vpop.xlane.xlu0 %1852  ;;  %v1997_v25 = vpack.c.bf16 %v1632_v47, %v1629_v56  ;;  %v1996_v61 = vpack.c.bf16 %v1624_v13, %v1621_v9  ;;  %v1645_v30 = vadd.f32 %v6588_v52, %v8821_v44  ;;  %v1636_v59 = vpop.f32.mrb[53].mxu0 }
 0x642   : > { %7387 = vpow2.f32 %v1896_v53  ;;  %v1898_v40 = vmul.f32 1.442695, %v1879_v51  ;;  %v1880_v1 = vsub.f32 %v8672_v36, %v1853_v63  ;;  %6811 = vmatmul.mubr.msk.bf16.gmra.mrb[136].mxu1 %vm917_vm0, %v10616_v33 }
 0x643   : > { %v1855_v37 = vpop.xlane.xlu1 %1854  ;;  %6814 = vmatprep.mubr.msk.bf16.mxu1 %vm917_vm0, %v10617_v26  ;;  %6630 = vmatprep.subr.bf16.mxu0 %v1996_v61 }
 0x644   : > { %7389 = vpow2.f32 %v1898_v40  ;;  %v1900_v32 = vmul.f32 1.442695, %v1880_v1  ;;  %v1881_v34 = vsub.f32 %v8677_v58, %v1855_v37  ;;  %6631 = vmatpush3.bf16.msra.mxu0 %v1996_v61  ;;  %v1637_v40 = vadd.f32 %v1636_v59, %v8821_v44  ;;  %v6589_v1 = vpop.f32.mrb[54].mxu0 }
 0x645   : > { %v1857_v36 = vpop.xlane.xlu0 %1856  ;;  %6632 = vmatprep.subr.bf16.mxu0 %v1997_v25  ;;  %v1648_v33 = vadd.f32 %v6589_v1, %v8821_v44  ;;  %v1639_v37 = vpop.f32.mrb[55].mxu0 }
 0x646   : > { %7391 = vpow2.f32 %v1900_v32  ;;  %v1902_v2 = vmul.f32 1.442695, %v1881_v34  ;;  %v1882_v60 = vsub.f32 %v8670_v35, %v1857_v36  ;;  %v1640_v43 = vadd.f32 %v1639_v37, %v8821_v44  ;;  %v7244_v36 = vld [vmem:[%s10505_s1 + $0x78] sm:$0xff]   ;;  %v6592_v22 = vpop.f32.mrb[56].mxu0 }
 0x647   : > { %v1859_v21 = vpop.xlane.xlu1 %1858  ;;  %v1999_v56 = vpack.c.bf16 %v1648_v33, %v1645_v30 }
 0x648   : > { %v8832_v0 = vpop.eup %7383  ;;  %7393 = vpow2.f32 %v1902_v2  ;;  %v1904_v58 = vmul.f32 1.442695, %v1882_v60  ;;  %v1883_v3 = vsub.f32 %v8675_v15, %v1859_v21  ;;  %6633 = vmatpush3.bf16.msra.mxu0 %v1997_v25 }
 0x649   : > { %v1861_v48 = vpop.xlane.xlu0 %1860  ;;  %1924 = vadd.xlane.f32.xlu0 %v8832_v0 }
 0x64a   : > { %v8837_v35 = vpop.eup %7385  ;;  %7395 = vpow2.f32 %v1904_v58  ;;  %v1906_v62 = vmul.f32 1.442695, %v1883_v3  ;;  %v1884_v41 = vsub.f32 %v8684_v6, %v1861_v48  ;;  %6815 = vmatmul.mubr.msk.bf16.gmra.mrb[140].mxu1 %vm917_vm0, %v10618_v42  ;;  %v1661_v58 = vadd.f32 %v6592_v22, %v8821_v44  ;;  %v1652_v3 = vpop.f32.mrb[57].mxu0 }
 0x64b   : > { %v1863_v20 = vpop.xlane.xlu1 %1862  ;;  %1926 = vadd.xlane.f32.xlu1 %v8837_v35  ;;  %6886 = vmatprep.mubr.bf16.mxu1 %v8156_v4 }
 0x64c   : > { %v8846_v15 = vpop.eup %7387  ;;  %7397 = vpow2.f32 %v1906_v62  ;;  %v1908_v31 = vmul.f32 1.442695, %v1884_v41  ;;  %v1885_v11 = vsub.f32 %v8689_v54, %v1863_v20  ;;  %v1653_v62 = vadd.f32 %v1652_v3, %v8821_v44 }
 0x64d   : > { %v1865_v6 = vpop.xlane.xlu0 %1864  ;;  %1928 = vadd.xlane.f32.xlu0 %v8846_v15 }
 0x64e   : > { %v8851_v53 = vpop.eup %7389  ;;  %7399 = vpow2.f32 %v1908_v31  ;;  %v1910_v51 = vmul.f32 1.442695, %v1885_v11  ;;  %v1886_v63 = vsub.f32 %v8682_v5, %v1865_v6 }
 0x64f   : > { %v1867_v54 = vpop.xlane.xlu1 %1866  ;;  %1930 = vadd.xlane.f32.xlu1 %v8851_v53 }
 0x650   : > { %v8857_v26 = vpop.eup %7391  ;;  %7401 = vpow2.f32 %v1910_v51  ;;  %v1912_v32 = vmul.f32 1.442695, %v1886_v63  ;;  %v1887_v34 = vsub.f32 %v8687_v14, %v1867_v54  ;;  %v1998_v14 = vpack.c.bf16 %v1640_v43, %v1637_v40 }
 0x651   : > { %1932 = vadd.xlane.f32.xlu0 %v8857_v26  ;;  %v1869_v5 = vpop.xlane.xlu0 %1868 }
 0x652   : > { %v8865_v28 = vpop.eup %7393  ;;  %7403 = vpow2.f32 %v1912_v32  ;;  %v1914_v2 = vmul.f32 1.442695, %v1887_v34  ;;  %v1888_v60 = vsub.f32 %v8696_v19, %v1869_v5  ;;  %6887 = vmatmul.mubr.bf16.vlgmr.msra.gmra.mrb[144].mxu1 %v8167_v10  ;;  %6634 = vmatprep.subr.bf16.mxu0 %v1998_v14 }
 0x653   : > { %1934 = vadd.xlane.f32.xlu1 %v8865_v28  ;;  %v1871_v9 = vpop.xlane.xlu1 %1870  ;;  %6890 = vmatprep.mubr.bf16.mxu1 %v8172_v12 }
 0x654   : > { %v8871_v38 = vpop.eup %7395  ;;  %7405 = vpow2.f32 %v1914_v2  ;;  %v1916_v21 = vmul.f32 1.442695, %v1888_v60  ;;  %v1889_v47 = vsub.f32 %v8702_v50, %v1871_v9  ;;  %6903 = vmatpush3.bf16.xpose.msra.mxu1 %v8800_v45  ;;  %6635 = vmatpush3.bf16.msra.mxu0 %v1998_v14  ;;  %v6593_v50 = vpop.f32.mrb[58].mxu0 }
 0x655   : > { %1936 = vadd.xlane.f32.xlu0 %v8871_v38  ;;  %v1873_v19 = vpop.xlane.xlu0 %1872  ;;  %6904 = vmatprep.subr.bf16.mxu1 %v7244_v36  ;;  %v1664_v41 = vadd.f32 %v6593_v50, %v8821_v44  ;;  %v1655_v42 = vpop.f32.mrb[59].mxu0 }
 0x656   : > { %v8877_v13 = vpop.eup %7397  ;;  %7407 = vpow2.f32 %v1916_v21  ;;  %v1918_v48 = vmul.f32 1.442695, %v1889_v47  ;;  %v1890_v25 = vsub.f32 %v8694_v16, %v1873_v19  ;;  %6636 = vmatprep.subr.bf16.mxu0 %v1999_v56  ;;  %v1656_v11 = vadd.f32 %v1655_v42, %v8821_v44  ;;  %v6776_v60 = vpop.f32.mrb[116].mxu1 }
 0x657   : > { %1938 = vadd.xlane.f32.xlu1 %v8877_v13  ;;  %v1875_v45 = vpop.xlane.xlu1 %1874  ;;  %v2001_v16 = vpack.c.bf16 %v1664_v41, %v1661_v58  ;;  %v2797_v14 = vadd.f32 %v6776_v60, %v8765_v46  ;;  %v2788_v9 = vpop.f32.mrb[117].mxu1 }
 0x658   : > { %v8883_v61 = vpop.eup %7399  ;;  %7409 = vpow2.f32 %v1918_v48  ;;  %v1920_v20 = vmul.f32 1.442695, %v1890_v25  ;;  %v1891_v31 = vsub.f32 %v8700_v55, %v1875_v45  ;;  %v2000_v30 = vpack.c.bf16 %v1656_v11, %v1653_v62  ;;  %6637 = vmatpush3.bf16.msra.mxu0 %v1999_v56  ;;  %v6596_v55 = vpop.f32.mrb[60].mxu0 }
 0x659   : > { %1940 = vadd.xlane.f32.xlu0 %v8883_v61  ;;  %v1668_v51 = vpop.f32.mrb[61].mxu0  ;;  %v1677_v5 = vadd.f32 %v6596_v55, %v8821_v44  ;;  %v6777_v21 = vpop.f32.mrb[118].mxu1 }
 0x65a   : > { %v8888_v52 = vpop.eup %7401  ;;  %7411 = vpow2.f32 %v1920_v20  ;;  %v1922_v6 = vmul.f32 1.442695, %v1891_v31  ;;  %6891 = vmatmul.mubr.bf16.gmra.mrb[148].mxu1 %v8180_v17  ;;  %6638 = vmatprep.subr.bf16.mxu0 %v2000_v30  ;;  %v6597_v40 = vpop.f32.mrb[62].mxu0  ;;  %v1669_v33 = vadd.f32 %v1668_v51, %v8821_v44  ;;  %v2800_v47 = vadd.f32 %v6777_v21, %v8765_v46 }
 0x65b   : > { %1942 = vadd.xlane.f32.xlu1 %v8888_v52  ;;  %6894 = vmatprep.mubr.bf16.mxu1 %v8182_v18  ;;  %v1671_v1 = vpop.f32.mrb[63].mxu0  ;;  %v2791_v22 = vpop.f32.mrb[119].mxu1 }
 0x65c   : > { %v8893_v59 = vpop.eup %7403  ;;  %7413 = vpow2.f32 %v1922_v6  ;;  %6905 = vmatpush3.bf16.xpose.msra.mxu1 %v7244_v36  ;;  %6639 = vmatpush3.bf16.msra.mxu0 %v2000_v30  ;;  %v1672_v37 = vadd.f32 %v1671_v1, %v8821_v44  ;;  %v1680_v36 = vadd.f32 %v6597_v40, %v8821_v44  ;;  %v2789_v44 = vadd.f32 %v2788_v9, %v8765_v46  ;;  %v6780_v48 = vpop.f32.mrb[120].mxu1 }
 0x65d   : > { %1944 = vadd.xlane.f32.xlu0 %v8893_v59  ;;  %6640 = vmatprep.subr.bf16.mxu0 %v2001_v16  ;;  %v2792_v19 = vadd.f32 %v2791_v22, %v8765_v46  ;;  %v8923_v58 = vpack.c.bf16 %v2800_v47, %v2797_v14  ;;  %v2813_v25 = vadd.f32 %v6780_v48, %v8765_v46  ;;  %v2804_v62 = vpop.f32.mrb[121].mxu1 }
 0x65e   : > { %v8896_v63 = vpop.eup %7405  ;;  %v2002_v34 = vpack.c.bf16 %v1672_v37, %v1669_v33  ;;  %v2003_v2 = vpack.c.bf16 %v1680_v36, %v1677_v5  ;;  %v2805_v50 = vadd.f32 %v2804_v62, %v8765_v46  ;;  %v6781_v45 = vpop.f32.mrb[122].mxu1 }
 0x65f   : > { %1946 = vadd.xlane.f32.xlu1 %v8896_v63  ;;  %v8925_v3 = vpack.c.bf16 %v2792_v19, %v2789_v44  ;;  %v2816_v41 = vadd.f32 %v6781_v45, %v8765_v46  ;;  %v2807_v42 = vpop.f32.mrb[123].mxu1 }
 0x660   : > { %v8899_v54 = vpop.eup %7407  ;;  %6641 = vmatpush3.bf16.msra.mxu0 %v2001_v16  ;;  %v2808_v20 = vadd.f32 %v2807_v42, %v8765_v46  ;;  %v6784_v16 = vpop.f32.mrb[124].mxu1 }
 0x661   : > { %1948 = vadd.xlane.f32.xlu0 %v8899_v54  ;;  %6642 = vmatprep.subr.bf16.mxu0 %v2002_v34  ;;  %v8933_v31 = vpack.c.bf16 %v2816_v41, %v2813_v25  ;;  %v2820_v6 = vpop.f32.mrb[125].mxu1  ;;  %v2829_v30 = vadd.f32 %v6784_v16, %v8765_v46 }
 0x662   : > { %v8904_v32 = vpop.eup %7409  ;;  %6895 = vmatmul.mubr.bf16.gmra.mrb[152].mxu1 %v8190_v23  ;;  %v8935_v11 = vpack.c.bf16 %v2808_v20, %v2805_v50  ;;  %v2821_v55 = vadd.f32 %v2820_v6, %v8765_v46  ;;  %v6785_v51 = vpop.f32.mrb[126].mxu1 }
 0x663   : > { %1950 = vadd.xlane.f32.xlu1 %v8904_v32  ;;  %6898 = vmatprep.mubr.bf16.mxu1 %v8192_v24  ;;  %v2832_v40 = vadd.f32 %v6785_v51, %v8765_v46  ;;  %v2823_v1 = vpop.f32.mrb[127].mxu1 }
 0x664   : > { %v8909_v43 = vpop.eup %7411  ;;  %6643 = vmatpush3.bf16.msra.mxu0 %v2002_v34  ;;  %v2824_v33 = vadd.f32 %v2823_v1, %v8765_v46 }
 0x665   : > { %1952 = vadd.xlane.f32.xlu0 %v8909_v43  ;;  %6644 = vmatprep.subr.bf16.mxu0 %v2003_v2  ;;  %v8943_v37 = vpack.c.bf16 %v2832_v40, %v2829_v30 }
 0x666   : > { %v8914_v56 = vpop.eup %7413  ;;  %v8945_v34 = vpack.c.bf16 %v2824_v33, %v2821_v55 }
 0x667   : > { %1954 = vadd.xlane.f32.xlu1 %v8914_v56 }
 0x668   : > { %6645 = vmatpush3.bf16.msra.mxu0 %v2003_v2 }
 0x66a   : > { %6899 = vmatmul.mubr.bf16.gmra.mrb[156].mxu1 %v8198_v27 }
 0x66b   : > { %6906 = vmatprep.mubr.bf16.mxu1 %v8156_v4 }
 0x672   : > { %6907 = vmatmul.mubr.bf16.vlgmr.msra.gmra.mrb[160].mxu1 %v8167_v10 }
 0x673   : > { %6910 = vmatprep.mubr.bf16.mxu1 %v8172_v12 }
 0x67a   : > { %6911 = vmatmul.mubr.bf16.gmra.mrb[164].mxu1 %v8180_v17 }
 0x67b   : > { %6914 = vmatprep.mubr.bf16.mxu1 %v8182_v18 }
 0x682   : > { %6915 = vmatmul.mubr.bf16.gmra.mrb[168].mxu1 %v8190_v23 }
 0x683   : > { %6918 = vmatprep.mubr.bf16.mxu1 %v8192_v24 }
 0x68a   : > { %6919 = vmatmul.mubr.bf16.gmra.mrb[172].mxu1 %v8198_v27 }
 0x6d6   : > { %v1925_v5 = vpop.xlane.xlu0 %1924 }
 0x6d7   : > { %7415 = vrcp.f32 %v1925_v5 }
 0x6d8   : > { %v1927_v36 = vpop.xlane.xlu1 %1926 }
 0x6d9   : > { %7417 = vrcp.f32 %v1927_v36 }
 0x6da   : > { %v1929_v2 = vpop.xlane.xlu0 %1928 }
 0x6db   : > { %7419 = vrcp.f32 %v1929_v2 }
 0x6dc   : > { %v1931_v60 = vpop.xlane.xlu1 %1930 }
 0x6dd   : > { %7421 = vrcp.f32 %v1931_v60 }
 0x6de   : > { %v1933_v14 = vpop.xlane.xlu0 %1932 }
 0x6df   : > { %7423 = vrcp.f32 %v1933_v14 }
 0x6e0   : > { %v1935_v46 = vpop.xlane.xlu1 %1934 }
 0x6e1   : > { %v7416_v9 = vpop.eup %7415  ;;  %7425 = vrcp.f32 %v1935_v46 }
 0x6e2   : > { %v1937_v44 = vpop.xlane.xlu0 %1936  ;;  %v1972_v22 = vmul.f32 %v7416_v9, %v8832_v0 }
 0x6e3   : > { %v7418_v21 = vpop.eup %7417  ;;  %7427 = vrcp.f32 %v1937_v44 }
 0x6e4   : > { %v1939_v47 = vpop.xlane.xlu1 %1938  ;;  %v1973_v19 = vmul.f32 %v7418_v21, %v8837_v35 }
 0x6e5   : > { %v7420_v48 = vpop.eup %7419  ;;  %7429 = vrcp.f32 %v1939_v47 }
 0x6e6   : > { %v1941_v25 = vpop.xlane.xlu0 %1940  ;;  %v1988_v62 = vpack.c.bf16 %v1973_v19, %v1972_v22  ;;  %v1974_v45 = vmul.f32 %v7420_v48, %v8846_v15 }
 0x6e7   : > { %v7422_v50 = vpop.eup %7421  ;;  %7431 = vrcp.f32 %v1941_v25 }
 0x6e8   : > { %v1975_v41 = vmul.f32 %v7422_v50, %v8851_v53  ;;  %6646 = vmatprep.mubr.bf16.mxu0 %v1988_v62  ;;  %v1943_v42 = vpop.xlane.xlu1 %1942 }
 0x6e9   : > { %v7424_v20 = vpop.eup %7423  ;;  %7433 = vrcp.f32 %v1943_v42  ;;  %v7246_v42 = vld [vmem:[%s10507_s3 + $0x48] sm:$0xff]  }
 0x6ea   : > { %v1945_v16 = vpop.xlane.xlu0 %1944  ;;  %v1989_v6 = vpack.c.bf16 %v1975_v41, %v1974_v45  ;;  %v1976_v35 = vmul.f32 %v7424_v20, %v8857_v26 }
 0x6eb   : > { %v7426_v30 = vpop.eup %7425  ;;  %7435 = vrcp.f32 %v1945_v16  ;;  %v2194_v16 = vsel %vm917_vm0, %v7246_v42, 0 }
 0x6ec   : > { %6647 = vmatmul.mubr.bf16.vlgmr.msra.gmra.mrb[64].mxu0 %v1989_v6  ;;  %v1947_v0 = vpop.xlane.xlu1 %1946  ;;  %v1977_v55 = vmul.f32 %v7426_v30, %v8865_v28 }
 0x6ed   : > { %v7428_v51 = vpop.eup %7427  ;;  %7437 = vrcp.f32 %v1947_v0 }
 0x6ee   : > { %v1949_v40 = vpop.xlane.xlu0 %1948  ;;  %v1990_v15 = vpack.c.bf16 %v1977_v55, %v1976_v35  ;;  %v1978_v33 = vmul.f32 %v7428_v51, %v8871_v38  ;;  %v7247_v35 = vld [vmem:[%s10507_s3 + $0x50] sm:$0xff]  }
 0x6ef   : > { %v7430_v1 = vpop.eup %7429  ;;  %7439 = vrcp.f32 %v1949_v40  ;;  %v2197_v51 = vsel %vm917_vm0, %v7247_v35, 0 }
 0x6f0   : > { %6650 = vmatprep.mubr.bf16.mxu0 %v1990_v15  ;;  %v1951_v53 = vpop.xlane.xlu1 %1950  ;;  %v1979_v5 = vmul.f32 %v7430_v1, %v8877_v13 }
 0x6f1   : > { %v7432_v36 = vpop.eup %7431  ;;  %7441 = vrcp.f32 %v1951_v53  ;;  %v7248_v53 = vld [vmem:[%s10507_s3 + $0x58] sm:$0xff]  }
 0x6f2   : > { %v1953_v2 = vpop.xlane.xlu0 %1952  ;;  %v1991_v60 = vpack.c.bf16 %v1979_v5, %v1978_v33  ;;  %v1980_v28 = vmul.f32 %v7432_v36, %v8883_v61  ;;  %v2200_v5 = vsel %vm917_vm0, %v7248_v53, 0 }
 0x6f3   : > { %v7434_v14 = vpop.eup %7433  ;;  %7443 = vrcp.f32 %v1953_v2  ;;  %v10547_v2 = vsub.s32 3, %v8209_v29 }
 0x6f4   : > { %6651 = vmatmul.mubr.bf16.gmra.mrb[68].mxu0 %v1991_v60  ;;  %v1955_v26 = vpop.xlane.xlu1 %1954  ;;  %v1981_v46 = vmul.f32 %v7434_v14, %v8888_v52  ;;  %v7245_v52 = vld [vmem:[%s10507_s3 + $0x40] sm:$0xff]  }
 0x6f5   : > { %v7436_v9 = vpop.eup %7435  ;;  %7445 = vrcp.f32 %v1955_v26  ;;  %7102 = vmatprep.subr.msk.bf16.mxu0 %vm917_vm0, %v7245_v52  ;;  %v2191_v45 = vsel %vm917_vm0, %v7245_v52, 0  ;;  %v7705_v26 = vld [vmem:[#allocation5] sm:$0xff] }
 0x6f6   : > { %v1992_v44 = vpack.c.bf16 %v1981_v46, %v1980_v28  ;;  %v1982_v38 = vmul.f32 %v7436_v9, %v8893_v59  ;;  %6663 = vmatpush3.bf16.xpose.msra.mxu0 %v2191_v45  ;;  %v3482_v28 = vrot.slane %v7705_v26, %v10547_v2  ;;  %v7249_v46 = vld [vmem:[%s10507_s3 + $0x60] sm:$0xff]  }
 0x6f7   : > { %v7438_v21 = vpop.eup %7437  ;;  %7103 = vmatprep.subr.msk.bf16.mxu0 %vm917_vm0, %v7246_v42 }
 0x6f8   : > { %6654 = vmatprep.mubr.bf16.mxu0 %v1992_v44  ;;  %v1983_v13 = vmul.f32 %v7438_v21, %v8896_v63  ;;  %v2203_v44 = vsel %vm917_vm0, %v7249_v46, 0 }
 0x6f9   : > { %v7440_v47 = vpop.eup %7439 }
 0x6fa   : > { %v1993_v22 = vpack.c.bf16 %v1983_v13, %v1982_v38  ;;  %v1984_v48 = vmul.f32 %v7440_v47, %v8899_v54 }
 0x6fb   : > { %v7442_v19 = vpop.eup %7441 }
 0x6fc   : > { %6655 = vmatmul.mubr.bf16.gmra.mrb[72].mxu0 %v1993_v22  ;;  %v1985_v25 = vmul.f32 %v7442_v19, %v8904_v32 }
 0x6fd   : > { %v7444_v61 = vpop.eup %7443 }
 0x6fe   : > { %v1994_v62 = vpack.c.bf16 %v1985_v25, %v1984_v48  ;;  %v1986_v59 = vmul.f32 %v7444_v61, %v8909_v43  ;;  %6665 = vmatpush3.bf16.xpose.msra.mxu0 %v2194_v16 }
 0x6ff   : > { %v7446_v50 = vpop.eup %7445  ;;  %7104 = vmatprep.subr.msk.bf16.mxu0 %vm917_vm0, %v7247_v35 }
 0x700   : > { %6658 = vmatprep.mubr.bf16.mxu0 %v1994_v62  ;;  %v1987_v63 = vmul.f32 %v7446_v50, %v8914_v56  ;;  %v7250_v62 = vld [vmem:[%s10507_s3 + $0x68] sm:$0xff]  }
 0x701   : > { %v2206_v50 = vsel %vm917_vm0, %v7250_v62, 0 }
 0x702   : > { %v1995_v54 = vpack.c.bf16 %v1987_v63, %v1986_v59 }
 0x704   : > { %6659 = vmatmul.mubr.bf16.gmra.mrb[76].mxu0 %v1995_v54 }
 0x705   : > { %v8971_v32 = vpop.f32.mrb[128].mxu1 }
 0x706   : > { %v8973_v41 = vpop.f32.mrb[129].mxu1  ;;  %6667 = vmatpush3.bf16.xpose.msra.mxu0 %v2197_v51 }
 0x707   : > { %2996 = vmax.xlane.f32.xlu0 %v8973_v41  ;;  %v8979_v43 = vpop.f32.mrb[130].mxu1  ;;  %7105 = vmatprep.subr.msk.bf16.mxu0 %vm917_vm0, %v7248_v53 }
 0x708   : > { %v8981_v56 = vpop.f32.mrb[131].mxu1 }
 0x709   : > { %2998 = vmax.xlane.f32.xlu1 %v8981_v56 }
 0x70b   : > { %3000 = vmax.xlane.f32.xlu0 %v8971_v32 }
 0x70d   : > { %3002 = vmax.xlane.f32.xlu1 %v8979_v43  ;;  %v8987_v20 = vpop.f32.mrb[132].mxu1 }
 0x70e   : > { %v8990_v6 = vpop.f32.mrb[133].mxu1  ;;  %6669 = vmatpush3.bf16.xpose.msra.mxu0 %v2200_v5  ;;  %v7251_v5 = vld [vmem:[%s10507_s3 + $0x70] sm:$0xff]  }
 0x70f   : > { %3004 = vmax.xlane.f32.xlu0 %v8990_v6  ;;  %v8993_v30 = vpop.f32.mrb[134].mxu1  ;;  %7106 = vmatprep.subr.msk.bf16.mxu0 %vm917_vm0, %v7249_v46 }
 0x710   : > { %v8995_v0 = vpop.f32.mrb[135].mxu1 }
 0x711   : > { %3006 = vmax.xlane.f32.xlu1 %v8995_v0 }
 0x713   : > { %3008 = vmax.xlane.f32.xlu0 %v8987_v20 }
 0x715   : > { %3010 = vmax.xlane.f32.xlu1 %v8993_v30  ;;  %v9003_v55 = vpop.f32.mrb[136].mxu1 }
 0x716   : > { %v9007_v40 = vpop.f32.mrb[137].mxu1  ;;  %6671 = vmatpush3.bf16.xpose.msra.mxu0 %v2203_v44 }
 0x717   : > { %3012 = vmax.xlane.f32.xlu0 %v9007_v40  ;;  %v9010_v15 = vpop.f32.mrb[138].mxu1  ;;  %7107 = vmatprep.subr.msk.bf16.mxu0 %vm917_vm0, %v7250_v62 }
 0x718   : > { %v9012_v1 = vpop.f32.mrb[139].mxu1 }
 0x719   : > { %3014 = vmax.xlane.f32.xlu1 %v9012_v1 }
 0x71b   : > { %3016 = vmax.xlane.f32.xlu0 %v9003_v55 }
 0x71d   : > { %3018 = vmax.xlane.f32.xlu1 %v9010_v15  ;;  %v9020_v33 = vpop.f32.mrb[140].mxu1 }
 0x71e   : > { %v9024_v36 = vpop.f32.mrb[141].mxu1  ;;  %6673 = vmatpush3.bf16.xpose.msra.mxu0 %v2206_v50  ;;  %v7252_v50 = vld [vmem:[%s10507_s3 + $0x78] sm:$0xff]  }
 0x71f   : > { %3020 = vmax.xlane.f32.xlu0 %v9024_v36  ;;  %v9028_v60 = vpop.f32.mrb[142].mxu1  ;;  %7108 = vmatprep.subr.msk.bf16.mxu0 %vm917_vm0, %v7251_v5 }
 0x720   : > { %v9030_v14 = vpop.f32.mrb[143].mxu1 }
 0x721   : > { %3022 = vmax.xlane.f32.xlu1 %v9030_v14 }
 0x723   : > { %3024 = vmax.xlane.f32.xlu0 %v9020_v33 }
 0x725   : > { %3026 = vmax.xlane.f32.xlu1 %v9028_v60  ;;  %v6888_v9 = vpop.f32.mrb[144].mxu1 }
 0x726   : > { %v9042_v21 = vadd.f32 %v6888_v9, %v3482_v28  ;;  %v3529_v38 = vpop.f32.mrb[145].mxu1  ;;  %v2209_v9 = vsel %vm917_vm0, %v7251_v5, 0 }
 0x727   : > { %v3530_v13 = vadd.f32 %v3529_v38, %v3482_v28  ;;  %v6889_v47 = vpop.f32.mrb[146].mxu1  ;;  %6675 = vmatpush3.bf16.xpose.msra.mxu0 %v2209_v9 }
 0x728   : > { %v9044_v22 = vadd.f32 %v6889_v47, %v3482_v28  ;;  %v3532_v19 = vpop.f32.mrb[147].mxu1  ;;  %7109 = vmatprep.subr.msk.bf16.mxu0 %vm917_vm0, %v7252_v50 }
 0x729   : > { %v3533_v48 = vadd.f32 %v3532_v19, %v3482_v28 }
 0x72b   : > { %v3818_v61 = vpack.c.bf16 %v3533_v48, %v3530_v13 }
 0x72d   : > { %v6892_v52 = vpop.f32.mrb[148].mxu1  ;;  %6958 = vmatprep.mubr.msk.bf16.mxu1 %vm917_vm0, %v3818_v61 }
 0x72e   : > { %v9054_v59 = vadd.f32 %v6892_v52, %v3482_v28  ;;  %v3545_v63 = vpop.f32.mrb[149].mxu1 }
 0x72f   : > { %v9056_v45 = vadd.f32 %v3545_v63, %v3482_v28  ;;  %v6893_v54 = vpop.f32.mrb[150].mxu1 }
 0x730   : > { %v9058_v42 = vadd.f32 %v6893_v54, %v3482_v28  ;;  %v3548_v16 = vpop.f32.mrb[151].mxu1  ;;  %v2212_v54 = vsel %vm917_vm0, %v7252_v50, 0 }
 0x731   : > { %v9060_v35 = vadd.f32 %v3548_v16, %v3482_v28  ;;  %6677 = vmatpush3.bf16.xpose.msra.mxu0 %v2212_v54  ;;  %v9104_v54 = vld [vmem:[%s10507_s3] sm:$0xff]  }
 0x732   : > { %7110 = vmatprep.subr.msk.bf16.mxu0 %vm917_vm0, %v9104_v54 }
 0x735   : > { %v6896_v46 = vpop.f32.mrb[152].mxu1 }
 0x736   : > { %v9071_v44 = vadd.f32 %v6896_v46, %v3482_v28  ;;  %v3561_v38 = vpop.f32.mrb[153].mxu1 }
 0x737   : > { %v9073_v13 = vadd.f32 %v3561_v38, %v3482_v28  ;;  %v6897_v47 = vpop.f32.mrb[154].mxu1  ;;  %v3594_v38 = vsub.s32 7, %v8209_v29 }
 0x738   : > { %v9075_v19 = vadd.f32 %v6897_v47, %v3482_v28  ;;  %v3564_v48 = vpop.f32.mrb[155].mxu1 }
 0x739   : > { %v9077_v61 = vadd.f32 %v3564_v48, %v3482_v28 }
 0x73d   : > { %v6900_v63 = vpop.f32.mrb[156].mxu1 }
 0x73e   : > { %v9088_v16 = vadd.f32 %v6900_v63, %v3482_v28  ;;  %v3577_v5 = vpop.f32.mrb[157].mxu1  ;;  %v3595_v63 = vrot.slane %v7705_v26, %v3594_v38 }
 0x73f   : > { %v9090_v46 = vadd.f32 %v3577_v5, %v3482_v28  ;;  %v6901_v9 = vpop.f32.mrb[158].mxu1 }
 0x740   : > { %v9093_v47 = vadd.f32 %v6901_v9, %v3482_v28  ;;  %v3580_v48 = vpop.f32.mrb[159].mxu1 }
 0x741   : > { %v9095_v2 = vadd.f32 %v3580_v48, %v3482_v28 }
 0x745   : > { %v6908_v5 = vpop.f32.mrb[160].mxu1 }
 0x746   : > { %v3651_v9 = vadd.f32 %v6908_v5, %v3595_v63  ;;  %v3642_v52 = vpop.f32.mrb[161].mxu1 }
 0x747   : > { %v3643_v28 = vadd.f32 %v3642_v52, %v3595_v63  ;;  %v6909_v48 = vpop.f32.mrb[162].mxu1 }
 0x748   : > { %v3654_v51 = vadd.f32 %v6909_v48, %v3595_v63  ;;  %v3645_v53 = vpop.f32.mrb[163].mxu1 }
 0x749   : > { %v3646_v62 = vadd.f32 %v3645_v53, %v3595_v63 }
 0x74a   : > { %v3827_v25 = vpack.c.bf16 %v3654_v51, %v3651_v9 }
 0x74b   : > { %v3826_v49 = vpack.c.bf16 %v3646_v62, %v3643_v28 }
 0x74c   : > { %v3862_v53 = vsel %vm917_vm0, %v3827_v25, 0 }
 0x74d   : > { %7134 = vmatprep.subr.msk.bf16.mxu1 %vm917_vm0, %v3826_v49  ;;  %v3859_v26 = vsel %vm917_vm0, %v3826_v49, 0  ;;  %v6912_v38 = vpop.f32.mrb[164].mxu1 }
 0x74e   : > { %6943 = vmatpush3.bf16.xpose.msra.mxu1 %v3859_v26  ;;  %v3667_v50 = vadd.f32 %v6912_v38, %v3595_v63  ;;  %v3658_v29 = vpop.f32.mrb[165].mxu1 }
 0x74f   : > { %7135 = vmatprep.subr.msk.bf16.mxu1 %vm917_vm0, %v3827_v25  ;;  %v3659_v27 = vadd.f32 %v3658_v29, %v3595_v63  ;;  %v6913_v5 = vpop.f32.mrb[166].mxu1 }
 0x750   : > { %v3670_v24 = vadd.f32 %v6913_v5, %v3595_v63  ;;  %v3661_v52 = vpop.f32.mrb[167].mxu1 }
 0x751   : > { %v3662_v23 = vadd.f32 %v3661_v52, %v3595_v63 }
 0x752   : > { %v3829_v48 = vpack.c.bf16 %v3670_v24, %v3667_v50 }
 0x753   : > { %v3828_v51 = vpack.c.bf16 %v3662_v23, %v3659_v27 }
 0x755   : > { %v6916_v62 = vpop.f32.mrb[168].mxu1  ;;  %v3865_v5 = vsel %vm917_vm0, %v3828_v51, 0 }
 0x756   : > { %6945 = vmatpush3.bf16.xpose.msra.mxu1 %v3862_v53  ;;  %v3683_v9 = vadd.f32 %v6916_v62, %v3595_v63  ;;  %v3674_v28 = vpop.f32.mrb[169].mxu1 }
 0x757   : > { %7136 = vmatprep.subr.msk.bf16.mxu1 %vm917_vm0, %v3828_v51  ;;  %v3675_v49 = vadd.f32 %v3674_v28, %v3595_v63  ;;  %v6917_v26 = vpop.f32.mrb[170].mxu1 }
 0x758   : > { %v3686_v38 = vadd.f32 %v6917_v26, %v3595_v63  ;;  %v3677_v18 = vpop.f32.mrb[171].mxu1  ;;  %v3868_v26 = vsel %vm917_vm0, %v3829_v48, 0 }
 0x759   : > { %v3678_v17 = vadd.f32 %v3677_v18, %v3595_v63 }
 0x75a   : > { %v3831_v29 = vpack.c.bf16 %v3686_v38, %v3683_v9 }
 0x75b   : > { %v3830_v12 = vpack.c.bf16 %v3678_v17, %v3675_v49 }
 0x75c   : > { %v3874_v18 = vsel %vm917_vm0, %v3831_v29, 0 }
 0x75d   : > { %v6920_v52 = vpop.f32.mrb[172].mxu1  ;;  %v3871_v17 = vsel %vm917_vm0, %v3830_v12, 0 }
 0x75e   : > { %6947 = vmatpush3.bf16.xpose.msra.mxu1 %v3865_v5  ;;  %v3699_v24 = vadd.f32 %v6920_v52, %v3595_v63  ;;  %v3690_v25 = vpop.f32.mrb[173].mxu1 }
 0x75f   : > { %7137 = vmatprep.subr.msk.bf16.mxu1 %vm917_vm0, %v3829_v48  ;;  %v3691_v23 = vadd.f32 %v3690_v25, %v3595_v63  ;;  %v6921_v27 = vpop.f32.mrb[174].mxu1  ;;  %v10619_v48 = vpack.c.bf16 %v9044_v22, %v9042_v21  ;;  %v10624_v25 = vpack.c.bf16 %v9095_v2, %v9090_v46 }
 0x760   : > { %v3702_v50 = vadd.f32 %v6921_v27, %v3595_v63  ;;  %v3693_v53 = vpop.f32.mrb[175].mxu1 }
 0x761   : > { %v3694_v62 = vadd.f32 %v3693_v53, %v3595_v63 }
 0x762   : > { %v3833_v28 = vpack.c.bf16 %v3702_v50, %v3699_v24 }
 0x763   : > { %v3832_v10 = vpack.c.bf16 %v3694_v62, %v3691_v23 }
 0x764   : > { %v3880_v63 = vsel %vm917_vm0, %v3833_v28, 0 }
 0x765   : > { %v3877_v51 = vsel %vm917_vm0, %v3832_v10, 0 }
 0x766   : > { %6949 = vmatpush3.bf16.xpose.msra.mxu1 %v3868_v26 }
 0x767   : > { %7138 = vmatprep.subr.msk.bf16.mxu1 %vm917_vm0, %v3830_v12  ;;  %v10620_v12 = vpack.c.bf16 %v9060_v35, %v9056_v45 }
 0x76e   : > { %6951 = vmatpush3.bf16.xpose.msra.mxu1 %v3871_v17 }
 0x76f   : > { %7139 = vmatprep.subr.msk.bf16.mxu1 %vm917_vm0, %v3831_v29  ;;  %v10622_v29 = vpack.c.bf16 %v9077_v61, %v9073_v13  ;;  %v10623_v61 = vpack.c.bf16 %v9075_v19, %v9071_v44 }
 0x776   : > { %6953 = vmatpush3.bf16.xpose.msra.mxu1 %v3874_v18 }
 0x777   : > { %7140 = vmatprep.subr.msk.bf16.mxu1 %vm917_vm0, %v3832_v10  ;;  %v10621_v10 = vpack.c.bf16 %v9058_v42, %v9054_v59 }
 0x77e   : > { %6955 = vmatpush3.bf16.xpose.msra.mxu1 %v3877_v51 }
 0x77f   : > { %7141 = vmatprep.subr.msk.bf16.mxu1 %vm917_vm0, %v3833_v28  ;;  %v10625_v28 = vpack.c.bf16 %v9093_v47, %v9088_v16 }
 0x786   : > { %6957 = vmatpush3.bf16.xpose.msra.mxu1 %v3880_v63 }
 0x78d   : > { %6959 = vmatmul.mubr.msk.bf16.vlgmr.msra.gmra.mrb[176].mxu1 %vm917_vm0, %v10619_v48 }
 0x78e   : > { %6962 = vmatprep.mubr.msk.bf16.mxu1 %vm917_vm0, %v10620_v12 }
 0x794   : > { %v2997_v9 = vpop.xlane.xlu0 %2996 }
 0x795   : > { %v3028_v49 = vsub.f32 %v8973_v41, %v2997_v9  ;;  %6963 = vmatmul.mubr.msk.bf16.gmra.mrb[180].mxu1 %vm917_vm0, %v10621_v10 }
 0x796   : > { %v2999_v38 = vpop.xlane.xlu1 %2998  ;;  %6966 = vmatprep.mubr.msk.bf16.mxu1 %vm917_vm0, %v10622_v29 }
 0x797   : > { %v3044_v21 = vmul.f32 1.442695, %v3028_v49  ;;  %v3029_v22 = vsub.f32 %v8981_v56, %v2999_v38 }
 0x798   : > { %v3001_v45 = vpop.xlane.xlu0 %3000 }
 0x799   : > { %7447 = vpow2.f32 %v3044_v21  ;;  %v3046_v35 = vmul.f32 1.442695, %v3029_v22  ;;  %v3030_v5 = vsub.f32 %v8971_v32, %v3001_v45 }
 0x79a   : > { %v3003_v41 = vpop.xlane.xlu1 %3002 }
 0x79b   : > { %7449 = vpow2.f32 %v3046_v35  ;;  %v3048_v52 = vmul.f32 1.442695, %v3030_v5  ;;  %v3031_v59 = vsub.f32 %v8979_v43, %v3003_v41 }
 0x79c   : > { %v3005_v42 = vpop.xlane.xlu0 %3004 }
 0x79d   : > { %7451 = vpow2.f32 %v3048_v52  ;;  %v3050_v24 = vmul.f32 1.442695, %v3031_v59  ;;  %v3032_v13 = vsub.f32 %v8990_v6, %v3005_v42  ;;  %6967 = vmatmul.mubr.msk.bf16.gmra.mrb[184].mxu1 %vm917_vm0, %v10623_v61 }
 0x79e   : > { %v3007_v56 = vpop.xlane.xlu1 %3006  ;;  %6970 = vmatprep.mubr.msk.bf16.mxu1 %vm917_vm0, %v10624_v25 }
 0x79f   : > { %7453 = vpow2.f32 %v3050_v24  ;;  %v3052_v32 = vmul.f32 1.442695, %v3032_v13  ;;  %v3033_v43 = vsub.f32 %v8995_v0, %v3007_v56 }
 0x7a0   : > { %v3009_v23 = vpop.xlane.xlu0 %3008 }
 0x7a1   : > { %7455 = vpow2.f32 %v3052_v32  ;;  %v3054_v27 = vmul.f32 1.442695, %v3033_v43  ;;  %v3034_v6 = vsub.f32 %v8987_v20, %v3009_v23 }
 0x7a2   : > { %v3011_v50 = vpop.xlane.xlu1 %3010 }
 0x7a3   : > { %v9155_v53 = vpop.eup %7447  ;;  %7457 = vpow2.f32 %v3054_v27  ;;  %v3056_v44 = vmul.f32 1.442695, %v3034_v6  ;;  %v3035_v19 = vsub.f32 %v8993_v30, %v3011_v50  ;;  %v2376_v6 = vsel %vm917_vm0, %v9104_v54, 0  ;;  %v7254_v50 = vld [vmem:[%s10507_s3 + $0x8] sm:$0xff]   ;;  %v7255_v54 = vld [vmem:[%s10507_s3 + $0x10] sm:$0xff]  }
 0x7a4   : > { %v3013_v62 = vpop.xlane.xlu0 %3012  ;;  %3076 = vadd.xlane.f32.xlu0 %v9155_v53 }
 0x7a5   : > { %v9159_v2 = vpop.eup %7449  ;;  %7459 = vpow2.f32 %v3056_v44  ;;  %v3058_v46 = vmul.f32 1.442695, %v3035_v19  ;;  %v3036_v0 = vsub.f32 %v9007_v40, %v3013_v62  ;;  %6971 = vmatmul.mubr.msk.bf16.gmra.mrb[188].mxu1 %vm917_vm0, %v10625_v28 }
 0x7a6   : > { %v3015_v20 = vpop.xlane.xlu1 %3014  ;;  %3078 = vadd.xlane.f32.xlu1 %v9159_v2 }
 0x7a7   : > { %v9167_v26 = vpop.eup %7451  ;;  %7461 = vpow2.f32 %v3058_v46  ;;  %v3060_v30 = vmul.f32 1.442695, %v3036_v0  ;;  %v3037_v17 = vsub.f32 %v9012_v1, %v3015_v20  ;;  %v2379_v20 = vsel %vm917_vm0, %v7254_v50, 0 }
 0x7a8   : > { %v3017_v18 = vpop.xlane.xlu0 %3016  ;;  %3080 = vadd.xlane.f32.xlu0 %v9167_v26 }
 0x7a9   : > { %v9171_v51 = vpop.eup %7453  ;;  %7463 = vpow2.f32 %v3060_v30  ;;  %v3062_v40 = vmul.f32 1.442695, %v3037_v17  ;;  %v3038_v16 = vsub.f32 %v9003_v55, %v3017_v18 }
 0x7aa   : > { %v3019_v47 = vpop.xlane.xlu1 %3018  ;;  %3082 = vadd.xlane.f32.xlu1 %v9171_v51 }
 0x7ab   : > { %v9175_v63 = vpop.eup %7455  ;;  %7465 = vpow2.f32 %v3062_v40  ;;  %v3064_v48 = vmul.f32 1.442695, %v3038_v16  ;;  %v3039_v12 = vsub.f32 %v9010_v15, %v3019_v47 }
 0x7ac   : > { %3084 = vadd.xlane.f32.xlu0 %v9175_v63  ;;  %v3021_v1 = vpop.xlane.xlu0 %3020 }
 0x7ad   : > { %v9179_v9 = vpop.eup %7457  ;;  %7467 = vpow2.f32 %v3064_v48  ;;  %v3066_v49 = vmul.f32 1.442695, %v3039_v12  ;;  %v3040_v10 = vsub.f32 %v9024_v36, %v3021_v1  ;;  %v2382_v48 = vsel %vm917_vm0, %v7255_v54, 0  ;;  %v7256_v12 = vld [vmem:[%s10507_s3 + $0x18] sm:$0xff]  }
 0x7ae   : > { %3086 = vadd.xlane.f32.xlu1 %v9179_v9  ;;  %v3023_v55 = vpop.xlane.xlu1 %3022 }
 0x7af   : > { %v9183_v38 = vpop.eup %7459  ;;  %7469 = vpow2.f32 %v3066_v49  ;;  %v3068_v29 = vmul.f32 1.442695, %v3040_v10  ;;  %v3041_v21 = vsub.f32 %v9030_v14, %v3023_v55 }
 0x7b0   : > { %3088 = vadd.xlane.f32.xlu0 %v9183_v38  ;;  %v3025_v15 = vpop.xlane.xlu0 %3024 }
 0x7b1   : > { %v9187_v22 = vpop.eup %7461  ;;  %7471 = vpow2.f32 %v3068_v29  ;;  %v3070_v45 = vmul.f32 1.442695, %v3041_v21  ;;  %v3042_v35 = vsub.f32 %v9020_v33, %v3025_v15  ;;  %v2385_v15 = vsel %vm917_vm0, %v7256_v12, 0 }
 0x7b2   : > { %3090 = vadd.xlane.f32.xlu1 %v9187_v22  ;;  %v3027_v36 = vpop.xlane.xlu1 %3026 }
 0x7b3   : > { %v9191_v5 = vpop.eup %7463  ;;  %7473 = vpow2.f32 %v3070_v45  ;;  %v3072_v41 = vmul.f32 1.442695, %v3042_v35  ;;  %v3043_v52 = vsub.f32 %v9028_v60, %v3027_v36  ;;  %v7257_v45 = vld [vmem:[%s10507_s3 + $0x20] sm:$0xff]   ;;  %v10626_v35 = vpack.c.bf16 %v8551_v39, %v8545_v7  ;;  %v7260_v39 = vld [vmem:[%s10507_s3 + $0x38] sm:$0xff]  }
 0x7b4   : > { %3092 = vadd.xlane.f32.xlu0 %v9191_v5  ;;  %v2388_v36 = vsel %vm917_vm0, %v7257_v45, 0 }
 0x7b5   : > { %v9195_v14 = vpop.eup %7465  ;;  %7475 = vpow2.f32 %v3072_v41  ;;  %v3074_v59 = vmul.f32 1.442695, %v3043_v52  ;;  %v7258_v41 = vld [vmem:[%s10507_s3 + $0x28] sm:$0xff]  }
 0x7b6   : > { %3094 = vadd.xlane.f32.xlu1 %v9195_v14  ;;  %v2391_v52 = vsel %vm917_vm0, %v7258_v41, 0 }
 0x7b7   : > { %v9198_v42 = vpop.eup %7467  ;;  %7477 = vpow2.f32 %v3074_v59  ;;  %v7259_v59 = vld [vmem:[%s10507_s3 + $0x30] sm:$0xff]  }
 0x7b8   : > { %3096 = vadd.xlane.f32.xlu0 %v9198_v42  ;;  %v2394_v7 = vsel %vm917_vm0, %v7259_v59, 0 }
 0x7b9   : > { %v9201_v33 = vpop.eup %7469 }
 0x7ba   : > { %3098 = vadd.xlane.f32.xlu1 %v9201_v33 }
 0x7bb   : > { %v9204_v24 = vpop.eup %7471 }
 0x7bc   : > { %3100 = vadd.xlane.f32.xlu0 %v9204_v24 }
 0x7bd   : > { %v9207_v60 = vpop.eup %7473 }
 0x7be   : > { %3102 = vadd.xlane.f32.xlu1 %v9207_v60 }
 0x7bf   : > { %v9210_v13 = vpop.eup %7475  ;;  %v6648_v61 = vpop.f32.mrb[64].mxu0 }
 0x7c0   : > { %v2038_v56 = vpop.f32.mrb[65].mxu0  ;;  %3104 = vadd.xlane.f32.xlu0 %v9210_v13 }
 0x7c1   : > { %v9213_v25 = vpop.eup %7477  ;;  %v6649_v32 = vpop.f32.mrb[66].mxu0 }
 0x7c2   : > { %v2102_v43 = vpack.c.bf16 %v6649_v32, %v6648_v61  ;;  %v2041_v23 = vpop.f32.mrb[67].mxu0  ;;  %3106 = vadd.xlane.f32.xlu1 %v9213_v25  ;;  %v2397_v61 = vsel %vm917_vm0, %v7260_v39, 0  ;;  %v10628_v32 = vld [vmem:[#allocation26_spill] sm:$0xff] }
 0x7c3   : > { %v2101_v27 = vpack.c.bf16 %v2041_v23, %v2038_v56  ;;  %v10627_v56 = vld [vmem:[#allocation27_spill] sm:$0xff] }
 0x7c4   : > { %v10630_v23 = vld [vmem:[#allocation31_spill] sm:$0xff] }
 0x7c5   : > { %6678 = vmatprep.mubr.msk.bf16.mxu0 %vm917_vm0, %v2101_v27  ;;  %v10631_v27 = vld [vmem:[#allocation29_spill] sm:$0xff] }
 0x7c6   : > { %6679 = vmatmul.mubr.msk.bf16.vlgmr.msra.gmra.mrb[80].mxu0 %vm917_vm0, %v2102_v43  ;;  %v10629_v43 = vpack.c.bf16 %v10627_v56, %v10628_v32 }
 0x7c7   : > { %6695 = vmatpush3.bf16.xpose.msra.mxu0 %v2376_v6  ;;  %v6652_v44 = vpop.f32.mrb[68].mxu0  ;;  %v10632_v6 = vpack.c.bf16 %v10630_v23, %v10631_v27 }
 0x7c8   : > { %v2054_v19 = vpop.f32.mrb[69].mxu0  ;;  %7111 = vmatprep.subr.msk.bf16.mxu0 %vm917_vm0, %v7254_v50  ;;  %v10633_v50 = vld [vmem:[#allocation30_spill] sm:$0xff] }
 0x7c9   : > { %v6653_v62 = vpop.f32.mrb[70].mxu0 }
 0x7ca   : > { %v2104_v46 = vpack.c.bf16 %v6653_v62, %v6652_v44  ;;  %v2057_v0 = vpop.f32.mrb[71].mxu0  ;;  %v10634_v44 = vld [vmem:[#allocation28_spill] sm:$0xff]  ;;  %v10636_v62 = vld [vmem:[#allocation35_spill] sm:$0xff] }
 0x7cb   : > { %v2103_v28 = vpack.c.bf16 %v2057_v0, %v2054_v19  ;;  %v10635_v19 = vpack.c.bf16 %v10633_v50, %v10634_v44 }
 0x7cd   : > { %6682 = vmatprep.mubr.msk.bf16.mxu0 %vm917_vm0, %v2103_v28 }
 0x7ce   : > { %6683 = vmatmul.mubr.msk.bf16.gmra.mrb[84].mxu0 %vm917_vm0, %v2104_v46  ;;  %v10637_v46 = vld [vmem:[#allocation33_spill] sm:$0xff] }
 0x7cf   : > { %6697 = vmatpush3.bf16.xpose.msra.mxu0 %v2379_v20  ;;  %v6656_v30 = vpop.f32.mrb[72].mxu0  ;;  %v10638_v0 = vpack.c.bf16 %v10636_v62, %v10637_v46  ;;  %v10642_v20 = vld [vmem:[#allocation39_spill] sm:$0xff] }
 0x7d0   : > { %v2070_v17 = vpop.f32.mrb[73].mxu0  ;;  %7112 = vmatprep.subr.msk.bf16.mxu0 %vm917_vm0, %v7255_v54  ;;  %v10643_v54 = vld [vmem:[#allocation37_spill] sm:$0xff] }
 0x7d1   : > { %v6657_v18 = vpop.f32.mrb[74].mxu0 }
 0x7d2   : > { %v2106_v40 = vpack.c.bf16 %v6657_v18, %v6656_v30  ;;  %v2073_v16 = vpop.f32.mrb[75].mxu0  ;;  %v10644_v30 = vpack.c.bf16 %v10642_v20, %v10643_v54  ;;  %v7261_v18 = vld [vmem:[%s10507_s3 + $0x80] sm:$0xff]  }
 0x7d3   : > { %v2105_v47 = vpack.c.bf16 %v2073_v16, %v2070_v17 }
 0x7d5   : > { %6686 = vmatprep.mubr.msk.bf16.mxu0 %vm917_vm0, %v2105_v47 }
 0x7d6   : > { %6687 = vmatmul.mubr.msk.bf16.gmra.mrb[88].mxu0 %vm917_vm0, %v2106_v40 }
 0x7d7   : > { %6699 = vmatpush3.bf16.xpose.msra.mxu0 %v2382_v48  ;;  %v6660_v1 = vpop.f32.mrb[76].mxu0 }
 0x7d8   : > { %v2086_v49 = vpop.f32.mrb[77].mxu0  ;;  %7113 = vmatprep.subr.msk.bf16.mxu0 %vm917_vm0, %v7256_v12 }
 0x7d9   : > { %v6661_v10 = vpop.f32.mrb[78].mxu0 }
 0x7da   : > { %v2108_v55 = vpack.c.bf16 %v6661_v10, %v6660_v1  ;;  %v2089_v29 = vpop.f32.mrb[79].mxu0 }
 0x7db   : > { %v2107_v21 = vpack.c.bf16 %v2089_v29, %v2086_v49 }
 0x7dd   : > { %6690 = vmatprep.mubr.msk.bf16.mxu0 %vm917_vm0, %v2107_v21 }
 0x7de   : > { %6691 = vmatmul.mubr.msk.bf16.gmra.mrb[92].mxu0 %vm917_vm0, %v2108_v55 }
 0x7df   : > { %6701 = vmatpush3.bf16.xpose.msra.mxu0 %v2385_v15  ;;  %6710 = vmatprep.mubr.msk.bf16.mxu0 %vm917_vm0, %v10626_v35 }
 0x7e0   : > { %7114 = vmatprep.subr.msk.bf16.mxu0 %vm917_vm0, %v7257_v45 }
 0x7e7   : > { %6703 = vmatpush3.bf16.xpose.msra.mxu0 %v2388_v36 }
 0x7e8   : > { %7115 = vmatprep.subr.msk.bf16.mxu0 %vm917_vm0, %v7258_v41 }
 0x7ef   : > { %6705 = vmatpush3.bf16.xpose.msra.mxu0 %v2391_v52 }
 0x7f0   : > { %7116 = vmatprep.subr.msk.bf16.mxu0 %vm917_vm0, %v7259_v59 }
 0x7f7   : > { %6707 = vmatpush3.bf16.xpose.msra.mxu0 %v2394_v7 }
 0x7f8   : > { %7117 = vmatprep.subr.msk.bf16.mxu0 %vm917_vm0, %v7260_v39 }
 0x7ff   : > { %6709 = vmatpush3.bf16.xpose.msra.mxu0 %v2397_v61 }
 0x800   : > { %6818 = vmatprep.subr.bf16.mxu0 %v8775_v8 }
 0x806   : > { %6711 = vmatmul.mubr.msk.bf16.vlgmr.msra.gmra.mrb[80].mxu0 %vm917_vm0, %v10629_v43 }
 0x807   : > { %6714 = vmatprep.mubr.msk.bf16.mxu0 %vm917_vm0, %v10632_v6  ;;  %6819 = vmatpush3.bf16.msra.mxu0 %v8775_v8  ;;  %v10640_v8 = vld [vmem:[#allocation32_spill] sm:$0xff] }
 0x808   : > { %6820 = vmatprep.subr.bf16.mxu0 %v8772_v57 }
 0x80b   : > { %6821 = vmatpush3.bf16.msra.mxu0 %v8772_v57  ;;  %v10639_v57 = vld [vmem:[#allocation34_spill] sm:$0xff] }
 0x80c   : > { %6822 = vmatprep.subr.bf16.mxu0 %v8925_v3  ;;  %v10641_v28 = vpack.c.bf16 %v10639_v57, %v10640_v8 }
 0x80e   : > { %6715 = vmatmul.mubr.msk.bf16.gmra.mrb[84].mxu0 %vm917_vm0, %v10635_v19 }
 0x80f   : > { %6718 = vmatprep.mubr.msk.bf16.mxu0 %vm917_vm0, %v10638_v0  ;;  %6823 = vmatpush3.bf16.msra.mxu0 %v8925_v3  ;;  %v10646_v3 = vld [vmem:[#allocation36_spill] sm:$0xff] }
 0x810   : > { %6824 = vmatprep.subr.bf16.mxu0 %v8923_v58 }
 0x813   : > { %6825 = vmatpush3.bf16.msra.mxu0 %v8923_v58  ;;  %v10645_v58 = vld [vmem:[#allocation38_spill] sm:$0xff] }
 0x814   : > { %6826 = vmatprep.subr.bf16.mxu0 %v8935_v11  ;;  %v10647_v17 = vpack.c.bf16 %v10645_v58, %v10646_v3 }
 0x816   : > { %6719 = vmatmul.mubr.msk.bf16.gmra.mrb[88].mxu0 %vm917_vm0, %v10641_v28 }
 0x817   : > { %6722 = vmatprep.mubr.msk.bf16.mxu0 %vm917_vm0, %v10644_v30  ;;  %6827 = vmatpush3.bf16.msra.mxu0 %v8935_v11 }
 0x818   : > { %6828 = vmatprep.subr.bf16.mxu0 %v8933_v31 }
 0x81b   : > { %6829 = vmatpush3.bf16.msra.mxu0 %v8933_v31 }
 0x81c   : > { %6830 = vmatprep.subr.bf16.mxu0 %v8945_v34 }
 0x81e   : > { %6723 = vmatmul.mubr.msk.bf16.gmra.mrb[92].mxu0 %vm917_vm0, %v10647_v17 }
 0x81f   : > { %6831 = vmatpush3.bf16.msra.mxu0 %v8945_v34 }
 0x820   : > { %6832 = vmatprep.subr.bf16.mxu0 %v8943_v37 }
 0x823   : > { %6833 = vmatpush3.bf16.msra.mxu0 %v8943_v37 }
 0x824   : > { %7126 = vmatprep.subr.msk.bf16.mxu0 %vm917_vm0, %v7261_v18 }
 0x831   : > { %v3077_v31 = vpop.xlane.xlu0 %3076 }
 0x832   : > { %7479 = vrcp.f32 %v3077_v31 }
 0x833   : > { %v3079_v11 = vpop.xlane.xlu1 %3078 }
 0x834   : > { %7481 = vrcp.f32 %v3079_v11 }
 0x835   : > { %v3081_v40 = vpop.xlane.xlu0 %3080 }
 0x836   : > { %7483 = vrcp.f32 %v3081_v40 }
 0x837   : > { %v3083_v16 = vpop.xlane.xlu1 %3082 }
 0x838   : > { %7485 = vrcp.f32 %v3083_v16 }
 0x839   : > { %v3085_v47 = vpop.xlane.xlu0 %3084 }
 0x83a   : > { %7487 = vrcp.f32 %v3085_v47 }
 0x83b   : > { %v3087_v34 = vpop.xlane.xlu1 %3086 }
 0x83c   : > { %v7480_v48 = vpop.eup %7479  ;;  %7489 = vrcp.f32 %v3087_v34  ;;  %v7263_v34 = vld [vmem:[%s10507_s3 + $0x90] sm:$0xff]  }
 0x83d   : > { %v3089_v12 = vpop.xlane.xlu0 %3088  ;;  %v3124_v37 = vmul.f32 %v7480_v48, %v9155_v53  ;;  %v3343_v53 = vsel %vm917_vm0, %v7261_v18, 0 }
 0x83e   : > { %v7482_v1 = vpop.eup %7481  ;;  %7491 = vrcp.f32 %v3089_v12 }
 0x83f   : > { %v3091_v49 = vpop.xlane.xlu1 %3090  ;;  %v3125_v10 = vmul.f32 %v7482_v1, %v9159_v2  ;;  %v7262_v2 = vld [vmem:[%s10507_s3 + $0x88] sm:$0xff]   ;;  %v3349_v1 = vsel %vm917_vm0, %v7263_v34, 0 }
 0x840   : > { %v7484_v55 = vpop.eup %7483  ;;  %7493 = vrcp.f32 %v3091_v49 }
 0x841   : > { %v3093_v29 = vpop.xlane.xlu0 %3092  ;;  %v3140_v21 = vpack.c.bf16 %v3125_v10, %v3124_v37  ;;  %v3126_v45 = vmul.f32 %v7484_v55, %v9167_v26  ;;  %v7264_v10 = vld [vmem:[%s10507_s3 + $0x98] sm:$0xff]  }
 0x842   : > { %v7486_v15 = vpop.eup %7485  ;;  %7495 = vrcp.f32 %v3093_v29 }
 0x843   : > { %v3127_v35 = vmul.f32 %v7486_v15, %v9171_v51  ;;  %6834 = vmatprep.mubr.bf16.mxu0 %v3140_v21  ;;  %v3095_v36 = vpop.xlane.xlu1 %3094  ;;  %v3352_v21 = vsel %vm917_vm0, %v7264_v10, 0 }
 0x844   : > { %v7488_v41 = vpop.eup %7487  ;;  %7497 = vrcp.f32 %v3095_v36  ;;  %v7266_v36 = vld [vmem:[%s10507_s3 + $0xa8] sm:$0xff]  }
 0x845   : > { %v3097_v52 = vpop.xlane.xlu0 %3096  ;;  %v3141_v59 = vpack.c.bf16 %v3127_v35, %v3126_v45  ;;  %v3128_v26 = vmul.f32 %v7488_v41, %v9175_v63  ;;  %v7265_v45 = vld [vmem:[%s10507_s3 + $0xa0] sm:$0xff]   ;;  %v3358_v41 = vsel %vm917_vm0, %v7266_v36, 0 }
 0x846   : > { %v7490_v7 = vpop.eup %7489  ;;  %7499 = vrcp.f32 %v3097_v52  ;;  %v3355_v35 = vsel %vm917_vm0, %v7265_v45, 0  ;;  %v7267_v52 = vld [vmem:[%s10507_s3 + $0xb0] sm:$0xff]  }
 0x847   : > { %6835 = vmatmul.mubr.bf16.vlgmr.msra.gmra.mrb[96].mxu0 %v3141_v59  ;;  %v3099_v39 = vpop.xlane.xlu1 %3098  ;;  %v3129_v51 = vmul.f32 %v7490_v7, %v9179_v9  ;;  %v3346_v9 = vsel %vm917_vm0, %v7262_v2, 0  ;;  %v3361_v59 = vsel %vm917_vm0, %v7267_v52, 0  ;;  %v9410_v7 = vld [vmem:[%s10505_s1 + $0xb0] sm:$0xff]  }
 0x848   : > { %v7492_v61 = vpop.eup %7491  ;;  %7501 = vrcp.f32 %v3099_v39  ;;  %6851 = vmatpush3.bf16.xpose.msra.mxu0 %v3343_v53  ;;  %v7268_v53 = vld [vmem:[%s10507_s3 + $0xb8] sm:$0xff]  }
 0x849   : > { %v3101_v56 = vpop.xlane.xlu0 %3100  ;;  %v3142_v32 = vpack.c.bf16 %v3129_v51, %v3128_v26  ;;  %7127 = vmatprep.subr.msk.bf16.mxu0 %vm917_vm0, %v7262_v2  ;;  %v3130_v27 = vmul.f32 %v7492_v61, %v9183_v38  ;;  %v3364_v2 = vsel %vm917_vm0, %v7268_v53, 0 }
 0x84a   : > { %v7494_v43 = vpop.eup %7493  ;;  %7503 = vrcp.f32 %v3101_v56 }
 0x84b   : > { %6838 = vmatprep.mubr.bf16.mxu0 %v3142_v32  ;;  %v3103_v23 = vpop.xlane.xlu1 %3102  ;;  %v3131_v6 = vmul.f32 %v7494_v43, %v9187_v22 }
 0x84c   : > { %v7496_v50 = vpop.eup %7495  ;;  %7505 = vrcp.f32 %v3103_v23 }
 0x84d   : > { %v3105_v63 = vpop.xlane.xlu0 %3104  ;;  %v3143_v44 = vpack.c.bf16 %v3131_v6, %v3130_v27  ;;  %v3132_v46 = vmul.f32 %v7496_v50, %v9191_v5 }
 0x84e   : > { %v7498_v19 = vpop.eup %7497  ;;  %7507 = vrcp.f32 %v3105_v63 }
 0x84f   : > { %6839 = vmatmul.mubr.bf16.gmra.mrb[100].mxu0 %v3143_v44  ;;  %v3107_v62 = vpop.xlane.xlu1 %3106  ;;  %v3133_v0 = vmul.f32 %v7498_v19, %v9195_v14 }
 0x850   : > { %v7500_v57 = vpop.eup %7499  ;;  %7509 = vrcp.f32 %v3107_v62  ;;  %6853 = vmatpush3.bf16.xpose.msra.mxu0 %v3346_v9 }
 0x851   : > { %v3144_v38 = vpack.c.bf16 %v3133_v0, %v3132_v46  ;;  %v3134_v22 = vmul.f32 %v7500_v57, %v9198_v42  ;;  %7128 = vmatprep.subr.msk.bf16.mxu0 %vm917_vm0, %v7263_v34 }
 0x852   : > { %v7502_v8 = vpop.eup %7501 }
 0x853   : > { %6842 = vmatprep.mubr.bf16.mxu0 %v3144_v38  ;;  %v3135_v28 = vmul.f32 %v7502_v8, %v9201_v33 }
 0x854   : > { %v7504_v20 = vpop.eup %7503 }
 0x855   : > { %v3145_v54 = vpack.c.bf16 %v3135_v28, %v3134_v22  ;;  %v3136_v58 = vmul.f32 %v7504_v20, %v9204_v24 }
 0x856   : > { %v7506_v30 = vpop.eup %7505 }
 0x857   : > { %6843 = vmatmul.mubr.bf16.gmra.mrb[104].mxu0 %v3145_v54  ;;  %v3137_v5 = vmul.f32 %v7506_v30, %v9207_v60 }
 0x858   : > { %v7508_v3 = vpop.eup %7507  ;;  %6855 = vmatpush3.bf16.xpose.msra.mxu0 %v3349_v1 }
 0x859   : > { %v3146_v14 = vpack.c.bf16 %v3137_v5, %v3136_v58  ;;  %v3138_v18 = vmul.f32 %v7508_v3, %v9210_v13  ;;  %7129 = vmatprep.subr.msk.bf16.mxu0 %vm917_vm0, %v7264_v10 }
 0x85a   : > { %v7510_v17 = vpop.eup %7509 }
 0x85b   : > { %6846 = vmatprep.mubr.bf16.mxu0 %v3146_v14  ;;  %v3139_v31 = vmul.f32 %v7510_v17, %v9213_v25 }
 0x85d   : > { %v3147_v11 = vpack.c.bf16 %v3139_v31, %v3138_v18 }
 0x85f   : > { %6847 = vmatmul.mubr.bf16.gmra.mrb[108].mxu0 %v3147_v11 }
 0x860   : > { %v9335_v42 = vpop.f32.mrb[176].mxu1  ;;  %6857 = vmatpush3.bf16.xpose.msra.mxu0 %v3352_v21 }
 0x861   : > { %v3916_v33 = vpop.f32.mrb[177].mxu1  ;;  %7130 = vmatprep.subr.msk.bf16.mxu0 %vm917_vm0, %v7265_v45 }
 0x862   : > { %3979 = vmax.xlane.f32.xlu0 %v3916_v33  ;;  %v9337_v40 = vpop.f32.mrb[178].mxu1 }
 0x863   : > { %v3919_v16 = vpop.f32.mrb[179].mxu1 }
 0x864   : > { %3981 = vmax.xlane.f32.xlu1 %v3919_v16 }
 0x866   : > { %3983 = vmax.xlane.f32.xlu0 %v9335_v42 }
 0x868   : > { %3985 = vmax.xlane.f32.xlu1 %v9337_v40  ;;  %v9341_v24 = vpop.f32.mrb[180].mxu1  ;;  %6859 = vmatpush3.bf16.xpose.msra.mxu0 %v3355_v35 }
 0x869   : > { %v9343_v60 = vpop.f32.mrb[181].mxu1  ;;  %7131 = vmatprep.subr.msk.bf16.mxu0 %vm917_vm0, %v7266_v36 }
 0x86a   : > { %3987 = vmax.xlane.f32.xlu0 %v9343_v60  ;;  %v9346_v13 = vpop.f32.mrb[182].mxu1 }
 0x86b   : > { %v9348_v25 = vpop.f32.mrb[183].mxu1 }
 0x86c   : > { %3989 = vmax.xlane.f32.xlu1 %v9348_v25 }
 0x86e   : > { %3991 = vmax.xlane.f32.xlu0 %v9341_v24 }
 0x870   : > { %3993 = vmax.xlane.f32.xlu1 %v9346_v13  ;;  %v9353_v47 = vpop.f32.mrb[184].mxu1  ;;  %6861 = vmatpush3.bf16.xpose.msra.mxu0 %v3358_v41 }
 0x871   : > { %v9358_v48 = vpop.f32.mrb[185].mxu1  ;;  %7132 = vmatprep.subr.msk.bf16.mxu0 %vm917_vm0, %v7267_v52 }
 0x872   : > { %3995 = vmax.xlane.f32.xlu0 %v9358_v48  ;;  %v9361_v12 = vpop.f32.mrb[186].mxu1 }
 0x873   : > { %v9365_v49 = vpop.f32.mrb[187].mxu1 }
 0x874   : > { %3997 = vmax.xlane.f32.xlu1 %v9365_v49 }
 0x876   : > { %3999 = vmax.xlane.f32.xlu0 %v9353_v47 }
 0x878   : > { %4001 = vmax.xlane.f32.xlu1 %v9361_v12  ;;  %v9370_v37 = vpop.f32.mrb[188].mxu1  ;;  %6863 = vmatpush3.bf16.xpose.msra.mxu0 %v3361_v59 }
 0x879   : > { %v9375_v55 = vpop.f32.mrb[189].mxu1  ;;  %7133 = vmatprep.subr.msk.bf16.mxu0 %vm917_vm0, %v7268_v53 }
 0x87a   : > { %4003 = vmax.xlane.f32.xlu0 %v9375_v55  ;;  %v9378_v29 = vpop.f32.mrb[190].mxu1 }
 0x87b   : > { %v9382_v15 = vpop.f32.mrb[191].mxu1 }
 0x87c   : > { %4005 = vmax.xlane.f32.xlu1 %v9382_v15 }
 0x87e   : > { %4007 = vmax.xlane.f32.xlu0 %v9370_v37 }
 0x880   : > { %4009 = vmax.xlane.f32.xlu1 %v9378_v29  ;;  %6865 = vmatpush3.bf16.xpose.msra.mxu0 %v3364_v2 }
 0x881   : > { %6922 = vmatprep.subr.bf16.mxu0 %v9410_v7 }
 0x8ef   : > { %v3980_v39 = vpop.xlane.xlu0 %3979 }
 0x8f0   : > { %v4011_v26 = vsub.f32 %v3916_v33, %v3980_v39 }
 0x8f1   : > { %v3982_v51 = vpop.xlane.xlu1 %3981 }
 0x8f2   : > { %v4027_v61 = vmul.f32 1.442695, %v4011_v26  ;;  %v4012_v56 = vsub.f32 %v3919_v16, %v3982_v51 }
 0x8f3   : > { %v3984_v32 = vpop.xlane.xlu0 %3983 }
 0x8f4   : > { %7511 = vpow2.f32 %v4027_v61  ;;  %v4029_v43 = vmul.f32 1.442695, %v4012_v56  ;;  %v4013_v23 = vsub.f32 %v9335_v42, %v3984_v32 }
 0x8f5   : > { %v3986_v27 = vpop.xlane.xlu1 %3985 }
 0x8f6   : > { %7513 = vpow2.f32 %v4029_v43  ;;  %v4031_v6 = vmul.f32 1.442695, %v4013_v23  ;;  %v4014_v50 = vsub.f32 %v9337_v40, %v3986_v27  ;;  %v7270_v27 = vld [vmem:[%s10505_s1 + $0xb8] sm:$0xff]  }
 0x8f7   : > { %v3988_v63 = vpop.xlane.xlu0 %3987 }
 0x8f8   : > { %7515 = vpow2.f32 %v4031_v6  ;;  %v4033_v44 = vmul.f32 1.442695, %v4014_v50  ;;  %v4015_v9 = vsub.f32 %v9343_v60, %v3988_v63 }
 0x8f9   : > { %v3990_v19 = vpop.xlane.xlu1 %3989 }
 0x8fa   : > { %7517 = vpow2.f32 %v4033_v44  ;;  %v4035_v62 = vmul.f32 1.442695, %v4015_v9  ;;  %v4016_v46 = vsub.f32 %v9348_v25, %v3990_v19 }
 0x8fb   : > { %v3992_v0 = vpop.xlane.xlu0 %3991 }
 0x8fc   : > { %7519 = vpow2.f32 %v4035_v62  ;;  %v4037_v57 = vmul.f32 1.442695, %v4016_v46  ;;  %v4017_v38 = vsub.f32 %v9341_v24, %v3992_v0 }
 0x8fd   : > { %v3994_v8 = vpop.xlane.xlu1 %3993 }
 0x8fe   : > { %v9418_v22 = vpop.eup %7511  ;;  %7521 = vpow2.f32 %v4037_v57  ;;  %v4039_v28 = vmul.f32 1.442695, %v4017_v38  ;;  %v4018_v20 = vsub.f32 %v9346_v13, %v3994_v8 }
 0x8ff   : > { %v3996_v54 = vpop.xlane.xlu0 %3995  ;;  %4059 = vadd.xlane.f32.xlu0 %v9418_v22 }
 0x900   : > { %v9422_v30 = vpop.eup %7513  ;;  %7523 = vpow2.f32 %v4039_v28  ;;  %v4041_v58 = vmul.f32 1.442695, %v4018_v20  ;;  %v4019_v5 = vsub.f32 %v9358_v48, %v3996_v54 }
 0x901   : > { %v3998_v3 = vpop.xlane.xlu1 %3997  ;;  %4061 = vadd.xlane.f32.xlu1 %v9422_v30 }
 0x902   : > { %v9426_v14 = vpop.eup %7515  ;;  %7525 = vpow2.f32 %v4041_v58  ;;  %v4043_v17 = vmul.f32 1.442695, %v4019_v5  ;;  %v4020_v18 = vsub.f32 %v9365_v49, %v3998_v3  ;;  %v10648_v3 = vld [vmem:[#allocation17_spill] sm:$0xff] }
 0x903   : > { %v4000_v31 = vpop.xlane.xlu0 %3999  ;;  %4063 = vadd.xlane.f32.xlu0 %v9426_v14 }
 0x904   : > { %v9430_v11 = vpop.eup %7517  ;;  %7527 = vpow2.f32 %v4043_v17  ;;  %v4045_v42 = vmul.f32 1.442695, %v4020_v18  ;;  %v4021_v33 = vsub.f32 %v9353_v47, %v4000_v31  ;;  %v10649_v17 = vld [vmem:[#allocation18_spill] sm:$0xff]  ;;  %v10650_v18 = vld [vmem:[#allocation19_spill] sm:$0xff]  ;;  %v10651_v31 = vld [vmem:[#allocation20_spill] sm:$0xff] }
 0x905   : > { %v4002_v40 = vpop.xlane.xlu1 %4001  ;;  %4065 = vadd.xlane.f32.xlu1 %v9430_v11 }
 0x906   : > { %v9434_v16 = vpop.eup %7519  ;;  %7529 = vpow2.f32 %v4045_v42  ;;  %v4047_v24 = vmul.f32 1.442695, %v4021_v33  ;;  %v4022_v60 = vsub.f32 %v9361_v12, %v4002_v40  ;;  %v10652_v42 = vld [vmem:[#allocation21_spill] sm:$0xff]  ;;  %v10653_v33 = vld [vmem:[#allocation22_spill] sm:$0xff]  ;;  %v10654_v40 = vld [vmem:[#allocation23_spill] sm:$0xff] }
 0x907   : > { %4067 = vadd.xlane.f32.xlu0 %v9434_v16  ;;  %v4004_v13 = vpop.xlane.xlu0 %4003 }
 0x908   : > { %v9438_v25 = vpop.eup %7521  ;;  %7531 = vpow2.f32 %v4047_v24  ;;  %v4049_v34 = vmul.f32 1.442695, %v4022_v60  ;;  %v4023_v48 = vsub.f32 %v9375_v55, %v4004_v13 }
 0x909   : > { %4069 = vadd.xlane.f32.xlu1 %v9438_v25  ;;  %v4006_v47 = vpop.xlane.xlu1 %4005 }
 0x90a   : > { %v9442_v1 = vpop.eup %7523  ;;  %7533 = vpow2.f32 %v4049_v34  ;;  %v4051_v49 = vmul.f32 1.442695, %v4023_v48  ;;  %v4024_v10 = vsub.f32 %v9382_v15, %v4006_v47 }
 0x90b   : > { %4071 = vadd.xlane.f32.xlu0 %v9442_v1  ;;  %v4008_v12 = vpop.xlane.xlu0 %4007 }
 0x90c   : > { %v9446_v21 = vpop.eup %7525  ;;  %7535 = vpow2.f32 %v4051_v49  ;;  %v4053_v45 = vmul.f32 1.442695, %v4024_v10  ;;  %v4025_v35 = vsub.f32 %v9370_v37, %v4008_v12  ;;  %v7706_v49 = vld [vmem:[#allocation5 + $0x8] sm:$0xf] }
 0x90d   : > { %4073 = vadd.xlane.f32.xlu1 %v9446_v21  ;;  %v4010_v55 = vpop.xlane.xlu1 %4009  ;;  %v10655_v10 = vld [vmem:[#allocation24_spill] sm:$0xff] }
 0x90e   : > { %v9450_v36 = vpop.eup %7527  ;;  %7537 = vpow2.f32 %v4053_v45  ;;  %v4055_v41 = vmul.f32 1.442695, %v4025_v35  ;;  %v4026_v52 = vsub.f32 %v9378_v29, %v4010_v55  ;;  %v10656_v12 = vsub.s32 3, %v10655_v10 }
 0x90f   : > { %4075 = vadd.xlane.f32.xlu0 %v9450_v36 }
 0x910   : > { %v9454_v15 = vpop.eup %7529  ;;  %7539 = vpow2.f32 %v4055_v41  ;;  %v4057_v59 = vmul.f32 1.442695, %v4026_v52  ;;  %v3708_v45 = vrot.slane %v7706_v49, %v10656_v12 }
 0x911   : > { %4077 = vadd.xlane.f32.xlu1 %v9454_v15 }
 0x912   : > { %v9457_v53 = vpop.eup %7531  ;;  %7541 = vpow2.f32 %v4057_v59 }
 0x913   : > { %4079 = vadd.xlane.f32.xlu0 %v9457_v53 }
 0x914   : > { %v9460_v37 = vpop.eup %7533 }
 0x915   : > { %4081 = vadd.xlane.f32.xlu1 %v9460_v37 }
 0x916   : > { %v9463_v2 = vpop.eup %7535 }
 0x917   : > { %4083 = vadd.xlane.f32.xlu0 %v9463_v2 }
 0x918   : > { %v9466_v29 = vpop.eup %7537 }
 0x919   : > { %4085 = vadd.xlane.f32.xlu1 %v9466_v29 }
 0x91a   : > { %v9469_v39 = vpop.eup %7539  ;;  %v6836_v26 = vpop.f32.mrb[96].mxu0 }
 0x91b   : > { %v3190_v51 = vpop.f32.mrb[97].mxu0  ;;  %4087 = vadd.xlane.f32.xlu0 %v9469_v39 }
 0x91c   : > { %v9472_v61 = vpop.eup %7541  ;;  %v6837_v56 = vpop.f32.mrb[98].mxu0 }
 0x91d   : > { %v3254_v32 = vpack.c.bf16 %v6837_v56, %v6836_v26  ;;  %v3193_v43 = vpop.f32.mrb[99].mxu0  ;;  %4089 = vadd.xlane.f32.xlu1 %v9472_v61 }
 0x91e   : > { %v3253_v23 = vpack.c.bf16 %v3193_v43, %v3190_v51 }
 0x920   : > { %6866 = vmatprep.mubr.msk.bf16.mxu0 %vm917_vm0, %v3253_v23 }
 0x921   : > { %6867 = vmatmul.mubr.msk.bf16.vlgmr.msra.gmra.mrb[80].mxu0 %vm917_vm0, %v3254_v32 }
 0x922   : > { %v6840_v6 = vpop.f32.mrb[100].mxu0  ;;  %6923 = vmatpush3.bf16.xpose.msra.mxu0 %v9410_v7 }
 0x923   : > { %v3206_v50 = vpop.f32.mrb[101].mxu0  ;;  %6924 = vmatprep.subr.bf16.mxu0 %v7270_v27 }
 0x924   : > { %v6841_v63 = vpop.f32.mrb[102].mxu0 }
 0x925   : > { %v3256_v44 = vpack.c.bf16 %v6841_v63, %v6840_v6  ;;  %v3209_v9 = vpop.f32.mrb[103].mxu0 }
 0x926   : > { %v3255_v19 = vpack.c.bf16 %v3209_v9, %v3206_v50 }
 0x928   : > { %6870 = vmatprep.mubr.msk.bf16.mxu0 %vm917_vm0, %v3255_v19 }
 0x929   : > { %6871 = vmatmul.mubr.msk.bf16.gmra.mrb[84].mxu0 %vm917_vm0, %v3256_v44 }
 0x92a   : > { %v6844_v62 = vpop.f32.mrb[104].mxu0  ;;  %6925 = vmatpush3.bf16.xpose.msra.mxu0 %v7270_v27 }
 0x92b   : > { %v3222_v46 = vpop.f32.mrb[105].mxu0 }
 0x92c   : > { %v6845_v0 = vpop.f32.mrb[106].mxu0 }
 0x92d   : > { %v3258_v57 = vpack.c.bf16 %v6845_v0, %v6844_v62  ;;  %v3225_v38 = vpop.f32.mrb[107].mxu0 }
 0x92e   : > { %v3257_v8 = vpack.c.bf16 %v3225_v38, %v3222_v46 }
 0x930   : > { %6874 = vmatprep.mubr.msk.bf16.mxu0 %vm917_vm0, %v3257_v8 }
 0x931   : > { %6875 = vmatmul.mubr.msk.bf16.gmra.mrb[88].mxu0 %vm917_vm0, %v3258_v57 }
 0x932   : > { %v6848_v7 = vpop.f32.mrb[108].mxu0 }
 0x933   : > { %v3238_v28 = vpop.f32.mrb[109].mxu0 }
 0x934   : > { %v6849_v20 = vpop.f32.mrb[110].mxu0 }
 0x935   : > { %v3260_v54 = vpack.c.bf16 %v6849_v20, %v6848_v7  ;;  %v3241_v58 = vpop.f32.mrb[111].mxu0 }
 0x936   : > { %v3259_v5 = vpack.c.bf16 %v3241_v58, %v3238_v28 }
 0x938   : > { %6878 = vmatprep.mubr.msk.bf16.mxu0 %vm917_vm0, %v3259_v5 }
 0x939   : > { %6879 = vmatmul.mubr.msk.bf16.gmra.mrb[92].mxu0 %vm917_vm0, %v3260_v54 }
 0x93a   : > { %6926 = vmatprep.mubr.bf16.mxu0 %v8156_v4 }
 0x941   : > { %6927 = vmatmul.mubr.bf16.vlgmr.msra.gmra.mrb[112].mxu0 %v10648_v3 }
 0x942   : > { %6930 = vmatprep.mubr.bf16.mxu0 %v10649_v17 }
 0x949   : > { %6931 = vmatmul.mubr.bf16.gmra.mrb[116].mxu0 %v10650_v18 }
 0x94a   : > { %6934 = vmatprep.mubr.bf16.mxu0 %v10651_v31 }
 0x951   : > { %6935 = vmatmul.mubr.bf16.gmra.mrb[120].mxu0 %v10652_v42 }
 0x952   : > { %6938 = vmatprep.mubr.bf16.mxu0 %v10653_v33 }
 0x959   : > { %6939 = vmatmul.mubr.bf16.gmra.mrb[124].mxu0 %v10654_v40 }
 0x98c   : > { %v4060_v24 = vpop.xlane.xlu0 %4059 }
 0x98d   : > { %7543 = vrcp.f32 %v4060_v24 }
 0x98e   : > { %v4062_v60 = vpop.xlane.xlu1 %4061 }
 0x98f   : > { %7545 = vrcp.f32 %v4062_v60 }
 0x992   : > { %v4066_v32 = vpop.xlane.xlu1 %4065 }
 0x993   : > { %7547 = vrcp.f32 %v4066_v32 }
 0x996   : > { %v4070_v50 = vpop.xlane.xlu1 %4069 }
 0x997   : > { %v7544_v13 = vpop.eup %7543  ;;  %7549 = vrcp.f32 %v4070_v50 }
 0x998   : > { %v4107_v34 = vmul.f32 %v7544_v13, %v9418_v22  ;;  %v4064_v22 = vpop.xlane.xlu0 %4063 }
 0x999   : > { %v7546_v4 = vpop.eup %7545  ;;  %7551 = vrcp.f32 %v4064_v22 }
 0x99a   : > { %v4108_v48 = vmul.f32 %v7546_v4, %v9422_v30  ;;  %v4074_v8 = vpop.xlane.xlu1 %4073 }
 0x99c   : > { %v4123_v47 = vpack.c.bf16 %v4108_v48, %v4107_v34  ;;  %v4068_v46 = vpop.xlane.xlu0 %4067 }
 0x99d   : > { %7553 = vrcp.f32 %v4068_v46 }
 0x99e   : > { %6990 = vmatprep.mubr.bf16.mxu0 %v4123_v47  ;;  %v4078_v42 = vpop.xlane.xlu1 %4077  ;;  %7555 = vrcp.f32 %v4074_v8 }
 0x99f   : > { %7557 = vrcp.f32 %v4078_v42 }
 0x9a0   : > { %v4072_v20 = vpop.xlane.xlu0 %4071 }
 0x9a1   : > { %7559 = vrcp.f32 %v4072_v20 }
 0x9a2   : > { %v4082_v49 = vpop.xlane.xlu1 %4081 }
 0x9a4   : > { %v4076_v40 = vpop.xlane.xlu0 %4075 }
 0x9a5   : > { %7561 = vrcp.f32 %v4076_v40 }
 0x9a6   : > { %7563 = vrcp.f32 %v4082_v49 }
 0xa14   : > { %v6928_v35 = vpop.f32.mrb[112].mxu0 }
 0xa15   : > { %v3755_v55 = vpop.f32.mrb[113].mxu0  ;;  %v3764_v52 = vadd.f32 %v6928_v35, %v3708_v45  ;;  %v7548_v35 = vpop.eup %7547 }
 0xa16   : > { %v6929_v41 = vpop.f32.mrb[114].mxu0  ;;  %v3756_v51 = vadd.f32 %v3755_v55, %v3708_v45  ;;  %v4080_v55 = vpop.xlane.xlu0 %4079 }
 0xa17   : > { %v3767_v59 = vadd.f32 %v6929_v41, %v3708_v45  ;;  %v3758_v26 = vpop.f32.mrb[115].mxu0  ;;  %v7550_v41 = vpop.eup %7549 }
 0xa18   : > { %v3759_v56 = vadd.f32 %v3758_v26, %v3708_v45  ;;  %v4110_v26 = vmul.f32 %v7548_v35, %v9430_v11 }
 0xa19   : > { %v4132_v43 = vpack.c.bf16 %v3767_v59, %v3764_v52  ;;  %v7552_v52 = vpop.eup %7551 }
 0xa1a   : > { %v4131_v23 = vpack.c.bf16 %v3759_v56, %v3756_v51  ;;  %v7554_v59 = vpop.eup %7553  ;;  %v4086_v51 = vpop.xlane.xlu1 %4085  ;;  %v4112_v56 = vmul.f32 %v7550_v41, %v9438_v25  ;;  %v4109_v32 = vmul.f32 %v7552_v52, %v9426_v14 }
 0xa1b   : > { %7565 = vrcp.f32 %v4086_v51  ;;  %v7556_v11 = vpop.eup %7555 }
 0xa1c   : > { %v6932_v27 = vpop.f32.mrb[116].mxu0  ;;  %6974 = vmatprep.subr.bf16.mxu0 %v4131_v23  ;;  %v4124_v22 = vpack.c.bf16 %v4110_v26, %v4109_v32  ;;  %7567 = vrcp.f32 %v4080_v55  ;;  %v4114_v14 = vmul.f32 %v7556_v11, %v9446_v21 }
 0xa1d   : > { %v3771_v30 = vpop.f32.mrb[117].mxu0  ;;  %6975 = vmatpush3.bf16.msra.mxu0 %v4131_v23  ;;  %v3780_v63 = vadd.f32 %v6932_v27, %v3708_v45  ;;  %v4111_v23 = vmul.f32 %v7554_v59, %v9434_v16 }
 0xa1e   : > { %v6933_v6 = vpop.f32.mrb[118].mxu0  ;;  %6976 = vmatprep.subr.bf16.mxu0 %v4132_v43  ;;  %v3772_v19 = vadd.f32 %v3771_v30, %v3708_v45  ;;  %v7558_v30 = vpop.eup %7557 }
 0xa1f   : > { %v3783_v44 = vadd.f32 %v6933_v6, %v3708_v45  ;;  %v3774_v9 = vpop.f32.mrb[119].mxu0  ;;  %v4125_v27 = vpack.c.bf16 %v4112_v56, %v4111_v23  ;;  %v7560_v6 = vpop.eup %7559 }
 0xa20   : > { %v3775_v62 = vadd.f32 %v3774_v9, %v3708_v45  ;;  %v7562_v25 = vpop.eup %7561  ;;  %v4090_v50 = vpop.xlane.xlu1 %4089 }
 0xa21   : > { %v4134_v0 = vpack.c.bf16 %v3783_v44, %v3780_v63  ;;  %6977 = vmatpush3.bf16.msra.mxu0 %v4132_v43  ;;  %v4084_v43 = vpop.xlane.xlu0 %4083  ;;  %v4116_v63 = vmul.f32 %v7558_v30, %v9454_v15  ;;  %v7272_v44 = vld [vmem:[%s10507_s3 + $0xc8] sm:$0xff]  }
 0xa22   : > { %v4133_v57 = vpack.c.bf16 %v3775_v62, %v3772_v19  ;;  %7569 = vrcp.f32 %v4084_v43  ;;  %v4113_v19 = vmul.f32 %v7560_v6, %v9442_v1  ;;  %v4115_v62 = vmul.f32 %v7562_v25, %v9450_v36  ;;  %v7273_v36 = vld [vmem:[%s10507_s3 + $0xd0] sm:$0xff]   ;;  %v9564_v6 = vld [vmem:[%s10508_s4] ss:$0 sm:$0xff] }
 0xa23   : > { %7571 = vrcp.f32 %v4090_v50  ;;  %v4329_v1 = vsel %vm917_vm0, %v7272_v44, 0 }
 0xa24   : > { %v6936_v38 = vpop.f32.mrb[120].mxu0  ;;  %6978 = vmatprep.subr.bf16.mxu0 %v4133_v57  ;;  %v4126_v46 = vpack.c.bf16 %v4114_v14, %v4113_v19 }
 0xa25   : > { %v3787_v7 = vpop.f32.mrb[121].mxu0  ;;  %6979 = vmatpush3.bf16.msra.mxu0 %v4133_v57  ;;  %v3796_v54 = vadd.f32 %v6936_v38, %v3708_v45  ;;  %v4088_v9 = vpop.xlane.xlu0 %4087  ;;  %v4127_v57 = vpack.c.bf16 %v4116_v63, %v4115_v62 }
 0xa26   : > { %v6937_v28 = vpop.f32.mrb[122].mxu0  ;;  %6980 = vmatprep.subr.bf16.mxu0 %v4134_v0  ;;  %v3788_v3 = vadd.f32 %v3787_v7, %v3708_v45  ;;  %7573 = vrcp.f32 %v4088_v9  ;;  %v7707_v9 = vld [vmem:[%s8138_s20] sm:$0xff] }
 0xa27   : > { %v3799_v58 = vadd.f32 %v6937_v28, %v3708_v45  ;;  %v3790_v5 = vpop.f32.mrb[123].mxu0 }
 0xa28   : > { %v3791_v17 = vadd.f32 %v3790_v5, %v3708_v45 }
 0xa29   : > { %v4136_v18 = vpack.c.bf16 %v3799_v58, %v3796_v54  ;;  %6981 = vmatpush3.bf16.msra.mxu0 %v4134_v0  ;;  %v7564_v0 = vpop.eup %7563 }
 0xa2a   : > { %v4135_v31 = vpack.c.bf16 %v3791_v17, %v3788_v3  ;;  %v7566_v21 = vpop.eup %7565  ;;  %v4118_v8 = vmul.f32 %v7564_v0, %v9460_v37  ;;  %v4332_v3 = vsel %vm917_vm0, %v7273_v36, 0  ;;  %v7274_v17 = vld [vmem:[%s10507_s3 + $0xd8] sm:$0xff]   ;;  %v7708_v0 = vld [vmem:[%s8138_s20 + $0x8] sm:$0xff] }
 0xa2b   : > { %v7568_v15 = vpop.eup %7567  ;;  %v4120_v7 = vmul.f32 %v7566_v21, %v9466_v29  ;;  %v7709_v21 = vld [vmem:[%s8138_s20 + $0x10] sm:$0xff] }
 0xa2c   : > { %v6940_v33 = vpop.f32.mrb[124].mxu0  ;;  %6982 = vmatprep.subr.bf16.mxu0 %v4135_v31  ;;  %v7570_v38 = vpop.eup %7569  ;;  %v4117_v28 = vmul.f32 %v7568_v15, %v9457_v53 }
 0xa2d   : > { %v3803_v24 = vpop.f32.mrb[125].mxu0  ;;  %6983 = vmatpush3.bf16.msra.mxu0 %v4135_v31  ;;  %v3812_v13 = vadd.f32 %v6940_v33, %v3708_v45  ;;  %v4119_v20 = vmul.f32 %v7570_v38, %v9463_v2  ;;  %v7572_v58 = vpop.eup %7571  ;;  %v7275_v31 = vld [vmem:[%s10507_s3 + $0xe0] sm:$0xff]   ;;  %v7277_v33 = vld [vmem:[%s10507_s3 + $0xf0] sm:$0xff]  }
 0xa2e   : > { %v6941_v60 = vpop.f32.mrb[126].mxu0  ;;  %6984 = vmatprep.subr.bf16.mxu0 %v4136_v18  ;;  %v3804_v48 = vadd.f32 %v3803_v24, %v3708_v45  ;;  %v4128_v54 = vpack.c.bf16 %v4118_v8, %v4117_v28  ;;  %v4122_v29 = vmul.f32 %v7572_v58, %v9472_v61  ;;  %v4338_v61 = vsel %vm917_vm0, %v7275_v31, 0  ;;  %v7278_v24 = vld [vmem:[%s10507_s3 + $0xf8] sm:$0xff]   ;;  %v7711_v58 = vld [vmem:[%s8138_s20 + $0x20] sm:$0xff] }
 0xa2f   : > { %v3815_v4 = vadd.f32 %v6941_v60, %v3708_v45  ;;  %v3806_v34 = vpop.f32.mrb[127].mxu0  ;;  %v4129_v5 = vpack.c.bf16 %v4120_v7, %v4119_v20  ;;  %v4344_v40 = vsel %vm917_vm0, %v7277_v33, 0  ;;  %v4347_v60 = vsel %vm917_vm0, %v7278_v24, 0  ;;  %v7710_v7 = vld [vmem:[%s8138_s20 + $0x18] sm:$0xff] }
 0xa30   : > { %v3807_v47 = vadd.f32 %v3806_v34, %v3708_v45  ;;  %v7271_v45 = vld [vmem:[%s10507_s3 + $0xc0] sm:$0xff]   ;;  %v7574_v37 = vpop.eup %7573 }
 0xa31   : > { %v4138_v10 = vpack.c.bf16 %v3815_v4, %v3812_v13  ;;  %6985 = vmatpush3.bf16.msra.mxu0 %v4136_v18  ;;  %v4326_v16 = vsel %vm917_vm0, %v7271_v45, 0  ;;  %v4121_v53 = vmul.f32 %v7574_v37, %v9469_v39  ;;  %v4335_v18 = vsel %vm917_vm0, %v7274_v17, 0  ;;  %v7276_v39 = vld [vmem:[%s10507_s3 + $0xe8] sm:$0xff]  }
 0xa32   : > { %v4137_v12 = vpack.c.bf16 %v3807_v47, %v3804_v48  ;;  %v4341_v42 = vsel %vm917_vm0, %v7276_v39, 0 }
 0xa33   : > { %v4130_v2 = vpack.c.bf16 %v4122_v29, %v4121_v53  ;;  %v7713_v53 = vld [vmem:[%s8138_s20 + $0x30] sm:$0xff] }
 0xa34   : > { %6986 = vmatprep.subr.bf16.mxu0 %v4137_v12 }
 0xa35   : > { %6987 = vmatpush3.bf16.msra.mxu0 %v4137_v12 }
 0xa36   : > { %6988 = vmatprep.subr.bf16.mxu0 %v4138_v10 }
 0xa39   : > { %6989 = vmatpush3.bf16.msra.mxu0 %v4138_v10 }
 0xa3a   : > { %7142 = vmatprep.subr.msk.bf16.mxu0 %vm917_vm0, %v7271_v45 }
 0xa3c   : > { %6991 = vmatmul.mubr.bf16.vlgmr.msra.gmra.mrb[128].mxu0 %v4124_v22 }
 0xa3d   : > { %6994 = vmatprep.mubr.bf16.mxu0 %v4125_v27 }
 0xa42   : > { %7007 = vmatpush3.bf16.xpose.msra.mxu0 %v4326_v16 }
 0xa43   : > { %7143 = vmatprep.subr.msk.bf16.mxu0 %vm917_vm0, %v7272_v44 }
 0xa44   : > { %6995 = vmatmul.mubr.bf16.gmra.mrb[132].mxu0 %v4126_v46 }
 0xa45   : > { %6998 = vmatprep.mubr.bf16.mxu0 %v4127_v57 }
 0xa4a   : > { %7009 = vmatpush3.bf16.xpose.msra.mxu0 %v4329_v1 }
 0xa4b   : > { %7144 = vmatprep.subr.msk.bf16.mxu0 %vm917_vm0, %v7273_v36 }
 0xa4c   : > { %6999 = vmatmul.mubr.bf16.gmra.mrb[136].mxu0 %v4128_v54 }
 0xa4d   : > { %7002 = vmatprep.mubr.bf16.mxu0 %v4129_v5 }
 0xa52   : > { %7011 = vmatpush3.bf16.xpose.msra.mxu0 %v4332_v3  ;;  %v7712_v3 = vld [vmem:[%s8138_s20 + $0x28] sm:$0xff] }
 0xa53   : > { %7145 = vmatprep.subr.msk.bf16.mxu0 %vm917_vm0, %v7274_v17 }
 0xa54   : > { %7003 = vmatmul.mubr.bf16.gmra.mrb[140].mxu0 %v4130_v2 }
 0xa5a   : > { %7013 = vmatpush3.bf16.xpose.msra.mxu0 %v4335_v18 }
 0xa5b   : > { %7146 = vmatprep.subr.msk.bf16.mxu0 %vm917_vm0, %v7275_v31 }
 0xa62   : > { %7015 = vmatpush3.bf16.xpose.msra.mxu0 %v4338_v61  ;;  %v7714_v61 = vld [vmem:[%s8138_s20 + $0x38] sm:$0xff] }
 0xa63   : > { %7147 = vmatprep.subr.msk.bf16.mxu0 %vm917_vm0, %v7276_v39 }
 0xa6a   : > { %7017 = vmatpush3.bf16.xpose.msra.mxu0 %v4341_v42 }
 0xa6b   : > { %7148 = vmatprep.subr.msk.bf16.mxu0 %vm917_vm0, %v7277_v33 }
 0xa72   : > { %7019 = vmatpush3.bf16.xpose.msra.mxu0 %v4344_v40 }
 0xa73   : > { %7149 = vmatprep.subr.msk.bf16.mxu0 %vm917_vm0, %v7278_v24 }
 0xa7a   : > { %7021 = vmatpush3.bf16.xpose.msra.mxu0 %v4347_v60  ;;  %v7715_v60 = vld [vmem:[%s8138_s20 + $0x40] sm:$0xff] }
 0xb0f   : > { %v6992_v13 = vpop.f32.mrb[128].mxu0 }
 0xb10   : > { %v4173_v4 = vpop.f32.mrb[129].mxu0 }
 0xb11   : > { %v6993_v34 = vpop.f32.mrb[130].mxu0 }
 0xb12   : > { %v4237_v48 = vpack.c.bf16 %v6993_v34, %v6992_v13  ;;  %v4176_v47 = vpop.f32.mrb[131].mxu0 }
 0xb13   : > { %v4236_v49 = vpack.c.bf16 %v4176_v47, %v4173_v4 }
 0xb15   : > { %7022 = vmatprep.mubr.msk.bf16.mxu0 %vm917_vm0, %v4236_v49  ;;  %v7717_v49 = vld [vmem:[%s8138_s20 + $0x50] sm:$0xff] }
 0xb16   : > { %7023 = vmatmul.mubr.msk.bf16.vlgmr.msra.gmra.mrb[80].mxu0 %vm917_vm0, %v4237_v48  ;;  %v7716_v48 = vld [vmem:[%s8138_s20 + $0x48] sm:$0xff] }
 0xb17   : > { %v6996_v10 = vpop.f32.mrb[132].mxu0 }
 0xb18   : > { %v4189_v12 = vpop.f32.mrb[133].mxu0 }
 0xb19   : > { %v6997_v35 = vpop.f32.mrb[134].mxu0 }
 0xb1a   : > { %v4239_v55 = vpack.c.bf16 %v6997_v35, %v6996_v10  ;;  %v4192_v41 = vpop.f32.mrb[135].mxu0 }
 0xb1b   : > { %v4238_v52 = vpack.c.bf16 %v4192_v41, %v4189_v12 }
 0xb1d   : > { %7026 = vmatprep.mubr.msk.bf16.mxu0 %vm917_vm0, %v4238_v52 }
 0xb1e   : > { %7027 = vmatmul.mubr.msk.bf16.gmra.mrb[84].mxu0 %vm917_vm0, %v4239_v55  ;;  %v7718_v55 = vld [vmem:[%s8138_s20 + $0x58] sm:$0xff] }
 0xb1f   : > { %v7000_v59 = vpop.f32.mrb[136].mxu0 }
 0xb20   : > { %v4205_v26 = vpop.f32.mrb[137].mxu0 }
 0xb21   : > { %v7001_v45 = vpop.f32.mrb[138].mxu0 }
 0xb22   : > { %v4241_v51 = vpack.c.bf16 %v7001_v45, %v7000_v59  ;;  %v4208_v56 = vpop.f32.mrb[139].mxu0 }
 0xb23   : > { %v4240_v32 = vpack.c.bf16 %v4208_v56, %v4205_v26 }
 0xb25   : > { %7030 = vmatprep.mubr.msk.bf16.mxu0 %vm917_vm0, %v4240_v32 }
 0xb26   : > { %7031 = vmatmul.mubr.msk.bf16.gmra.mrb[88].mxu0 %vm917_vm0, %v4241_v51  ;;  %v7719_v51 = vld [vmem:[%s8138_s20 + $0x60] sm:$0xff] }
 0xb27   : > { %v7004_v43 = vpop.f32.mrb[140].mxu0 }
 0xb28   : > { %v4221_v23 = vpop.f32.mrb[141].mxu0 }
 0xb29   : > { %v7005_v22 = vpop.f32.mrb[142].mxu0 }
 0xb2a   : > { %v4243_v11 = vpack.c.bf16 %v7005_v22, %v7004_v43  ;;  %v4224_v27 = vpop.f32.mrb[143].mxu0 }
 0xb2b   : > { %v4242_v30 = vpack.c.bf16 %v4224_v27, %v4221_v23  ;;  %v7720_v23 = vld [vmem:[%s8138_s20 + $0x68] sm:$0xff] }
 0xb2d   : > { %7034 = vmatprep.mubr.msk.bf16.mxu0 %vm917_vm0, %v4242_v30  ;;  %v7722_v30 = vld [vmem:[%s8138_s20 + $0x78] sm:$0xff] }
 0xb2e   : > { %7035 = vmatmul.mubr.msk.bf16.gmra.mrb[92].mxu0 %vm917_vm0, %v4243_v11  ;;  %v7721_v11 = vld [vmem:[%s8138_s20 + $0x70] sm:$0xff]  ;;  %s5756_s20 = sshll.u32 %s10393_s25, 4  ;;  %s10458_s20 = int_to_ptr.vmem [resolvable:$true] %s5756_s20 }
 0xb2f   : > { %s7809_s21 = scalar_lea.vmem %s10458_s20, 2048  ;;  %p7816_p4 = scmp.lt.s32.totalorder %s10458_s20, %s7814_s13 }
 0xb30   : > { %p7810_p8 = scmp.ne.s32.totalorder %s10458_s20, %s7809_s21 }
 0xb32   : > { %p7811_p10 = pnand %p7810_p8, %p10678_p9 }
 0xb34   : > { %p7812_p1 = pneg %p7811_p10 }
 0xbe9   : > { %v7024_v25 = vpop.f32.mrb[80].mxu0 }
 0xbea   : > { %v4383_v50 = vpop.f32.mrb[81].mxu0  ;;  %v4471_v44 = vadd.f32 %v7024_v25, %v9564_v6 }
 0xbeb   : > { %v4469_v14 = vadd.f32 %v9564_v6, %v4383_v50  ;;  %v7025_v63 = vpop.f32.mrb[82].mxu0  ;;  %v7280_v50 = vld [vmem:[%s10509_s5] sm:$0xff]  }
 0xbec   : > { %v4386_v16 = vpop.f32.mrb[83].mxu0  ;;  %v4472_v46 = vadd.f32 %v7025_v63, %v9564_v6  ;;  %v9578_v15 = vadd.f32 %v7709_v21, %v4471_v44  ;;  %v7282_v63 = vld [vmem:[%s10509_s5 + $0x8] sm:$0xff]   ;;  %v7284_v44 = vld [vmem:[%s10509_s5 + $0x10] sm:$0xff]  }
 0xbed   : > { %v9569_v19 = vadd.f32 %v7707_v9, %v4469_v14  ;;  %v4470_v62 = vadd.f32 %v9564_v6, %v4386_v16  ;;  %v7281_v14 = vld [vmem:[%s10509_s5 + $0x48] sm:$0xff]   ;;  %v7283_v16 = vld [vmem:[%s10509_s5 + $0x50] sm:$0xff]   ;;  %v7285_v9 = vld [vmem:[%s10509_s5 + $0x58] sm:$0xff]  }
 0xbee   : > { %v9582_v1 = vadd.f32 %v7710_v7, %v4472_v46  ;;  %v7287_v46 = vld [vmem:[%s10509_s5 + $0x60] sm:$0xff]  }
 0xbef   : > { %v9574_v57 = vadd.f32 %v7708_v0, %v4470_v62  ;;  %4503 = vadd.xlane.f32.xlu0 %v9569_v19  ;;  %v7286_v62 = vld [vmem:[%s10509_s5 + $0x18] sm:$0xff]   ;;  %v7288_v0 = vld [vmem:[%s10509_s5 + $0x20] sm:$0xff]  }
 0xbf1   : > { %4505 = vadd.xlane.f32.xlu1 %v9574_v57  ;;  %v7028_v38 = vpop.f32.mrb[84].mxu0 }
 0xbf2   : > { %v4399_v8 = vpop.f32.mrb[85].mxu0  ;;  %v4475_v54 = vadd.f32 %v7028_v38, %v9564_v6 }
 0xbf3   : > { %v4473_v36 = vadd.f32 %v9564_v6, %v4399_v8  ;;  %4507 = vadd.xlane.f32.xlu0 %v9578_v15  ;;  %v7029_v28 = vpop.f32.mrb[86].mxu0 }
 0xbf4   : > { %v4402_v20 = vpop.f32.mrb[87].mxu0  ;;  %v4476_v29 = vadd.f32 %v7029_v28, %v9564_v6  ;;  %v9598_v2 = vadd.f32 %v7713_v53, %v4475_v54 }
 0xbf5   : > { %v9588_v5 = vadd.f32 %v7711_v58, %v4473_v36  ;;  %v4474_v37 = vadd.f32 %v9564_v6, %v4402_v20  ;;  %4509 = vadd.xlane.f32.xlu1 %v9582_v1 }
 0xbf6   : > { %v9602_v39 = vadd.f32 %v7714_v61, %v4476_v29 }
 0xbf7   : > { %v9594_v17 = vadd.f32 %v7712_v3, %v4474_v37  ;;  %4511 = vadd.xlane.f32.xlu0 %v9588_v5 }
 0xbf9   : > { %4513 = vadd.xlane.f32.xlu1 %v9594_v17  ;;  %v7032_v18 = vpop.f32.mrb[88].mxu0 }
 0xbfa   : > { %v4415_v31 = vpop.f32.mrb[89].mxu0  ;;  %v4479_v24 = vadd.f32 %v7032_v18, %v9564_v6 }
 0xbfb   : > { %v4477_v42 = vadd.f32 %v9564_v6, %v4415_v31  ;;  %4515 = vadd.xlane.f32.xlu0 %v9598_v2  ;;  %v7033_v33 = vpop.f32.mrb[90].mxu0 }
 0xbfc   : > { %v4418_v40 = vpop.f32.mrb[91].mxu0  ;;  %v4480_v34 = vadd.f32 %v7033_v33, %v9564_v6  ;;  %v9618_v10 = vadd.f32 %v7717_v49, %v4479_v24 }
 0xbfd   : > { %v9608_v13 = vadd.f32 %v7715_v60, %v4477_v42  ;;  %v4478_v4 = vadd.f32 %v9564_v6, %v4418_v40  ;;  %4517 = vadd.xlane.f32.xlu1 %v9602_v39 }
 0xbfe   : > { %v9622_v41 = vadd.f32 %v7718_v55, %v4480_v34 }
 0xbff   : > { %v9614_v47 = vadd.f32 %v7716_v48, %v4478_v4  ;;  %4519 = vadd.xlane.f32.xlu0 %v9608_v13 }
 0xc01   : > { %4521 = vadd.xlane.f32.xlu1 %v9614_v47  ;;  %v7036_v12 = vpop.f32.mrb[92].mxu0 }
 0xc02   : > { %v4431_v35 = vpop.f32.mrb[93].mxu0  ;;  %v4483_v45 = vadd.f32 %v7036_v12, %v9564_v6 }
 0xc03   : > { %v4481_v52 = vadd.f32 %v9564_v6, %v4431_v35  ;;  %4523 = vadd.xlane.f32.xlu0 %v9618_v10  ;;  %v7037_v59 = vpop.f32.mrb[94].mxu0 }
 0xc04   : > { %v4434_v26 = vpop.f32.mrb[95].mxu0  ;;  %v4484_v43 = vadd.f32 %v7037_v59, %v9564_v6  ;;  %v9638_v27 = vadd.f32 %v7721_v11, %v4483_v45 }
 0xc05   : > { %v9628_v56 = vadd.f32 %v7719_v51, %v4481_v52  ;;  %v4482_v32 = vadd.f32 %v9564_v6, %v4434_v26  ;;  %4525 = vadd.xlane.f32.xlu1 %v9622_v41  ;;  %v7279_v6 = vld [vmem:[%s10509_s5 + $0x40] sm:$0xff]  }
 0xc06   : > { %v9642_v25 = vadd.f32 %v7722_v30, %v4484_v43  ;;  %6382 = vmatprep.subr.bf16.mxu1 %v7279_v6 }
 0xc07   : > { %v9634_v22 = vadd.f32 %v7720_v23, %v4482_v32  ;;  %4527 = vadd.xlane.f32.xlu0 %v9628_v56  ;;  %6383 = vmatpush3.bf16.xpose.msra.mxu1 %v7280_v50 }
 0xc08   : > { %6384 = vmatprep.subr.bf16.mxu1 %v7281_v14 }
 0xc09   : > { %4529 = vadd.xlane.f32.xlu1 %v9634_v22 }
 0xc0b   : > { %4531 = vadd.xlane.f32.xlu0 %v9638_v27 }
 0xc0d   : > { %4533 = vadd.xlane.f32.xlu1 %v9642_v25 }
 0xc0f   : > { %6385 = vmatpush3.bf16.xpose.msra.mxu1 %v7282_v63 }
 0xc10   : > { %6386 = vmatprep.subr.bf16.mxu1 %v7283_v16 }
 0xc17   : > { %6387 = vmatpush3.bf16.xpose.msra.mxu1 %v7284_v44 }
 0xc18   : > { %6388 = vmatprep.subr.bf16.mxu1 %v7285_v9 }
 0xc1f   : > { %6389 = vmatpush3.bf16.xpose.msra.mxu1 %v7286_v62 }
 0xc20   : > { %6390 = vmatprep.subr.bf16.mxu1 %v7287_v46 }
 0xc27   : > { %6391 = vmatpush3.bf16.xpose.msra.mxu1 %v7288_v0 }
 0xc7c   : > { %v4504_v21 = vpop.xlane.xlu0 %4503 }
 0xc7d   : > { %v4536_v38 = vmul.f32 0.0078125, %v4504_v21 }
 0xc7e   : > { %v4506_v8 = vpop.xlane.xlu1 %4505 }
 0xc7f   : > { %v9677_v7 = vsub.f32 %v9569_v19, %v4536_v38  ;;  %v4537_v36 = vmul.f32 0.0078125, %v4506_v8 }
 0xc80   : > { %v4508_v28 = vpop.xlane.xlu0 %4507 }
 0xc81   : > { %v9680_v20 = vsub.f32 %v9574_v57, %v4537_v36  ;;  %v4538_v54 = vmul.f32 0.0078125, %v4508_v28  ;;  %v4568_v58 = vmul.f32 %v9677_v7, %v9677_v7 }
 0xc82   : > { %v4510_v37 = vpop.xlane.xlu1 %4509 }
 0xc83   : > { %v9685_v29 = vsub.f32 %v9578_v15, %v4538_v54  ;;  %v4539_v3 = vmul.f32 0.0078125, %v4510_v37  ;;  %4584 = vadd.xlane.f32.xlu0 %v4568_v58  ;;  %v4569_v53 = vmul.f32 %v9680_v20, %v9680_v20  ;;  %v7293_v54 = vld [vmem:[%s10509_s5 + $0x78] sm:$0xff]  }
 0xc84   : > { %v4512_v19 = vpop.xlane.xlu0 %4511  ;;  %v7294_v58 = vld [vmem:[%s10509_s5 + $0x38] sm:$0xff]  }
 0xc85   : > { %v9690_v18 = vsub.f32 %v9582_v1, %v4539_v3  ;;  %v4540_v31 = vmul.f32 0.0078125, %v4512_v19  ;;  %4586 = vadd.xlane.f32.xlu1 %v4569_v53  ;;  %v4570_v57 = vmul.f32 %v9685_v29, %v9685_v29  ;;  %v7297_v37 = vld [vmem:[#allocation7 + $0x4] ss:$8 sps:$4 sm:$0xff]   ;;  %v7300_v3 = vld [vmem:[#allocation7 + $0x14] ss:$8 sps:$4 sm:$0xff]  }
 0xc86   : > { %v4514_v61 = vpop.xlane.xlu1 %4513  ;;  %5392 = vmatprep.subr.bf16.mxu0 %v7297_v37  ;;  %v7298_v53 = vld [vmem:[#allocation7 + $0x10] ss:$8 sps:$4 sm:$0xff]   ;;  %v7303_v19 = vld [vmem:[#allocation7 + $0x24] ss:$8 sps:$4 sm:$0xff]  }
 0xc87   : > { %v9695_v42 = vsub.f32 %v9588_v5, %v4540_v31  ;;  %v4541_v15 = vmul.f32 0.0078125, %v4514_v61  ;;  %4588 = vadd.xlane.f32.xlu0 %v4570_v57  ;;  %v4571_v33 = vmul.f32 %v9690_v18, %v9690_v18  ;;  %v7301_v31 = vld [vmem:[#allocation7 + $0x20] ss:$8 sps:$4 sm:$0xff]   ;;  %v7306_v57 = vld [vmem:[#allocation7 + $0x34] ss:$8 sps:$4 sm:$0xff]  }
 0xc88   : > { %v4516_v40 = vpop.xlane.xlu0 %4515  ;;  %v7304_v61 = vld [vmem:[#allocation7 + $0x30] ss:$8 sps:$4 sm:$0xff]  }
 0xc89   : > { %v9700_v24 = vsub.f32 %v9594_v17, %v4541_v15  ;;  %v4542_v1 = vmul.f32 0.0078125, %v4516_v40  ;;  %4590 = vadd.xlane.f32.xlu1 %v4571_v33  ;;  %v4572_v60 = vmul.f32 %v9695_v42, %v9695_v42 }
 0xc8a   : > { %v4518_v4 = vpop.xlane.xlu1 %4517 }
 0xc8b   : > { %v9705_v34 = vsub.f32 %v9598_v2, %v4542_v1  ;;  %v4543_v5 = vmul.f32 0.0078125, %v4518_v4  ;;  %4592 = vadd.xlane.f32.xlu0 %v4572_v60  ;;  %v4573_v48 = vmul.f32 %v9700_v24, %v9700_v24 }
 0xc8c   : > { %v4520_v49 = vpop.xlane.xlu0 %4519 }
 0xc8d   : > { %v9710_v12 = vsub.f32 %v9602_v39, %v4543_v5  ;;  %v4544_v17 = vmul.f32 0.0078125, %v4520_v49  ;;  %4594 = vadd.xlane.f32.xlu1 %v4573_v48  ;;  %v4574_v35 = vmul.f32 %v9705_v34, %v9705_v34 }
 0xc8e   : > { %v4522_v55 = vpop.xlane.xlu1 %4521 }
 0xc8f   : > { %v9715_v52 = vsub.f32 %v9608_v13, %v4544_v17  ;;  %v4545_v2 = vmul.f32 0.0078125, %v4522_v55  ;;  %4596 = vadd.xlane.f32.xlu0 %v4574_v35  ;;  %v4575_v59 = vmul.f32 %v9710_v12, %v9710_v12  ;;  %v7289_v13 = vld [vmem:[%s10509_s5 + $0x68] sm:$0xff]  }
 0xc90   : > { %v4524_v26 = vpop.xlane.xlu0 %4523  ;;  %6392 = vmatprep.subr.bf16.mxu1 %v7289_v13 }
 0xc91   : > { %v9720_v45 = vsub.f32 %v9614_v47, %v4545_v2  ;;  %v4546_v39 = vmul.f32 0.0078125, %v4524_v26  ;;  %4598 = vadd.xlane.f32.xlu1 %v4575_v59  ;;  %v4576_v51 = vmul.f32 %v9715_v52, %v9715_v52  ;;  %v7290_v47 = vld [vmem:[%s10509_s5 + $0x28] sm:$0xff]  }
 0xc92   : > { %v4526_v32 = vpop.xlane.xlu1 %4525  ;;  %6393 = vmatpush3.bf16.xpose.msra.mxu1 %v7290_v47 }
 0xc93   : > { %v9728_v43 = vsub.f32 %v9618_v10, %v4546_v39  ;;  %v4547_v23 = vmul.f32 0.0078125, %v4526_v32  ;;  %4600 = vadd.xlane.f32.xlu0 %v4576_v51  ;;  %v4577_v11 = vmul.f32 %v9720_v45, %v9720_v45 }
 0xc94   : > { %v4528_v30 = vpop.xlane.xlu0 %4527 }
 0xc95   : > { %v9736_v6 = vsub.f32 %v9622_v41, %v4547_v23  ;;  %v4548_v50 = vmul.f32 0.0078125, %v4528_v30  ;;  %4602 = vadd.xlane.f32.xlu1 %v4577_v11  ;;  %v4578_v10 = vmul.f32 %v9728_v43, %v9728_v43 }
 0xc96   : > { %v4530_v14 = vpop.xlane.xlu1 %4529 }
 0xc97   : > { %v9741_v63 = vsub.f32 %v9628_v56, %v4548_v50  ;;  %v4549_v16 = vmul.f32 0.0078125, %v4530_v14  ;;  %4604 = vadd.xlane.f32.xlu0 %v4578_v10  ;;  %v4579_v44 = vmul.f32 %v9736_v6, %v9736_v6  ;;  %v7291_v56 = vld [vmem:[%s10509_s5 + $0x70] sm:$0xff]   ;;  %v9777_v10 = vld [vmem:[%s10513_s9] ss:$0 sm:$0xff] }
 0xc98   : > { %v4532_v9 = vpop.xlane.xlu0 %4531  ;;  %6394 = vmatprep.subr.bf16.mxu1 %v7291_v56 }
 0xc99   : > { %v9746_v62 = vsub.f32 %v9634_v22, %v4549_v16  ;;  %v4550_v41 = vmul.f32 0.0078125, %v4532_v9  ;;  %4606 = vadd.xlane.f32.xlu1 %v4579_v44  ;;  %v4580_v46 = vmul.f32 %v9741_v63, %v9741_v63  ;;  %v7292_v22 = vld [vmem:[%s10509_s5 + $0x30] sm:$0xff]  }
 0xc9a   : > { %v4534_v0 = vpop.xlane.xlu1 %4533  ;;  %6395 = vmatpush3.bf16.xpose.msra.mxu1 %v7292_v22  ;;  %v9785_v22 = vld [vmem:[%s10514_s10] ss:$0 sm:$0xff] }
 0xc9b   : > { %v9754_v21 = vsub.f32 %v9638_v27, %v4550_v41  ;;  %v4551_v38 = vmul.f32 0.0078125, %v4534_v0  ;;  %4608 = vadd.xlane.f32.xlu0 %v4580_v46  ;;  %v4581_v8 = vmul.f32 %v9746_v62, %v9746_v62  ;;  %6396 = vmatprep.subr.bf16.mxu1 %v7293_v54 }
 0xc9d   : > { %v9762_v36 = vsub.f32 %v9642_v25, %v4551_v38  ;;  %4610 = vadd.xlane.f32.xlu1 %v4581_v8  ;;  %v4582_v28 = vmul.f32 %v9754_v21, %v9754_v21  ;;  %v7295_v25 = vld [vmem:[#allocation7] ss:$8 sps:$4 sm:$0xff]  }
 0xc9e   : > { %5393 = vmatpush1.bf16.xpose.msra.mxu0 %v7295_v25 }
 0xc9f   : > { %4612 = vadd.xlane.f32.xlu0 %v4582_v28  ;;  %v4583_v27 = vmul.f32 %v9762_v36, %v9762_v36  ;;  %5394 = vmatprep.subr.bf16.mxu0 %v7300_v3 }
 0xca1   : > { %4614 = vadd.xlane.f32.xlu1 %v4583_v27 }
 0xca2   : > { %6397 = vmatpush3.bf16.xpose.msra.mxu1 %v7294_v58 }
 0xca6   : > { %5395 = vmatpush1.bf16.xpose.msra.mxu0 %v7298_v53 }
 0xca7   : > { %5396 = vmatprep.subr.bf16.mxu0 %v7303_v19 }
 0xcae   : > { %5397 = vmatpush1.bf16.xpose.msra.mxu0 %v7301_v31 }
 0xcaf   : > { %5398 = vmatprep.subr.bf16.mxu0 %v7306_v57 }
 0xcb6   : > { %5399 = vmatpush1.bf16.xpose.msra.mxu0 %v7304_v61 }
 0xd10   : > { %v4585_v15 = vpop.xlane.xlu0 %4584 }
 0xd11   : > { %v4616_v33 = vmul.f32 0.0078125, %v4585_v15 }
 0xd12   : > { %v4587_v40 = vpop.xlane.xlu1 %4586 }
 0xd13   : > { %v4632_v1 = vadd.f32 1e-05, %v4616_v33  ;;  %v4617_v60 = vmul.f32 0.0078125, %v4587_v40 }
 0xd14   : > { %v4589_v4 = vpop.xlane.xlu0 %4588 }
 0xd15   : > { %7575 = vrsqrt.f32 %v4632_v1  ;;  %v4633_v5 = vadd.f32 1e-05, %v4617_v60  ;;  %v4618_v48 = vmul.f32 0.0078125, %v4589_v4 }
 0xd16   : > { %v4591_v49 = vpop.xlane.xlu1 %4590 }
 0xd17   : > { %7577 = vrsqrt.f32 %v4633_v5  ;;  %v4634_v17 = vadd.f32 1e-05, %v4618_v48  ;;  %v4619_v35 = vmul.f32 0.0078125, %v4591_v49 }
 0xd18   : > { %v4593_v55 = vpop.xlane.xlu0 %4592 }
 0xd19   : > { %7579 = vrsqrt.f32 %v4634_v17  ;;  %v4635_v2 = vadd.f32 1e-05, %v4619_v35  ;;  %v4620_v59 = vmul.f32 0.0078125, %v4593_v55 }
 0xd1a   : > { %v4595_v26 = vpop.xlane.xlu1 %4594 }
 0xd1b   : > { %7581 = vrsqrt.f32 %v4635_v2  ;;  %v4636_v39 = vadd.f32 1e-05, %v4620_v59  ;;  %v4621_v51 = vmul.f32 0.0078125, %v4595_v26 }
 0xd1c   : > { %v4597_v32 = vpop.xlane.xlu0 %4596 }
 0xd1d   : > { %7583 = vrsqrt.f32 %v4636_v39  ;;  %v4637_v13 = vadd.f32 1e-05, %v4621_v51  ;;  %v4622_v23 = vmul.f32 0.0078125, %v4597_v32 }
 0xd1e   : > { %v4599_v11 = vpop.xlane.xlu1 %4598 }
 0xd1f   : > { %v7576_v47 = vpop.eup %7575  ;;  %7585 = vrsqrt.f32 %v4637_v13  ;;  %v4638_v30 = vadd.f32 1e-05, %v4622_v23  ;;  %v4623_v50 = vmul.f32 0.0078125, %v4599_v11 }
 0xd20   : > { %v4601_v14 = vpop.xlane.xlu0 %4600  ;;  %v4664_v16 = vmul.f32 %v7576_v47, %v9677_v7 }
 0xd21   : > { %v7578_v44 = vpop.eup %7577  ;;  %v4639_v9 = vadd.f32 1e-05, %v4623_v50  ;;  %7587 = vrsqrt.f32 %v4638_v30  ;;  %v4624_v38 = vmul.f32 0.0078125, %v4601_v14 }
 0xd22   : > { %v4603_v41 = vpop.xlane.xlu1 %4602  ;;  %v4665_v46 = vmul.f32 %v7578_v44, %v9680_v20  ;;  %v4686_v0 = vmul.f32 %v9777_v10, %v4664_v16 }
 0xd23   : > { %v7580_v56 = vpop.eup %7579  ;;  %7589 = vrsqrt.f32 %v4639_v9  ;;  %v4625_v8 = vmul.f32 0.0078125, %v4603_v41  ;;  %v4640_v19 = vadd.f32 1e-05, %v4624_v38 }
 0xd24   : > { %v4687_v28 = vmul.f32 %v9777_v10, %v4665_v46  ;;  %v4666_v7 = vmul.f32 %v7580_v56, %v9685_v29  ;;  %v9790_v20 = vadd.f32 %v9785_v22, %v4686_v0  ;;  %v4605_v31 = vpop.xlane.xlu0 %4604 }
 0xd25   : > { %v7582_v27 = vpop.eup %7581  ;;  %v4641_v54 = vadd.f32 1e-05, %v4625_v8  ;;  %v4626_v60 = vmul.f32 0.0078125, %v4605_v31 }
 0xd26   : > { %v4607_v58 = vpop.xlane.xlu1 %4606  ;;  %v9793_v25 = vadd.f32 %v9785_v22, %v4687_v28  ;;  %v4667_v37 = vmul.f32 %v7582_v27, %v9690_v18  ;;  %v4688_v3 = vmul.f32 %v9777_v10, %v4666_v7 }
 0xd27   : > { %v7584_v53 = vpop.eup %7583  ;;  %7591 = vrsqrt.f32 %v4641_v54  ;;  %v4627_v33 = vmul.f32 0.0078125, %v4607_v58  ;;  %v4642_v2 = vadd.f32 1e-05, %v4626_v60 }
 0xd28   : > { %v4724_v57 = vpack.c.bf16 %v9793_v25, %v9790_v20  ;;  %v4689_v29 = vmul.f32 %v9777_v10, %v4667_v37  ;;  %v4668_v61 = vmul.f32 %v7584_v53, %v9695_v42  ;;  %v9802_v40 = vadd.f32 %v9785_v22, %v4688_v3  ;;  %v4609_v59 = vpop.xlane.xlu0 %4608 }
 0xd29   : > { %v7586_v15 = vpop.eup %7585  ;;  %7593 = vrsqrt.f32 %v4640_v19  ;;  %v4643_v17 = vadd.f32 1e-05, %v4627_v33  ;;  %v4628_v11 = vmul.f32 0.0078125, %v4609_v59  ;;  %v7312_v59 = vld [vmem:[#allocation7 + $0x54] ss:$8 sps:$4 sm:$0xff]  }
 0xd2a   : > { %6398 = vmatprep.mubr.bf16.mxu1 %v4724_v57  ;;  %v9805_v18 = vadd.f32 %v9785_v22, %v4689_v29  ;;  %v4669_v1 = vmul.f32 %v7586_v15, %v9700_v24  ;;  %v4690_v42 = vmul.f32 %v9777_v10, %v4668_v61  ;;  %v4611_v35 = vpop.xlane.xlu1 %4610 }
 0xd2b   : > { %6399 = vmatmul.mubr.bf16.vlgmr.msra.gmra.mrb[192].mxu1 %v4724_v57  ;;  %v7588_v4 = vpop.eup %7587  ;;  %7595 = vrsqrt.f32 %v4643_v17  ;;  %v4629_v51 = vmul.f32 0.0078125, %v4611_v35  ;;  %v4644_v16 = vadd.f32 1e-05, %v4628_v11 }
 0xd2c   : > { %v4725_v5 = vpack.c.bf16 %v9805_v18, %v9802_v40  ;;  %v4691_v48 = vmul.f32 %v9777_v10, %v4669_v1  ;;  %v9817_v26 = vadd.f32 %v9785_v22, %v4690_v42  ;;  %v4670_v39 = vmul.f32 %v7588_v4, %v9705_v34  ;;  %v4613_v44 = vpop.xlane.xlu0 %4612 }
 0xd2d   : > { %v7590_v49 = vpop.eup %7589  ;;  %7597 = vrsqrt.f32 %v4642_v2  ;;  %v4645_v30 = vadd.f32 1e-05, %v4629_v51  ;;  %v4630_v8 = vmul.f32 0.0078125, %v4613_v44  ;;  %v7307_v2 = vld [vmem:[#allocation7 + $0x40] ss:$8 sps:$4 sm:$0xff]  }
 0xd2e   : > { %6400 = vmatprep.mubr.bf16.mxu1 %v4725_v5  ;;  %v9813_v55 = vadd.f32 %v9785_v22, %v4691_v48  ;;  %v4671_v24 = vmul.f32 %v7590_v49, %v9710_v12  ;;  %v4692_v12 = vmul.f32 %v9777_v10, %v4670_v39  ;;  %v4615_v50 = vpop.xlane.xlu1 %4614  ;;  %v7310_v39 = vld [vmem:[#allocation7 + $0x50] ss:$8 sps:$4 sm:$0xff]   ;;  %v7313_v51 = vld [vmem:[#allocation7 + $0x60] ss:$8 sps:$4 sm:$0xff]  }
 0xd2f   : > { %7599 = vrsqrt.f32 %v4645_v30  ;;  %v4631_v46 = vmul.f32 0.0078125, %v4615_v50  ;;  %v4646_v54 = vadd.f32 1e-05, %v4630_v8 }
 0xd30   : > { %v4726_v32 = vpack.c.bf16 %v9813_v55, %v9817_v26  ;;  %v4693_v13 = vmul.f32 %v9777_v10, %v4671_v24  ;;  %v9829_v9 = vadd.f32 %v9785_v22, %v4692_v12  ;;  %7601 = vrsqrt.f32 %v4644_v16  ;;  %v10665_v12 = vld [vmem:[#allocation40_spill] sm:$0xff] }
 0xd31   : > { %v7592_v23 = vpop.eup %7591  ;;  %v4647_v7 = vadd.f32 1e-05, %v4631_v46 }
 0xd32   : > { %v9825_v14 = vadd.f32 %v9785_v22, %v4693_v13  ;;  %v4673_v34 = vmul.f32 %v7592_v23, %v9720_v45  ;;  %v4764_v13 = vld [vmem:[%s10510_s6] sm:$0x3]  ;;  %v10664_v23 = vld [vmem:[#allocation25_spill] sm:$0xff] }
 0xd33   : > { %6401 = vmatmul.mubr.bf16.gmra.mrb[196].mxu1 %v4725_v5  ;;  %v7594_v47 = vpop.eup %7593  ;;  %7603 = vrsqrt.f32 %v4647_v7  ;;  %v9884_v11 = vrot.slane %v4764_v13, %v10664_v23 }
 0xd34   : > { %6402 = vmatprep.mubr.bf16.mxu1 %v4726_v32  ;;  %v4672_v41 = vmul.f32 %v7594_v47, %v9715_v52  ;;  %v4727_v0 = vpack.c.bf16 %v9825_v14, %v9829_v9  ;;  %v4695_v56 = vmul.f32 %v9777_v10, %v4673_v34  ;;  %7605 = vrsqrt.f32 %v4646_v54 }
 0xd35   : > { %v7596_v38 = vpop.eup %7595  ;;  %v9887_v47 = vrot.slane %v4764_v13, %v10665_v12 }
 0xd36   : > { %v4694_v45 = vmul.f32 %v9777_v10, %v4672_v41  ;;  %v9837_v27 = vadd.f32 %v9785_v22, %v4695_v56  ;;  %v4675_v52 = vmul.f32 %v7596_v38, %v9736_v6 }
 0xd37   : > { %v7598_v28 = vpop.eup %7597 }
 0xd38   : > { %10657 = vst [vmem:[#allocation27_spill] sm:$0xff] %v9837_v27  ;;  %v9841_v58 = vadd.f32 %v9785_v22, %v4694_v45  ;;  %v4674_v37 = vmul.f32 %v7598_v28, %v9728_v43  ;;  %v4697_v53 = vmul.f32 %v9777_v10, %v4675_v52 }
 0xd39   : > { %v7600_v19 = vpop.eup %7599 }
 0xd3a   : > { %v4728_v3 = vpack.c.bf16 %v9837_v27, %v9841_v58  ;;  %v4696_v31 = vmul.f32 %v9777_v10, %v4674_v37  ;;  %v7602_v57 = vpop.eup %7601  ;;  %v9849_v6 = vadd.f32 %v9785_v22, %v4697_v53  ;;  %v4677_v29 = vmul.f32 %v7600_v19, %v9746_v62 }
 0xd3b   : > { %6403 = vmatmul.mubr.bf16.gmra.mrb[200].mxu1 %v4726_v32  ;;  %v4676_v61 = vmul.f32 %v7602_v57, %v9741_v63  ;;  %v7316_v32 = vld [vmem:[#allocation7 + $0x70] ss:$8 sps:$4 sm:$0xff]  }
 0xd3c   : > { %6404 = vmatprep.mubr.bf16.mxu1 %v4727_v0  ;;  %10658 = vst [vmem:[#allocation26_spill] sm:$0xff] %v9849_v6  ;;  %v9853_v43 = vadd.f32 %v9785_v22, %v4696_v31  ;;  %v4699_v33 = vmul.f32 %v9777_v10, %v4677_v29 }
 0xd3d   : > { %v7604_v1 = vpop.eup %7603  ;;  %v4698_v60 = vmul.f32 %v9777_v10, %v4676_v61 }
 0xd3e   : > { %10659 = vst [vmem:[#allocation31_spill] sm:$0xff] %v9853_v43  ;;  %v4729_v15 = vpack.c.bf16 %v9849_v6, %v9853_v43  ;;  %v7606_v4 = vpop.eup %7605  ;;  %v9861_v5 = vadd.f32 %v9785_v22, %v4699_v33  ;;  %v4679_v62 = vmul.f32 %v7604_v1, %v9762_v36 }
 0xd3f   : > { %v9865_v42 = vadd.f32 %v9785_v22, %v4698_v60  ;;  %v4678_v63 = vmul.f32 %v7606_v4, %v9754_v21  ;;  %v7309_v21 = vld [vmem:[#allocation7 + $0x44] ss:$8 sps:$4 sm:$0xff]  }
 0xd40   : > { %10660 = vst [vmem:[#allocation29_spill] sm:$0xff] %v9861_v5  ;;  %v4701_v49 = vmul.f32 %v9777_v10, %v4679_v62  ;;  %5400 = vmatprep.subr.bf16.mxu0 %v7309_v21 }
 0xd41   : > { %10661 = vst [vmem:[#allocation30_spill] sm:$0xff] %v9865_v42  ;;  %v4730_v48 = vpack.c.bf16 %v9861_v5, %v9865_v42  ;;  %v4700_v17 = vmul.f32 %v9777_v10, %v4678_v63  ;;  %5401 = vmatpush1.bf16.xpose.msra.mxu0 %v7307_v2  ;;  %v7315_v10 = vld [vmem:[#allocation7 + $0x64] ss:$8 sps:$4 sm:$0xff]  }
 0xd42   : > { %v9873_v35 = vadd.f32 %v9785_v22, %v4701_v49  ;;  %5402 = vmatprep.subr.bf16.mxu0 %v7312_v59 }
 0xd43   : > { %6405 = vmatmul.mubr.bf16.gmra.mrb[204].mxu1 %v4727_v0  ;;  %v9876_v24 = vadd.f32 %v9785_v22, %v4700_v17  ;;  %v7318_v22 = vld [vmem:[#allocation7 + $0x74] ss:$8 sps:$4 sm:$0xff]  }
 0xd44   : > { %6406 = vmatprep.mubr.bf16.mxu1 %v4728_v3  ;;  %10662 = vst [vmem:[#allocation28_spill] sm:$0xff] %v9873_v35 }
 0xd45   : > { %10663 = vst [vmem:[#allocation35_spill] sm:$0xff] %v9876_v24  ;;  %v4731_v36 = vpack.c.bf16 %v9873_v35, %v9876_v24 }
 0xd49   : > { %5403 = vmatpush1.bf16.xpose.msra.mxu0 %v7310_v39 }
 0xd4a   : > { %5404 = vmatprep.subr.bf16.mxu0 %v7315_v10 }
 0xd4b   : > { %6407 = vmatmul.mubr.bf16.gmra.mrb[208].mxu1 %v4728_v3 }
 0xd4c   : > { %6408 = vmatprep.mubr.bf16.mxu1 %v4729_v15 }
 0xd51   : > { %5405 = vmatpush1.bf16.xpose.msra.mxu0 %v7313_v51 }
 0xd52   : > { %5406 = vmatprep.subr.bf16.mxu0 %v7318_v22 }
 0xd53   : > { %6409 = vmatmul.mubr.bf16.gmra.mrb[212].mxu1 %v4729_v15 }
 0xd54   : > { %6410 = vmatprep.mubr.bf16.mxu1 %v4730_v48 }
 0xd59   : > { %5407 = vmatpush1.bf16.xpose.msra.mxu0 %v7316_v32 }
 0xd5b   : > { %6411 = vmatmul.mubr.bf16.gmra.mrb[216].mxu1 %v4730_v48 }
 0xd5c   : > { %6412 = vmatprep.mubr.bf16.mxu1 %v4731_v36 }
 0xd63   : > { %6413 = vmatmul.mubr.bf16.gmra.mrb[220].mxu1 %v4731_v36 }
 0xdfe   : > { %v4906_v30 = vpop.f32.mrb[192].mxu1 }
 0xdff   : > { %v9890_v50 = vadd.f32 %v4906_v30, %v9884_v11  ;;  %v4908_v34 = vpop.f32.mrb[193].mxu1 }
 0xe00   : > { %v9893_v16 = vadd.f32 %v4908_v34, %v9887_v47  ;;  %v4910_v44 = vpop.f32.mrb[194].mxu1 }
 0xe01   : > { %v4985_v41 = vmul.f32 %v9890_v50, %v9890_v50  ;;  %v9898_v46 = vadd.f32 %v4910_v44, %v9884_v11  ;;  %v4912_v0 = vpop.f32.mrb[195].mxu1 }
 0xe02   : > { %v4986_v56 = vmul.f32 %v9893_v16, %v9893_v16  ;;  %v9903_v38 = vadd.f32 %v4912_v0, %v9887_v47 }
 0xe03   : > { %v5017_v8 = vmul.f32 %v4985_v41, %v9890_v50  ;;  %v4987_v45 = vmul.f32 %v9898_v46, %v9898_v46 }
 0xe04   : > { %v5018_v28 = vmul.f32 %v4986_v56, %v9893_v16  ;;  %v4988_v7 = vmul.f32 %v9903_v38, %v9903_v38 }
 0xe05   : > { %v5049_v52 = vmul.f32 0.044715, %v5017_v8  ;;  %v5019_v54 = vmul.f32 %v4987_v45, %v9898_v46 }
 0xe06   : > { %v5050_v37 = vmul.f32 0.044715, %v5018_v28  ;;  %v5020_v3 = vmul.f32 %v4988_v7, %v9903_v38  ;;  %v4916_v53 = vpop.f32.mrb[196].mxu1 }
 0xe07   : > { %v5081_v19 = vadd.f32 %v5049_v52, %v9890_v50  ;;  %v5051_v31 = vmul.f32 0.044715, %v5019_v54  ;;  %v9915_v57 = vadd.f32 %v4916_v53, %v9884_v11  ;;  %v4918_v29 = vpop.f32.mrb[197].mxu1 }
 0xe08   : > { %v5082_v61 = vadd.f32 %v5050_v37, %v9893_v16  ;;  %v5052_v15 = vmul.f32 0.044715, %v5020_v3  ;;  %v9919_v33 = vadd.f32 %v4918_v29, %v9887_v47  ;;  %v4920_v1 = vpop.f32.mrb[198].mxu1 }
 0xe09   : > { %v5113_v60 = vmul.f32 0.7978846, %v5081_v19  ;;  %v5083_v4 = vadd.f32 %v5051_v31, %v9898_v46  ;;  %v4989_v62 = vmul.f32 %v9915_v57, %v9915_v57  ;;  %v9925_v63 = vadd.f32 %v4920_v1, %v9884_v11  ;;  %v4922_v48 = vpop.f32.mrb[199].mxu1 }
 0xe0a   : > { %v5114_v49 = vmul.f32 0.7978846, %v5082_v61  ;;  %v5084_v17 = vadd.f32 %v5052_v15, %v9903_v38  ;;  %v4990_v36 = vmul.f32 %v9919_v33, %v9919_v33  ;;  %v9931_v21 = vadd.f32 %v4922_v48, %v9887_v47 }
 0xe0b   : > { %7607 = vtanh.f32 %v5113_v60  ;;  %v5115_v2 = vmul.f32 0.7978846, %v5083_v4  ;;  %v5021_v59 = vmul.f32 %v4989_v62, %v9915_v57  ;;  %v4991_v39 = vmul.f32 %v9925_v63, %v9925_v63 }
 0xe0c   : > { %7609 = vtanh.f32 %v5114_v49  ;;  %v5116_v10 = vmul.f32 0.7978846, %v5084_v17  ;;  %v5022_v51 = vmul.f32 %v4990_v36, %v9919_v33  ;;  %v4992_v22 = vmul.f32 %v9931_v21, %v9931_v21 }
 0xe0d   : > { %7611 = vtanh.f32 %v5115_v2  ;;  %v5053_v32 = vmul.f32 0.044715, %v5021_v59  ;;  %v5023_v13 = vmul.f32 %v4991_v39, %v9925_v63 }
 0xe0e   : > { %v5054_v23 = vmul.f32 0.044715, %v5022_v51  ;;  %v5024_v12 = vmul.f32 %v4992_v22, %v9931_v21  ;;  %v4926_v30 = vpop.f32.mrb[200].mxu1  ;;  %7613 = vtanh.f32 %v5116_v10 }
 0xe0f   : > { %v5085_v34 = vadd.f32 %v5053_v32, %v9915_v57  ;;  %v5055_v44 = vmul.f32 0.044715, %v5023_v13  ;;  %v9943_v41 = vadd.f32 %v4926_v30, %v9884_v11  ;;  %v4928_v0 = vpop.f32.mrb[201].mxu1 }
 0xe10   : > { %v5086_v56 = vadd.f32 %v5054_v23, %v9919_v33  ;;  %v5056_v8 = vmul.f32 0.044715, %v5024_v12  ;;  %v9947_v45 = vadd.f32 %v4928_v0, %v9887_v47  ;;  %v4930_v28 = vpop.f32.mrb[202].mxu1 }
 0xe11   : > { %v5117_v7 = vmul.f32 0.7978846, %v5085_v34  ;;  %v5087_v52 = vadd.f32 %v5055_v44, %v9925_v63  ;;  %v4993_v54 = vmul.f32 %v9943_v41, %v9943_v41  ;;  %v9953_v37 = vadd.f32 %v4930_v28, %v9884_v11  ;;  %v4932_v3 = vpop.f32.mrb[203].mxu1 }
 0xe12   : > { %v5118_v53 = vmul.f32 0.7978846, %v5086_v56  ;;  %v5088_v19 = vadd.f32 %v5056_v8, %v9931_v21  ;;  %v4994_v31 = vmul.f32 %v9947_v45, %v9947_v45  ;;  %v9959_v29 = vadd.f32 %v4932_v3, %v9887_v47 }
 0xe13   : > { %7615 = vtanh.f32 %v5117_v7  ;;  %v5119_v61 = vmul.f32 0.7978846, %v5087_v52  ;;  %v5025_v15 = vmul.f32 %v4993_v54, %v9943_v41  ;;  %v4995_v1 = vmul.f32 %v9953_v37, %v9953_v37 }
 0xe14   : > { %7617 = vtanh.f32 %v5118_v53  ;;  %v5120_v60 = vmul.f32 0.7978846, %v5088_v19  ;;  %v5026_v4 = vmul.f32 %v4994_v31, %v9947_v45  ;;  %v4996_v62 = vmul.f32 %v9959_v29, %v9959_v29 }
 0xe15   : > { %v7608_v48 = vpop.eup %7607  ;;  %7619 = vtanh.f32 %v5119_v61  ;;  %v5057_v49 = vmul.f32 0.044715, %v5025_v15  ;;  %v5027_v17 = vmul.f32 %v4995_v1, %v9953_v37 }
 0xe16   : > { %v7610_v36 = vpop.eup %7609  ;;  %v5177_v2 = vadd.f32 1.0, %v7608_v48  ;;  %7621 = vtanh.f32 %v5120_v60  ;;  %v5058_v59 = vmul.f32 0.044715, %v5026_v4  ;;  %v5028_v39 = vmul.f32 %v4996_v62, %v9959_v29  ;;  %v4936_v10 = vpop.f32.mrb[204].mxu1 }
 0xe17   : > { %v7612_v51 = vpop.eup %7611  ;;  %v5089_v22 = vadd.f32 %v5057_v49, %v9943_v41  ;;  %v5059_v32 = vmul.f32 0.044715, %v5027_v17  ;;  %v9971_v13 = vadd.f32 %v4936_v10, %v9884_v11  ;;  %v4938_v23 = vpop.f32.mrb[205].mxu1  ;;  %v5178_v12 = vadd.f32 1.0, %v7610_v36 }
 0xe18   : > { %v5209_v30 = vmul.f32 0.5, %v5177_v2  ;;  %v5179_v34 = vadd.f32 1.0, %v7612_v51  ;;  %v5090_v44 = vadd.f32 %v5058_v59, %v9947_v45  ;;  %v5060_v0 = vmul.f32 0.044715, %v5028_v39  ;;  %v4940_v56 = vpop.f32.mrb[206].mxu1  ;;  %v7614_v3 = vpop.eup %7613 }
 0xe19   : > { %v5121_v8 = vmul.f32 0.7978846, %v5089_v22  ;;  %v5091_v28 = vadd.f32 %v5059_v32, %v9953_v37  ;;  %v4997_v7 = vmul.f32 %v9971_v13, %v9971_v13  ;;  %v9978_v52 = vadd.f32 %v4938_v23, %v9887_v47  ;;  %v4942_v54 = vpop.f32.mrb[207].mxu1 }
 0xe1a   : > { %v9981_v53 = vmul.f32 %v5209_v30, %v9890_v50  ;;  %v5211_v19 = vmul.f32 0.5, %v5179_v34  ;;  %v5122_v31 = vmul.f32 0.7978846, %v5090_v44  ;;  %v5092_v61 = vadd.f32 %v5060_v0, %v9959_v29 }
 0xe1b   : > { %7623 = vtanh.f32 %v5121_v8  ;;  %v5123_v15 = vmul.f32 0.7978846, %v5091_v28  ;;  %v5029_v1 = vmul.f32 %v4997_v7, %v9971_v13  ;;  %v4998_v60 = vmul.f32 %v9978_v52, %v9978_v52 }
 0xe1c   : > { %v9988_v4 = vmul.f32 %v5211_v19, %v9898_v46  ;;  %7625 = vtanh.f32 %v5122_v31  ;;  %v5124_v62 = vmul.f32 0.7978846, %v5092_v61  ;;  %v9991_v48 = vadd.f32 %v4940_v56, %v9884_v11 }
 0xe1d   : > { %v9993_v50 = vpop.eup %7615  ;;  %7627 = vtanh.f32 %v5123_v15  ;;  %v5061_v49 = vmul.f32 0.044715, %v5029_v1  ;;  %v5030_v17 = vmul.f32 %v4998_v60, %v9978_v52  ;;  %v9997_v36 = vadd.f32 %v4942_v54, %v9887_v47 }
 0xe1e   : > { %v9999_v2 = vpop.eup %7617  ;;  %7629 = vtanh.f32 %v5124_v62  ;;  %v4999_v59 = vmul.f32 %v9991_v48, %v9991_v48  ;;  %v4946_v39 = vpop.f32.mrb[208].mxu1  ;;  %v5180_v10 = vadd.f32 1.0, %v7614_v3  ;;  %v5210_v28 = vmul.f32 0.5, %v5178_v12 }
 0xe1f   : > { %v10005_v51 = vpop.eup %7619  ;;  %v5093_v22 = vadd.f32 %v5061_v49, %v9971_v13  ;;  %v5062_v32 = vmul.f32 0.044715, %v5030_v17  ;;  %v5000_v23 = vmul.f32 %v9997_v36, %v9997_v36  ;;  %v10011_v30 = vadd.f32 %v4946_v39, %v9884_v11  ;;  %v4948_v34 = vpop.f32.mrb[209].mxu1 }
 0xe20   : > { %v10013_v44 = vpop.eup %7621  ;;  %v5031_v0 = vmul.f32 %v4999_v59, %v9991_v48  ;;  %v10017_v56 = vadd.f32 %v4948_v34, %v9887_v47  ;;  %v4950_v8 = vpop.f32.mrb[210].mxu1  ;;  %v5212_v7 = vmul.f32 0.5, %v5180_v10 }
 0xe21   : > { %v5125_v54 = vmul.f32 0.7978846, %v5093_v22  ;;  %v5094_v3 = vadd.f32 %v5062_v32, %v9978_v52  ;;  %v5032_v19 = vmul.f32 %v5000_v23, %v9997_v36  ;;  %v5001_v31 = vmul.f32 %v10011_v30, %v10011_v30  ;;  %v4952_v61 = vpop.f32.mrb[211].mxu1 }
 0xe22   : > { %v5063_v15 = vmul.f32 0.044715, %v5031_v0  ;;  %v5002_v1 = vmul.f32 %v10017_v56, %v10017_v56  ;;  %v10026_v60 = vadd.f32 %v4950_v8, %v9884_v11  ;;  %v10029_v62 = vadd.f32 %v4952_v61, %v9887_v47 }
 0xe23   : > { %7631 = vtanh.f32 %v5125_v54  ;;  %v5126_v12 = vmul.f32 0.7978846, %v5094_v3  ;;  %v5064_v49 = vmul.f32 0.044715, %v5032_v19  ;;  %v5033_v17 = vmul.f32 %v5001_v31, %v10011_v30 }
 0xe24   : > { %v5095_v59 = vadd.f32 %v5063_v15, %v9991_v48  ;;  %v5034_v39 = vmul.f32 %v5002_v1, %v10017_v56  ;;  %v5003_v10 = vmul.f32 %v10026_v60, %v10026_v60  ;;  %v5004_v22 = vmul.f32 %v10029_v62, %v10029_v62 }
 0xe25   : > { %v10038_v32 = vpop.eup %7623  ;;  %7633 = vtanh.f32 %v5126_v12  ;;  %v5096_v23 = vadd.f32 %v5064_v49, %v9997_v36  ;;  %v5065_v34 = vmul.f32 0.044715, %v5033_v17  ;;  %v5242_v0 = vmul.f32 %v5210_v28, %v9893_v16 }
 0xe26   : > { %v10042_v8 = vpop.eup %7625  ;;  %v5127_v54 = vmul.f32 0.7978846, %v5095_v59  ;;  %v5066_v3 = vmul.f32 0.044715, %v5034_v39  ;;  %v5035_v19 = vmul.f32 %v5003_v10, %v10026_v60  ;;  %v5036_v31 = vmul.f32 %v5004_v22, %v10029_v62  ;;  %v4956_v61 = vpop.f32.mrb[212].mxu1 }
 0xe27   : > { %v10046_v15 = vpop.eup %7627  ;;  %v5128_v1 = vmul.f32 0.7978846, %v5096_v23  ;;  %v5097_v46 = vadd.f32 %v5065_v34, %v10011_v30  ;;  %v5244_v12 = vmul.f32 %v5212_v7, %v9903_v38  ;;  %v10051_v49 = vadd.f32 %v4956_v61, %v9884_v11  ;;  %v4958_v16 = vpop.f32.mrb[213].mxu1 }
 0xe28   : > { %v10053_v28 = vpop.eup %7629  ;;  %7635 = vtanh.f32 %v5127_v54  ;;  %v5098_v17 = vadd.f32 %v5066_v3, %v10017_v56  ;;  %v5067_v59 = vmul.f32 0.044715, %v5035_v19  ;;  %v5068_v39 = vmul.f32 0.044715, %v5036_v31  ;;  %v4960_v10 = vpop.f32.mrb[214].mxu1 }
 0xe29   : > { %7637 = vtanh.f32 %v5128_v1  ;;  %v5129_v22 = vmul.f32 0.7978846, %v5097_v46  ;;  %v5274_v35 = vpack.c.bf16 %v5244_v12, %v5242_v0  ;;  %v5005_v23 = vmul.f32 %v10051_v49, %v10051_v49  ;;  %v4962_v34 = vpop.f32.mrb[215].mxu1 }
 0xe2a   : > { %v5130_v38 = vmul.f32 0.7978846, %v5098_v17  ;;  %v5099_v7 = vadd.f32 %v5067_v59, %v10026_v60  ;;  %v5100_v61 = vadd.f32 %v5068_v39, %v10029_v62  ;;  %v10061_v24 = vadd.f32 %v4958_v16, %v9887_v47 }
 0xe2b   : > { %7639 = vtanh.f32 %v5129_v22  ;;  %5424 = vmatprep.mubr.bf16.mxu0 %v5274_v35  ;;  %v5037_v54 = vmul.f32 %v5005_v23, %v10051_v49  ;;  %v10065_v3 = vadd.f32 %v4960_v10, %v9884_v11  ;;  %v10068_v46 = vadd.f32 %v4962_v34, %v9887_v47 }
 0xe2c   : > { %7641 = vtanh.f32 %v5130_v38  ;;  %v5131_v0 = vmul.f32 0.7978846, %v5099_v7  ;;  %v5132_v19 = vmul.f32 0.7978846, %v5100_v61  ;;  %v10666_v31 = vpack.c.bf16 %v9988_v4, %v9981_v53 }
 0xe2d   : > { %v5006_v1 = vmul.f32 %v10061_v24, %v10061_v24  ;;  %v10075_v12 = vpop.eup %7631  ;;  %v5069_v35 = vmul.f32 0.044715, %v5037_v54  ;;  %v5007_v16 = vmul.f32 %v10065_v3, %v10065_v3  ;;  %v5008_v17 = vmul.f32 %v10068_v46, %v10068_v46 }
 0xe2e   : > { %5425 = vmatmul.mubr.bf16.vlgmr.msra.gmra.mrb[144].mxu0 %v10666_v31  ;;  %v5182_v59 = vadd.f32 1.0, %v9999_v2  ;;  %7643 = vtanh.f32 %v5131_v0  ;;  %v5184_v53 = vadd.f32 1.0, %v10013_v44  ;;  %v5181_v4 = vadd.f32 1.0, %v9993_v50  ;;  %v4966_v10 = vpop.f32.mrb[216].mxu1 }
 0xe2f   : > { %v5038_v39 = vmul.f32 %v5006_v1, %v10061_v24  ;;  %v10085_v22 = vpop.eup %7633  ;;  %7645 = vtanh.f32 %v5132_v19  ;;  %v5101_v23 = vadd.f32 %v5069_v35, %v10051_v49  ;;  %v5039_v34 = vmul.f32 %v5007_v16, %v10065_v3  ;;  %v4968_v7 = vpop.f32.mrb[217].mxu1 }
 0xe30   : > { %v5040_v38 = vmul.f32 %v5008_v17, %v10068_v46  ;;  %v5214_v2 = vmul.f32 0.5, %v5182_v59  ;;  %v5216_v54 = vmul.f32 0.5, %v5184_v53  ;;  %v5183_v0 = vadd.f32 1.0, %v10005_v51  ;;  %v4970_v31 = vpop.f32.mrb[218].mxu1 }
 0xe31   : > { %v5070_v61 = vmul.f32 0.044715, %v5038_v39  ;;  %v5133_v44 = vmul.f32 0.7978846, %v5101_v23  ;;  %v5071_v1 = vmul.f32 0.044715, %v5039_v34  ;;  %v10092_v5 = vadd.f32 %v4966_v10, %v9884_v11 }
 0xe32   : > { %v5072_v50 = vmul.f32 0.044715, %v5040_v38  ;;  %v10094_v19 = vpop.eup %7635  ;;  %v5246_v16 = vmul.f32 %v5214_v2, %v9919_v33  ;;  %v5248_v17 = vmul.f32 %v5216_v54, %v9931_v21  ;;  %v5213_v39 = vmul.f32 0.5, %v5181_v4  ;;  %v4972_v59 = vpop.f32.mrb[219].mxu1 }
 0xe33   : > { %v5102_v35 = vadd.f32 %v5070_v61, %v10061_v24  ;;  %v10099_v53 = vpop.eup %7637  ;;  %7647 = vtanh.f32 %v5133_v44  ;;  %v5103_v51 = vadd.f32 %v5071_v1, %v10065_v3  ;;  %v5215_v34 = vmul.f32 0.5, %v5183_v0 }
 0xe34   : > { %v5104_v23 = vadd.f32 %v5072_v50, %v10068_v46  ;;  %v5276_v38 = vpack.c.bf16 %v5248_v17, %v5246_v16  ;;  %v5245_v42 = vmul.f32 %v5213_v39, %v9915_v57  ;;  %v5009_v61 = vmul.f32 %v10092_v5, %v10092_v5 }
 0xe35   : > { %v5134_v10 = vmul.f32 0.7978846, %v5102_v35  ;;  %v10106_v33 = vpop.eup %7639  ;;  %v5135_v21 = vmul.f32 0.7978846, %v5103_v51  ;;  %v5247_v2 = vmul.f32 %v5215_v34, %v9925_v63  ;;  %v10110_v54 = vadd.f32 %v4968_v7, %v9887_v47 }
 0xe36   : > { %v5136_v4 = vmul.f32 0.7978846, %v5104_v23  ;;  %v10112_v44 = vpop.eup %7641  ;;  %5432 = vmatprep.mubr.bf16.mxu0 %v5276_v38  ;;  %v5041_v0 = vmul.f32 %v5009_v61, %v10092_v5  ;;  %v10116_v57 = vadd.f32 %v4970_v31, %v9884_v11  ;;  %v10119_v1 = vadd.f32 %v4972_v59, %v9887_v47  ;;  %v4976_v50 = vpop.f32.mrb[220].mxu1 }
 0xe37   : > { %7649 = vtanh.f32 %v5134_v10  ;;  %v5275_v35 = vpack.c.bf16 %v5247_v2, %v5245_v42  ;;  %v5010_v63 = vmul.f32 %v10110_v54, %v10110_v54  ;;  %v5186_v7 = vadd.f32 1.0, %v10042_v8  ;;  %v4978_v16 = vpop.f32.mrb[221].mxu1 }
 0xe38   : > { %7651 = vtanh.f32 %v5135_v21  ;;  %v10124_v17 = vpop.eup %7643  ;;  %v5073_v39 = vmul.f32 0.044715, %v5041_v0  ;;  %v5011_v31 = vmul.f32 %v10116_v57, %v10116_v57  ;;  %v5012_v59 = vmul.f32 %v10119_v1, %v10119_v1  ;;  %v4980_v51 = vpop.f32.mrb[222].mxu1 }
 0xe39   : > { %7653 = vtanh.f32 %v5136_v4  ;;  %v10130_v23 = vpop.eup %7645  ;;  %5433 = vmatmul.mubr.bf16.gmra.mrb[148].mxu0 %v5275_v35  ;;  %v5042_v42 = vmul.f32 %v5010_v63, %v10110_v54  ;;  %v5188_v34 = vadd.f32 1.0, %v10053_v28  ;;  %v5218_v8 = vmul.f32 0.5, %v5186_v7  ;;  %v4982_v38 = vpop.f32.mrb[223].mxu1 }
 0xe3a   : > { %v5185_v10 = vadd.f32 1.0, %v10038_v32  ;;  %v5105_v61 = vadd.f32 %v5073_v39, %v10092_v5  ;;  %v5043_v21 = vmul.f32 %v5011_v31, %v10116_v57  ;;  %v5044_v4 = vmul.f32 %v5012_v59, %v10119_v1 }
 0xe3b   : > { %v5187_v2 = vadd.f32 1.0, %v10046_v15  ;;  %v5074_v0 = vmul.f32 0.044715, %v5042_v42  ;;  %v5220_v6 = vmul.f32 0.5, %v5188_v34  ;;  %v5250_v35 = vmul.f32 %v5218_v8, %v9947_v45 }
 0xe3c   : > { %v5217_v43 = vmul.f32 0.5, %v5185_v10  ;;  %v5137_v63 = vmul.f32 0.7978846, %v5105_v61  ;;  %v5075_v27 = vmul.f32 0.044715, %v5043_v21  ;;  %v10141_v7 = vadd.f32 %v4976_v50, %v9884_v11 }
 0xe3d   : > { %v5076_v28 = vmul.f32 0.044715, %v5044_v4  ;;  %v10143_v32 = vpop.eup %7647  ;;  %v5106_v39 = vadd.f32 %v5074_v0, %v10110_v54  ;;  %v5252_v31 = vmul.f32 %v5220_v6, %v9959_v29  ;;  %v5219_v59 = vmul.f32 0.5, %v5187_v2 }
 0xe3e   : > { %v5249_v15 = vmul.f32 %v5217_v43, %v9943_v41  ;;  %7655 = vtanh.f32 %v5137_v63  ;;  %v5107_v42 = vadd.f32 %v5075_v27, %v10116_v57  ;;  %v5013_v34 = vmul.f32 %v10141_v7, %v10141_v7 }
 0xe3f   : > { %v5108_v45 = vadd.f32 %v5076_v28, %v10119_v1  ;;  %v5138_v8 = vmul.f32 0.7978846, %v5106_v39  ;;  %v5278_v50 = vpack.c.bf16 %v5252_v31, %v5250_v35  ;;  %v5251_v10 = vmul.f32 %v5219_v59, %v9953_v37 }
 0xe40   : > { %v10154_v61 = vadd.f32 %v4978_v16, %v9887_v47  ;;  %v5139_v6 = vmul.f32 0.7978846, %v5107_v42  ;;  %v5045_v43 = vmul.f32 %v5013_v34, %v10141_v7  ;;  %v10160_v27 = vadd.f32 %v4980_v51, %v9884_v11 }
 0xe41   : > { %v10156_v21 = vpop.eup %7649  ;;  %v5140_v29 = vmul.f32 0.7978846, %v5108_v45  ;;  %7657 = vtanh.f32 %v5138_v8  ;;  %5440 = vmatprep.mubr.bf16.mxu0 %v5278_v50  ;;  %v5277_v4 = vpack.c.bf16 %v5251_v10, %v5249_v15  ;;  %v10167_v16 = vadd.f32 %v4982_v38, %v9887_v47 }
 0xe42   : > { %v10162_v41 = vpop.eup %7651  ;;  %v5014_v37 = vmul.f32 %v10154_v61, %v10154_v61  ;;  %7659 = vtanh.f32 %v5139_v6  ;;  %v5077_v0 = vmul.f32 0.044715, %v5045_v43  ;;  %v5015_v35 = vmul.f32 %v10160_v27, %v10160_v27 }
 0xe43   : > { %v7654_v2 = vpop.eup %7653  ;;  %v5190_v11 = vadd.f32 1.0, %v10085_v22  ;;  %7661 = vtanh.f32 %v5140_v29  ;;  %5441 = vmatmul.mubr.bf16.gmra.mrb[152].mxu0 %v5277_v4  ;;  %v5016_v63 = vmul.f32 %v10167_v16, %v10167_v16  ;;  %v5192_v28 = vadd.f32 1.0, %v10099_v53 }
 0xe44   : > { %v5046_v51 = vmul.f32 %v5014_v37, %v10154_v61  ;;  %v5109_v47 = vadd.f32 %v5077_v0, %v10141_v7  ;;  %v5047_v38 = vmul.f32 %v5015_v35, %v10160_v27  ;;  %v5189_v31 = vadd.f32 1.0, %v10075_v12 }
 0xe45   : > { %v5222_v39 = vmul.f32 0.5, %v5190_v11  ;;  %v5048_v15 = vmul.f32 %v5016_v63, %v10167_v16  ;;  %v5224_v22 = vmul.f32 0.5, %v5192_v28  ;;  %v5191_v42 = vadd.f32 1.0, %v10094_v19 }
 0xe46   : > { %v5078_v59 = vmul.f32 0.044715, %v5046_v51  ;;  %v5141_v45 = vmul.f32 0.7978846, %v5109_v47  ;;  %v5079_v34 = vmul.f32 0.044715, %v5047_v38 }
 0xe47   : > { %v5254_v8 = vmul.f32 %v5222_v39, %v9978_v52  ;;  %v5221_v50 = vmul.f32 0.5, %v5189_v31  ;;  %v5080_v10 = vmul.f32 0.044715, %v5048_v15  ;;  %v5256_v6 = vmul.f32 %v5224_v22, %v9997_v36 }
 0xe48   : > { %v5110_v53 = vadd.f32 %v5078_v59, %v10154_v61  ;;  %v5223_v29 = vmul.f32 0.5, %v5191_v42  ;;  %v7656_v43 = vpop.eup %7655  ;;  %7663 = vtanh.f32 %v5141_v45  ;;  %v5111_v12 = vadd.f32 %v5079_v34, %v10160_v27 }
 0xe49   : > { %v5253_v4 = vmul.f32 %v5221_v50, %v9971_v13  ;;  %v5194_v37 = vadd.f32 1.0, %v10112_v44  ;;  %v5112_v0 = vadd.f32 %v5080_v10, %v10167_v16  ;;  %v5280_v35 = vpack.c.bf16 %v5256_v6, %v5254_v8 }
 0xe4a   : > { %v5142_v19 = vmul.f32 0.7978846, %v5110_v53  ;;  %v5255_v52 = vmul.f32 %v5223_v29, %v9991_v48  ;;  %v5143_v11 = vmul.f32 0.7978846, %v5111_v12  ;;  %v5196_v51 = vadd.f32 1.0, %v10130_v23 }
 0xe4b   : > { %v5226_v63 = vmul.f32 0.5, %v5194_v37  ;;  %v5193_v36 = vadd.f32 1.0, %v10106_v33  ;;  %v7658_v28 = vpop.eup %7657  ;;  %v5144_v47 = vmul.f32 0.7978846, %v5112_v0  ;;  %5448 = vmatprep.mubr.bf16.mxu0 %v5280_v35  ;;  %v5195_v13 = vadd.f32 1.0, %v10124_v17 }
 0xe4c   : > { %7665 = vtanh.f32 %v5142_v19  ;;  %v5279_v38 = vpack.c.bf16 %v5255_v52, %v5253_v4  ;;  %v7660_v44 = vpop.eup %7659  ;;  %v5228_v39 = vmul.f32 0.5, %v5196_v51  ;;  %v5198_v15 = vadd.f32 1.0, %v10156_v21 }
 0xe4d   : > { %7667 = vtanh.f32 %v5143_v11  ;;  %v5258_v31 = vmul.f32 %v5226_v63, %v10017_v56  ;;  %v5225_v59 = vmul.f32 0.5, %v5193_v36  ;;  %v7662_v48 = vpop.eup %7661  ;;  %v5227_v23 = vmul.f32 0.5, %v5195_v13 }
 0xe4e   : > { %7669 = vtanh.f32 %v5144_v47  ;;  %5449 = vmatmul.mubr.bf16.gmra.mrb[156].mxu0 %v5279_v38  ;;  %v5200_v33 = vadd.f32 1.0, %v7654_v2  ;;  %v5260_v22 = vmul.f32 %v5228_v39, %v10029_v62  ;;  %v5197_v45 = vadd.f32 1.0, %v10143_v32 }
 0xe4f   : > { %v5257_v42 = vmul.f32 %v5225_v59, %v10011_v30  ;;  %v5199_v17 = vadd.f32 1.0, %v10162_v41  ;;  %v5259_v34 = vmul.f32 %v5227_v23, %v10026_v60  ;;  %v5230_v8 = vmul.f32 0.5, %v5198_v15 }
 0xe50   : > { %v5232_v56 = vmul.f32 0.5, %v5200_v33  ;;  %v5202_v50 = vadd.f32 1.0, %v7658_v28  ;;  %v5282_v53 = vpack.c.bf16 %v5260_v22, %v5258_v31  ;;  %v5229_v10 = vmul.f32 0.5, %v5197_v45 }
 0xe51   : > { %v5231_v6 = vmul.f32 0.5, %v5199_v17  ;;  %v5204_v29 = vadd.f32 1.0, %v7662_v48  ;;  %v5281_v12 = vpack.c.bf16 %v5259_v34, %v5257_v42  ;;  %v5262_v21 = vmul.f32 %v5230_v8, %v10061_v24 }
 0xe52   : > { %v5264_v62 = vmul.f32 %v5232_v56, %v10068_v46  ;;  %v5234_v2 = vmul.f32 0.5, %v5202_v50  ;;  %v7664_v30 = vpop.eup %7663  ;;  %5456 = vmatprep.mubr.bf16.mxu0 %v5282_v53  ;;  %v5261_v32 = vmul.f32 %v5229_v10, %v10051_v49  ;;  %v5201_v4 = vadd.f32 1.0, %v7656_v43 }
 0xe53   : > { %v5263_v41 = vmul.f32 %v5231_v6, %v10065_v3  ;;  %v5236_v60 = vmul.f32 0.5, %v5204_v29  ;;  %v5203_v19 = vadd.f32 1.0, %v7660_v44  ;;  %v5205_v0 = vadd.f32 1.0, %v7664_v30 }
 0xe54   : > { %v5284_v37 = vpack.c.bf16 %v5264_v62, %v5262_v21  ;;  %v5266_v52 = vmul.f32 %v5234_v2, %v10110_v54  ;;  %v5233_v24 = vmul.f32 0.5, %v5201_v4 }
 0xe55   : > { %v5283_v35 = vpack.c.bf16 %v5263_v41, %v5261_v32  ;;  %v5268_v11 = vmul.f32 %v5236_v60, %v10119_v1  ;;  %v5235_v46 = vmul.f32 0.5, %v5203_v19  ;;  %v5237_v38 = vmul.f32 0.5, %v5205_v0 }
 0xe56   : > { %v7666_v51 = vpop.eup %7665  ;;  %5457 = vmatmul.mubr.bf16.gmra.mrb[160].mxu0 %v5281_v12  ;;  %v5265_v3 = vmul.f32 %v5233_v24, %v10092_v5  ;;  %v10667_v24 = vld [vmem:[#allocation27_spill] sm:$0xff] }
 0xe57   : > { %v7668_v63 = vpop.eup %7667  ;;  %5464 = vmatprep.mubr.bf16.mxu0 %v5284_v37  ;;  %v5286_v36 = vpack.c.bf16 %v5268_v11, %v5266_v52  ;;  %v5206_v49 = vadd.f32 1.0, %v7666_v51  ;;  %v5267_v43 = vmul.f32 %v5235_v46, %v10116_v57  ;;  %v5269_v31 = vmul.f32 %v5237_v38, %v10141_v7  ;;  %v10214_v57 = vld [vmem:[%s10512_s8] ss:$0 sm:$0xff] }
 0xe58   : > { %v7670_v28 = vpop.eup %7669  ;;  %v5207_v47 = vadd.f32 1.0, %v7668_v63 }
 0xe59   : > { %v5208_v13 = vadd.f32 1.0, %v7670_v28  ;;  %v5238_v44 = vmul.f32 0.5, %v5206_v49  ;;  %v5285_v54 = vpack.c.bf16 %v5267_v43, %v5265_v3  ;;  %v10668_v49 = vld [vmem:[#allocation31_spill] sm:$0xff]  ;;  %v10669_v43 = vld [vmem:[#allocation26_spill] sm:$0xff] }
 0xe5a   : > { %v5239_v39 = vmul.f32 0.5, %v5207_v47 }
 0xe5b   : > { %v5240_v1 = vmul.f32 0.5, %v5208_v13  ;;  %v5270_v48 = vmul.f32 %v5238_v44, %v10154_v61 }
 0xe5c   : > { %v5271_v59 = vmul.f32 %v5239_v39, %v10160_v27  ;;  %v10670_v39 = vld [vmem:[#allocation30_spill] sm:$0xff] }
 0xe5d   : > { %v5272_v23 = vmul.f32 %v5240_v1, %v10167_v16 }
 0xe5e   : > { %5465 = vmatmul.mubr.bf16.gmra.mrb[164].mxu0 %v5283_v35  ;;  %v5287_v15 = vpack.c.bf16 %v5271_v59, %v5269_v31 }
 0xe5f   : > { %5472 = vmatprep.mubr.bf16.mxu0 %v5286_v36  ;;  %v5288_v5 = vpack.c.bf16 %v5272_v23, %v5270_v48  ;;  %v10671_v48 = vld [vmem:[#allocation29_spill] sm:$0xff] }
 0xe66   : > { %5473 = vmatmul.mubr.bf16.gmra.mrb[168].mxu0 %v5285_v54 }
 0xe67   : > { %5480 = vmatprep.mubr.bf16.mxu0 %v5288_v5 }
 0xe6e   : > { %5481 = vmatmul.mubr.bf16.gmra.mrb[172].mxu0 %v5287_v15 }
 0xf01   : > { %v5426_v33 = vpop.f32.mrb[144].mxu0 }
 0xf02   : > { %v5427_v7 = vadd.f32 %v10214_v57, %v5426_v33  ;;  %v5428_v27 = vpop.f32.mrb[145].mxu0 }
 0xf03   : > { %v5429_v22 = vpop.f32.mrb[146].mxu0  ;;  %v10672_v27 = vld [vmem:[#allocation35_spill] sm:$0xff] }
 0xf04   : > { %v10218_v61 = vadd.f32 %v5427_v7, %v9790_v20  ;;  %v5430_v16 = vadd.f32 %v10214_v57, %v5429_v22  ;;  %v5431_v42 = vpop.f32.mrb[147].mxu0 }
 0xf06   : > { %v10222_v45 = vadd.f32 %v5430_v16, %v9793_v25  ;;  %5507 = vadd.xlane.f32.xlu0 %v10218_v61 }
 0xf08   : > { %5509 = vadd.xlane.f32.xlu1 %v10222_v45 }
 0xf0c   : > { %v5434_v17 = vpop.f32.mrb[148].mxu0 }
 0xf0d   : > { %v5435_v34 = vadd.f32 %v10214_v57, %v5434_v17  ;;  %v5436_v8 = vpop.f32.mrb[149].mxu0  ;;  %v10673_v17 = vld [vmem:[#allocation28_spill] sm:$0xff] }
 0xf0e   : > { %v5437_v56 = vpop.f32.mrb[150].mxu0 }
 0xf0f   : > { %v10228_v50 = vadd.f32 %v5435_v34, %v9802_v40  ;;  %v5438_v20 = vadd.f32 %v10214_v57, %v5437_v56  ;;  %v5439_v53 = vpop.f32.mrb[151].mxu0 }
 0xf11   : > { %v10232_v10 = vadd.f32 %v5438_v20, %v9805_v18  ;;  %5511 = vadd.xlane.f32.xlu0 %v10228_v50 }
 0xf13   : > { %5513 = vadd.xlane.f32.xlu1 %v10232_v10 }
 0xf16   : > { %v5442_v25 = vpop.f32.mrb[152].mxu0 }
 0xf17   : > { %v5443_v6 = vadd.f32 %v10214_v57, %v5442_v25  ;;  %v5444_v29 = vpop.f32.mrb[153].mxu0 }
 0xf18   : > { %v5445_v12 = vpop.f32.mrb[154].mxu0 }
 0xf19   : > { %v10238_v21 = vadd.f32 %v5443_v6, %v9817_v26  ;;  %v5446_v40 = vadd.f32 %v10214_v57, %v5445_v12  ;;  %v5447_v62 = vpop.f32.mrb[155].mxu0 }
 0xf1b   : > { %v10242_v2 = vadd.f32 %v5446_v40, %v9813_v55  ;;  %5515 = vadd.xlane.f32.xlu0 %v10238_v21 }
 0xf1d   : > { %5517 = vadd.xlane.f32.xlu1 %v10242_v2 }
 0xf21   : > { %v5450_v18 = vpop.f32.mrb[156].mxu0 }
 0xf22   : > { %v5451_v30 = vadd.f32 %v10214_v57, %v5450_v18  ;;  %v5452_v32 = vpop.f32.mrb[157].mxu0 }
 0xf23   : > { %v5453_v41 = vpop.f32.mrb[158].mxu0 }
 0xf24   : > { %v10248_v60 = vadd.f32 %v5451_v30, %v9829_v9  ;;  %v5454_v26 = vadd.f32 %v10214_v57, %v5453_v41  ;;  %v5455_v4 = vpop.f32.mrb[159].mxu0 }
 0xf26   : > { %v10252_v37 = vadd.f32 %v5454_v26, %v9825_v14  ;;  %5519 = vadd.xlane.f32.xlu0 %v10248_v60 }
 0xf28   : > { %5521 = vadd.xlane.f32.xlu1 %v10252_v37 }
 0xf29   : > { %v5458_v55 = vpop.f32.mrb[160].mxu0 }
 0xf2a   : > { %v5459_v19 = vadd.f32 %v10214_v57, %v5458_v55  ;;  %v5460_v0 = vpop.f32.mrb[161].mxu0 }
 0xf2b   : > { %v5461_v35 = vpop.f32.mrb[162].mxu0 }
 0xf2c   : > { %v10258_v52 = vadd.f32 %v5459_v19, %v9841_v58  ;;  %v5462_v9 = vadd.f32 %v10214_v57, %v5461_v35  ;;  %v5463_v11 = vpop.f32.mrb[163].mxu0 }
 0xf2e   : > { %v10262_v51 = vadd.f32 %v5462_v9, %v10667_v24  ;;  %5523 = vadd.xlane.f32.xlu0 %v10258_v52 }
 0xf30   : > { %5525 = vadd.xlane.f32.xlu1 %v10262_v51 }
 0xf31   : > { %v5466_v14 = vpop.f32.mrb[164].mxu0 }
 0xf32   : > { %v5467_v46 = vadd.f32 %v10214_v57, %v5466_v14  ;;  %v5468_v63 = vpop.f32.mrb[165].mxu0 }
 0xf33   : > { %v5469_v36 = vpop.f32.mrb[166].mxu0 }
 0xf34   : > { %v10268_v28 = vadd.f32 %v5467_v46, %v10668_v49  ;;  %v5470_v58 = vadd.f32 %v10214_v57, %v5469_v36  ;;  %v5471_v3 = vpop.f32.mrb[167].mxu0 }
 0xf36   : > { %v10272_v47 = vadd.f32 %v5470_v58, %v10669_v43  ;;  %5527 = vadd.xlane.f32.xlu0 %v10268_v28 }
 0xf38   : > { %5529 = vadd.xlane.f32.xlu1 %v10272_v47 }
 0xf39   : > { %v5474_v38 = vpop.f32.mrb[168].mxu0 }
 0xf3a   : > { %v5475_v13 = vadd.f32 %v10214_v57, %v5474_v38  ;;  %v5476_v44 = vpop.f32.mrb[169].mxu0 }
 0xf3b   : > { %v5477_v54 = vpop.f32.mrb[170].mxu0 }
 0xf3c   : > { %v10278_v1 = vadd.f32 %v5475_v13, %v10670_v39  ;;  %v5478_v31 = vadd.f32 %v10214_v57, %v5477_v54  ;;  %v5479_v59 = vpop.f32.mrb[171].mxu0 }
 0xf3e   : > { %v10282_v23 = vadd.f32 %v5478_v31, %v10671_v48  ;;  %5531 = vadd.xlane.f32.xlu0 %v10278_v1 }
 0xf40   : > { %5533 = vadd.xlane.f32.xlu1 %v10282_v23 }
 0xf41   : > { %v5482_v15 = vpop.f32.mrb[172].mxu0 }
 0xf42   : > { %v5483_v5 = vadd.f32 %v10214_v57, %v5482_v15  ;;  %v5484_v33 = vpop.f32.mrb[173].mxu0 }
 0xf43   : > { %v5485_v7 = vpop.f32.mrb[174].mxu0 }
 0xf44   : > { %v10288_v22 = vadd.f32 %v5483_v5, %v10672_v27  ;;  %v5486_v16 = vadd.f32 %v10214_v57, %v5485_v7  ;;  %v5487_v42 = vpop.f32.mrb[175].mxu0 }
 0xf46   : > { %v10292_v34 = vadd.f32 %v5486_v16, %v10673_v17  ;;  %5535 = vadd.xlane.f32.xlu0 %v10288_v22 }
 0xf48   : > { %5537 = vadd.xlane.f32.xlu1 %v10292_v34 }
 0xf93   : > { %v5508_v8 = vpop.xlane.xlu0 %5507 }
 0xf94   : > { %v5539_v56 = vmul.f32 0.0078125, %v5508_v8 }
 0xf95   : > { %v5510_v20 = vpop.xlane.xlu1 %5509 }
 0xf96   : > { %v10297_v53 = vsub.f32 %v10218_v61, %v5539_v56  ;;  %v5540_v25 = vmul.f32 0.0078125, %v5510_v20 }
 0xf98   : > { %v10300_v6 = vsub.f32 %v10222_v45, %v5540_v25  ;;  %v5571_v57 = vmul.f32 %v10297_v53, %v10297_v53 }
 0xf9a   : > { %5587 = vadd.xlane.f32.xlu0 %v5571_v57  ;;  %v5572_v29 = vmul.f32 %v10300_v6, %v10300_v6 }
 0xf9c   : > { %5589 = vadd.xlane.f32.xlu1 %v5572_v29 }
 0xf9e   : > { %v5512_v12 = vpop.xlane.xlu0 %5511 }
 0xf9f   : > { %v5541_v40 = vmul.f32 0.0078125, %v5512_v12 }
 0xfa0   : > { %v5514_v62 = vpop.xlane.xlu1 %5513 }
 0xfa1   : > { %v10307_v18 = vsub.f32 %v10228_v50, %v5541_v40  ;;  %v5542_v61 = vmul.f32 0.0078125, %v5514_v62 }
 0xfa3   : > { %v10310_v30 = vsub.f32 %v10232_v10, %v5542_v61  ;;  %v5573_v45 = vmul.f32 %v10307_v18, %v10307_v18  ;;  %v10379_v61 = vld [vmem:[%s10674_s12] ss:$0 sm:$0xff]  ;;  %s7815_s12 = scalar_lea.vmem %s7814_s13, 4096 }
 0xfa4   : > { %p7817_p0 = scmp.lt.s32.totalorder %s7815_s12, %s7809_s21 }
 0xfa5   : > { %5591 = vadd.xlane.f32.xlu0 %v5573_v45  ;;  %v5574_v32 = vmul.f32 %v10310_v30, %v10310_v30 }
 0xfa6   : > { %p7818_p2 = por %p7817_p0, %p7816_p4 }
 0xfa7   : > { %5593 = vadd.xlane.f32.xlu1 %v5574_v32 }
 0xfa8   : > { %v5516_v41 = vpop.xlane.xlu0 %5515  ;;  %p7819_p5 = pnand %p7818_p2, %p7812_p1 }
 0xfa9   : > { %v5543_v26 = vmul.f32 0.0078125, %v5516_v41 }
 0xfaa   : > { %v5518_v4 = vpop.xlane.xlu1 %5517 }
 0xfab   : > { %v10317_v55 = vsub.f32 %v10238_v21, %v5543_v26  ;;  %v5544_v50 = vmul.f32 0.0078125, %v5518_v4 }
 0xfad   : > { %v10320_v19 = vsub.f32 %v10242_v2, %v5544_v50  ;;  %v5575_v10 = vmul.f32 %v10317_v55, %v10317_v55  ;;  %v10385_v50 = vld [vmem:[%s10675_s22] ss:$0 sm:$0xff] }
 0xfaf   : > { %5595 = vadd.xlane.f32.xlu0 %v5575_v10  ;;  %v5576_v0 = vmul.f32 %v10320_v19, %v10320_v19 }
 0xfb1   : > { %5597 = vadd.xlane.f32.xlu1 %v5576_v0 }
 0xfb3   : > { %v5520_v35 = vpop.xlane.xlu0 %5519 }
 0xfb4   : > { %v5545_v9 = vmul.f32 0.0078125, %v5520_v35 }
 0xfb5   : > { %v5522_v11 = vpop.xlane.xlu1 %5521 }
 0xfb6   : > { %v10327_v24 = vsub.f32 %v10248_v60, %v5545_v9  ;;  %v5546_v21 = vmul.f32 0.0078125, %v5522_v11 }
 0xfb8   : > { %v10330_v14 = vsub.f32 %v10252_v37, %v5546_v21  ;;  %v5577_v2 = vmul.f32 %v10327_v24, %v10327_v24 }
 0xfba   : > { %5599 = vadd.xlane.f32.xlu0 %v5577_v2  ;;  %v5578_v46 = vmul.f32 %v10330_v14, %v10330_v14 }
 0xfbb   : > { %v5524_v63 = vpop.xlane.xlu0 %5523 }
 0xfbc   : > { %v5547_v36 = vmul.f32 0.0078125, %v5524_v63  ;;  %5601 = vadd.xlane.f32.xlu1 %v5578_v46 }
 0xfbd   : > { %v5526_v49 = vpop.xlane.xlu1 %5525 }
 0xfbe   : > { %v10337_v58 = vsub.f32 %v10258_v52, %v5547_v36  ;;  %v5548_v60 = vmul.f32 0.0078125, %v5526_v49 }
 0xfc0   : > { %v10340_v3 = vsub.f32 %v10262_v51, %v5548_v60  ;;  %v5579_v37 = vmul.f32 %v10337_v58, %v10337_v58 }
 0xfc2   : > { %5603 = vadd.xlane.f32.xlu0 %v5579_v37  ;;  %v5580_v43 = vmul.f32 %v10340_v3, %v10340_v3 }
 0xfc3   : > { %v5528_v38 = vpop.xlane.xlu0 %5527 }
 0xfc4   : > { %v5549_v13 = vmul.f32 0.0078125, %v5528_v38  ;;  %5605 = vadd.xlane.f32.xlu1 %v5580_v43 }
 0xfc5   : > { %v5530_v44 = vpop.xlane.xlu1 %5529 }
 0xfc6   : > { %v10347_v54 = vsub.f32 %v10268_v28, %v5549_v13  ;;  %v5550_v52 = vmul.f32 0.0078125, %v5530_v44 }
 0xfc8   : > { %v10350_v39 = vsub.f32 %v10272_v47, %v5550_v52  ;;  %v5581_v51 = vmul.f32 %v10347_v54, %v10347_v54 }
 0xfca   : > { %5607 = vadd.xlane.f32.xlu0 %v5581_v51  ;;  %v5582_v31 = vmul.f32 %v10350_v39, %v10350_v39 }
 0xfcb   : > { %v5532_v59 = vpop.xlane.xlu0 %5531 }
 0xfcc   : > { %v5551_v48 = vmul.f32 0.0078125, %v5532_v59  ;;  %5609 = vadd.xlane.f32.xlu1 %v5582_v31 }
 0xfcd   : > { %v5534_v15 = vpop.xlane.xlu1 %5533 }
 0xfce   : > { %v10357_v5 = vsub.f32 %v10278_v1, %v5551_v48  ;;  %v5552_v28 = vmul.f32 0.0078125, %v5534_v15 }
 0xfd0   : > { %v10360_v33 = vsub.f32 %v10282_v23, %v5552_v28  ;;  %v5583_v47 = vmul.f32 %v10357_v5, %v10357_v5 }
 0xfd2   : > { %5611 = vadd.xlane.f32.xlu0 %v5583_v47  ;;  %v5584_v7 = vmul.f32 %v10360_v33, %v10360_v33 }
 0xfd3   : > { %v5536_v27 = vpop.xlane.xlu0 %5535 }
 0xfd4   : > { %v5553_v16 = vmul.f32 0.0078125, %v5536_v27  ;;  %5613 = vadd.xlane.f32.xlu1 %v5584_v7 }
 0xfd5   : > { %v5538_v42 = vpop.xlane.xlu1 %5537 }
 0xfd6   : > { %v10367_v17 = vsub.f32 %v10288_v22, %v5553_v16  ;;  %v5554_v1 = vmul.f32 0.0078125, %v5538_v42 }
 0xfd8   : > { %v10370_v8 = vsub.f32 %v10292_v34, %v5554_v1  ;;  %v5585_v23 = vmul.f32 %v10367_v17, %v10367_v17 }
 0xfda   : > { %5615 = vadd.xlane.f32.xlu0 %v5585_v23  ;;  %v5586_v56 = vmul.f32 %v10370_v8, %v10370_v8 }
 0xfdc   : > { %5617 = vadd.xlane.f32.xlu1 %v5586_v56 }
0x1027   : > { %v5588_v20 = vpop.xlane.xlu0 %5587 }
0x1028   : > { %v5619_v25 = vmul.f32 0.0078125, %v5588_v20 }
0x1029   : > { %v5590_v57 = vpop.xlane.xlu1 %5589 }
0x102a   : > { %v5635_v29 = vadd.f32 1e-05, %v5619_v25  ;;  %v5620_v12 = vmul.f32 0.0078125, %v5590_v57 }
0x102c   : > { %7671 = vrsqrt.f32 %v5635_v29  ;;  %v5636_v22 = vadd.f32 1e-05, %v5620_v12 }
0x102e   : > { %7673 = vrsqrt.f32 %v5636_v22 }
0x1032   : > { %v5592_v40 = vpop.xlane.xlu0 %5591 }
0x1033   : > { %v5621_v62 = vmul.f32 0.0078125, %v5592_v40 }
0x1034   : > { %v5594_v45 = vpop.xlane.xlu1 %5593 }
0x1035   : > { %v5637_v41 = vadd.f32 1e-05, %v5621_v62  ;;  %v5622_v26 = vmul.f32 0.0078125, %v5594_v45 }
0x1036   : > { %v7672_v34 = vpop.eup %7671 }
0x1037   : > { %v5667_v32 = vmul.f32 %v7672_v34, %v10297_v53  ;;  %7675 = vrsqrt.f32 %v5637_v41  ;;  %v5638_v35 = vadd.f32 1e-05, %v5622_v26 }
0x1038   : > { %v7674_v4 = vpop.eup %7673 }
0x1039   : > { %v5689_v10 = vmul.f32 %v10379_v61, %v5667_v32  ;;  %v5668_v0 = vmul.f32 %v7674_v4, %v10300_v6  ;;  %7677 = vrsqrt.f32 %v5638_v35 }
0x103b   : > { %v5711_v9 = vadd.f32 %v10385_v50, %v5689_v10  ;;  %v5690_v11 = vmul.f32 %v10379_v61, %v5668_v0 }
0x103c   : > { %v5596_v21 = vpop.xlane.xlu0 %5595 }
0x103d   : > { %5727 = vst [vmem:[%s10393_s25] sm:$0xff] %v5711_v9  ;;  %v5712_v53 = vadd.f32 %v10385_v50, %v5690_v11  ;;  %v5623_v2 = vmul.f32 0.0078125, %v5596_v21 }
0x103e   : > { %v5598_v6 = vpop.xlane.xlu1 %5597 }
0x103f   : > { %5728 = vst [vmem:[%s10393_s25 + $0x8] sm:$0xff] %v5712_v53  ;;  %v5639_v46 = vadd.f32 1e-05, %v5623_v2  ;;  %v5624_v63 = vmul.f32 0.0078125, %v5598_v6 }
0x1041   : > { %v7676_v36 = vpop.eup %7675  ;;  %7679 = vrsqrt.f32 %v5639_v46  ;;  %v5640_v49 = vadd.f32 1e-05, %v5624_v63 }
0x1042   : > { %v5669_v60 = vmul.f32 %v7676_v36, %v10307_v18 }
0x1043   : > { %v7678_v37 = vpop.eup %7677  ;;  %7681 = vrsqrt.f32 %v5640_v49 }
0x1044   : > { %v5691_v43 = vmul.f32 %v10379_v61, %v5669_v60  ;;  %v5670_v38 = vmul.f32 %v7678_v37, %v10310_v30 }
0x1046   : > { %v5713_v13 = vadd.f32 %v10385_v50, %v5691_v43  ;;  %v5692_v44 = vmul.f32 %v10379_v61, %v5670_v38 }
0x1047   : > { %v5600_v52 = vpop.xlane.xlu0 %5599 }
0x1048   : > { %v5625_v51 = vmul.f32 0.0078125, %v5600_v52  ;;  %5729 = vst [vmem:[%s10393_s25 + $0x10] sm:$0xff] %v5713_v13  ;;  %v5714_v31 = vadd.f32 %v10385_v50, %v5692_v44 }
0x1049   : > { %v5602_v59 = vpop.xlane.xlu1 %5601 }
0x104a   : > { %v5641_v48 = vadd.f32 1e-05, %v5625_v51  ;;  %v5626_v15 = vmul.f32 0.0078125, %v5602_v59  ;;  %5730 = vst [vmem:[%s10393_s25 + $0x18] sm:$0xff] %v5714_v31 }
0x104b   : > { %v7680_v18 = vpop.eup %7679 }
0x104c   : > { %7683 = vrsqrt.f32 %v5641_v48  ;;  %v5642_v28 = vadd.f32 1e-05, %v5626_v15  ;;  %v5671_v47 = vmul.f32 %v7680_v18, %v10317_v55 }
0x104d   : > { %v7682_v30 = vpop.eup %7681 }
0x104e   : > { %7685 = vrsqrt.f32 %v5642_v28  ;;  %v5693_v7 = vmul.f32 %v10379_v61, %v5671_v47  ;;  %v5672_v27 = vmul.f32 %v7682_v30, %v10320_v19 }
0x104f   : > { %v5604_v16 = vpop.xlane.xlu0 %5603 }
0x1050   : > { %v5627_v42 = vmul.f32 0.0078125, %v5604_v16  ;;  %v5715_v1 = vadd.f32 %v10385_v50, %v5693_v7  ;;  %v5694_v23 = vmul.f32 %v10379_v61, %v5672_v27 }
0x1051   : > { %v5606_v56 = vpop.xlane.xlu1 %5605 }
0x1052   : > { %v5643_v20 = vadd.f32 1e-05, %v5627_v42  ;;  %v5628_v25 = vmul.f32 0.0078125, %v5606_v56  ;;  %5731 = vst [vmem:[%s10393_s25 + $0x20] sm:$0xff] %v5715_v1  ;;  %v5716_v57 = vadd.f32 %v10385_v50, %v5694_v23 }
0x1054   : > { %7687 = vrsqrt.f32 %v5643_v20  ;;  %v5644_v55 = vadd.f32 1e-05, %v5628_v25  ;;  %5732 = vst [vmem:[%s10393_s25 + $0x28] sm:$0xff] %v5716_v57 }
0x1056   : > { %v7684_v29 = vpop.eup %7683  ;;  %7689 = vrsqrt.f32 %v5644_v55 }
0x1057   : > { %v5673_v19 = vmul.f32 %v7684_v29, %v10327_v24  ;;  %v5608_v12 = vpop.xlane.xlu0 %5607 }
0x1058   : > { %v7686_v22 = vpop.eup %7685  ;;  %v5629_v40 = vmul.f32 0.0078125, %v5608_v12 }
0x1059   : > { %v5695_v62 = vmul.f32 %v10379_v61, %v5673_v19  ;;  %v5674_v34 = vmul.f32 %v7686_v22, %v10330_v14  ;;  %v5610_v45 = vpop.xlane.xlu1 %5609 }
0x105a   : > { %v5645_v32 = vadd.f32 1e-05, %v5629_v40  ;;  %v5630_v41 = vmul.f32 0.0078125, %v5610_v45 }
0x105b   : > { %v5717_v26 = vadd.f32 %v10385_v50, %v5695_v62  ;;  %v5696_v4 = vmul.f32 %v10379_v61, %v5674_v34 }
0x105c   : > { %7691 = vrsqrt.f32 %v5645_v32  ;;  %v5646_v10 = vadd.f32 1e-05, %v5630_v41 }
0x105d   : > { %5733 = vst [vmem:[%s10393_s25 + $0x30] sm:$0xff] %v5717_v26  ;;  %v5718_v24 = vadd.f32 %v10385_v50, %v5696_v4 }
0x105e   : > { %v7688_v0 = vpop.eup %7687  ;;  %7693 = vrsqrt.f32 %v5646_v10 }
0x105f   : > { %5734 = vst [vmem:[%s10393_s25 + $0x38] sm:$0xff] %v5718_v24  ;;  %v5675_v35 = vmul.f32 %v7688_v0, %v10337_v58  ;;  %v5612_v9 = vpop.xlane.xlu0 %5611 }
0x1060   : > { %v7690_v14 = vpop.eup %7689  ;;  %v5631_v11 = vmul.f32 0.0078125, %v5612_v9 }
0x1061   : > { %v5697_v53 = vmul.f32 %v10379_v61, %v5675_v35  ;;  %v5676_v21 = vmul.f32 %v7690_v14, %v10340_v3  ;;  %v5614_v2 = vpop.xlane.xlu1 %5613 }
0x1062   : > { %v5647_v6 = vadd.f32 1e-05, %v5631_v11  ;;  %v5632_v46 = vmul.f32 0.0078125, %v5614_v2 }
0x1063   : > { %v5719_v63 = vadd.f32 %v10385_v50, %v5697_v53  ;;  %v5698_v36 = vmul.f32 %v10379_v61, %v5676_v21 }
0x1064   : > { %7695 = vrsqrt.f32 %v5647_v6  ;;  %v5648_v49 = vadd.f32 1e-05, %v5632_v46 }
0x1065   : > { %5735 = vst [vmem:[%s10393_s25 + $0x40] sm:$0xff] %v5719_v63  ;;  %v5720_v58 = vadd.f32 %v10385_v50, %v5698_v36 }
0x1066   : > { %v7692_v60 = vpop.eup %7691  ;;  %7697 = vrsqrt.f32 %v5648_v49 }
0x1067   : > { %5736 = vst [vmem:[%s10393_s25 + $0x48] sm:$0xff] %v5720_v58  ;;  %v5677_v37 = vmul.f32 %v7692_v60, %v10347_v54  ;;  %v5616_v43 = vpop.xlane.xlu0 %5615 }
0x1068   : > { %v7694_v3 = vpop.eup %7693  ;;  %v5633_v38 = vmul.f32 0.0078125, %v5616_v43 }
0x1069   : > { %v5699_v13 = vmul.f32 %v10379_v61, %v5677_v37  ;;  %v5678_v44 = vmul.f32 %v7694_v3, %v10350_v39  ;;  %v5618_v52 = vpop.xlane.xlu1 %5617 }
0x106a   : > { %v5649_v51 = vadd.f32 1e-05, %v5633_v38  ;;  %v5634_v31 = vmul.f32 0.0078125, %v5618_v52 }
0x106b   : > { %v5721_v59 = vadd.f32 %v10385_v50, %v5699_v13  ;;  %v5700_v48 = vmul.f32 %v10379_v61, %v5678_v44 }
0x106c   : > { %7699 = vrsqrt.f32 %v5649_v51  ;;  %v5650_v15 = vadd.f32 1e-05, %v5634_v31 }
0x106d   : > { %5737 = vst [vmem:[%s10393_s25 + $0x50] sm:$0xff] %v5721_v59  ;;  %v5722_v54 = vadd.f32 %v10385_v50, %v5700_v48 }
0x106e   : > { %v7696_v18 = vpop.eup %7695  ;;  %7701 = vrsqrt.f32 %v5650_v15 }
0x106f   : > { %5738 = vst [vmem:[%s10393_s25 + $0x58] sm:$0xff] %v5722_v54  ;;  %v5679_v39 = vmul.f32 %v7696_v18, %v10357_v5 }
0x1070   : > { %v7698_v28 = vpop.eup %7697 }
0x1071   : > { %v5701_v47 = vmul.f32 %v10379_v61, %v5679_v39  ;;  %v5680_v30 = vmul.f32 %v7698_v28, %v10360_v33 }
0x1073   : > { %v5723_v7 = vadd.f32 %v10385_v50, %v5701_v47  ;;  %v5702_v27 = vmul.f32 %v10379_v61, %v5680_v30 }
0x1075   : > { %5739 = vst [vmem:[%s10393_s25 + $0x60] sm:$0xff] %v5723_v7  ;;  %v5724_v16 = vadd.f32 %v10385_v50, %v5702_v27 }
0x1076   : > { %v7700_v42 = vpop.eup %7699 }
0x1077   : > { %5740 = vst [vmem:[%s10393_s25 + $0x68] sm:$0xff] %v5724_v16  ;;  %v5681_v1 = vmul.f32 %v7700_v42, %v10367_v17 }
0x1078   : > { %v7702_v5 = vpop.eup %7701 }
0x1079   : > { %v5703_v23 = vmul.f32 %v10379_v61, %v5681_v1  ;;  %v5682_v33 = vmul.f32 %v7702_v5, %v10370_v8 }
0x107b   : > { %v5725_v56 = vadd.f32 %v10385_v50, %v5703_v23  ;;  %v5704_v20 = vmul.f32 %v10379_v61, %v5682_v33 }
0x107d   : > { %5741 = vst [vmem:[%s10393_s25 + $0x70] sm:$0xff] %v5725_v56  ;;  %v5726_v17 = vadd.f32 %v10385_v50, %v5704_v20 }
0x107f   : > { %5742 = vst [vmem:[%s10393_s25 + $0x78] sm:$0xff] %v5726_v17 }
0x1080   : > { %7822 = shalt.err (!%p7819_p5)
}
0x1081   : > { %s7823_s16 = scalar_lea.hbm %s10456_s17, 2048  ;;  %s7827_s25 = scalar_lea.hbm %s10677_s11, 8192 }
0x1082   : > { %p7824_p11 = scmp.ne.s32.totalorder %s10456_s17, %s7823_s16  ;;  %p7828_p6 = scmp.lt.u32.totalorder %s10456_s17, %s10677_s11 }
0x1083   : > { %p7829_p7 = scmp.lt.u32.totalorder %s7827_s25, %s7823_s16  ;;  %p7831_p8 = scmp.lt.u32.totalorder %s7823_s16, %s10456_s17 }
0x1084   : > { %p7825_p12 = pnand %p7824_p11, %p10678_p9 }
0x1085   : > { %p7830_p13 = por %p7829_p7, %p7828_p6 }
0x1086   : > { %p7826_p3 = pneg %p7825_p12 }
0x1087   : > { %p7832_p10 = por %p7831_p8, %p7830_p13 }
0x1089   : > { %p7833_p1 = pnand %p7832_p10, %p7826_p3 }
0x108b   : > { %7836 = shalt.err (!%p7833_p1)
}
0x108c   : > { %s7888_s19 = smov 128   ;;  %s7889_s21 = smov 512  }
0x108d   : > { %s7890_s30 = smov 8  }
0x108e   : > { %7160 = dma.vmem_to_hbm [thread:$0]  (%p10678_p9), %s10458_s20, 2048, %s10456_s17, %s5744_s29, %s7888_s19, %s7889_s21, %s7890_s30  }
0x108f PF: > { %s10679_s13 = sld [smem:[#allocation12_spill]]  ;;  %s10680_s12 = sld [smem:[#allocation16_spill]] }
0x1090   : > { %p7182_p4 = scmp.ge.s32.totalorder %s7879_s28, 2 }
0x1095   : > { %s5771_s24 = sand.u32 1, %s10679_s13   ;;  %p10681_p0 = scmp.ne.s32.totalorder %s10680_s12, 0 }
0x1096   : > { %s5772_s16 = scalar_lea.sflag [#allocation4], %s5771_s24 }
0x1097   : > { %p7174_p2 = pnand %p7182_p4, %p10681_p0 }
0x1099   : > { %7862 = dma.done.wait (!%p7174_p2), %s5772_s16, 2048  }
0x109a   : > { %7864 = vsyncadd (!%p7174_p2), %s5772_s16, 4294965248  ;;  %s10682_s28 = sld [smem:[#allocation13_spill]]  ;;  %s10683_s22 = sld [smem:[#allocation14_spill]] }
0x109b   : > { %s10684_s25 = smov %s7871_s26  ;;  %s10685_s26 = smov %s7875_s27 }
0x10a0   : > { %p27_p5 = scmp.ge.s32.totalorder %s10682_s28, 6   ;;  %s10686_s27 = smov %s10683_s22 }
0x10a2   :  { %29 = sbr.rel (!%p27_p5) target bundleno = 10 (0xa), region = 128 }
0x10a9   :  { %5777 = vsyncpa [#allocation3], 1 }
0x10aa   :  { %5779 = vsyncpa [#allocation3 + $0x1], 1 }
0x10ab   :  { %5780 = vsyncpa [#allocation6], 1 }
0x10ac   :  { %5781 = vsyncpa [#allocation4], 1 }
0x10ad   :  { %5783 = vsyncpa [#allocation4 + $0x1], 1 }

</bundles_post_ra>
